<compile_context>
chip_gen: v6e
topology: v6e:2x2x1
jax: 0.10.0
libtpu: 0.0.40
codegen_flags: <defaults>
</compile_context>

<pallas_src>
import math

import numpy as np
import jax
import jax.numpy as jnp
from jax.experimental import pallas as pl
from jax.experimental.pallas import tpu as pltpu

EPS = 1e-5  # nn.InstanceNorm3d default eps
TAPS = [(dz, dy, dx) for dz in (-1, 0, 1) for dy in (-1, 0, 1) for dx in (-1, 0, 1)]


def _up2_matrix_1d(L):
    """(L, 2L) linear upsample-by-2 matrix, PyTorch trilinear align_corners=False."""
    U = np.zeros((L, 2 * L), np.float32)
    for i in range(2 * L):
        src = max((i + 0.5) / 2.0 - 0.5, 0.0)
        i0 = int(math.floor(src))
        f = src - i0
        i1 = min(i0 + 1, L - 1)
        U[i0, i] += 1.0 - f
        U[i1, i] += f
    return U


def _boundary_masks(d, h, w):
    """(27, D*H*W) f32 masks: 1 where the tap's source voxel is in bounds, else 0."""
    dhw = d * h * w
    idx = np.arange(dhw)
    zc = idx // (h * w)
    yc = (idx // w) % h
    xc = idx % w
    m = np.empty((27, dhw), np.float32)
    for t, (dz, dy, dx) in enumerate(TAPS):
        ok = ((zc + dz >= 0) & (zc + dz < d) &
              (yc + dy >= 0) & (yc + dy < h) &
              (xc + dx >= 0) & (xc + dx < w))
        m[t] = ok.astype(np.float32)
    return m


def _make_kernel(n, c1, c2, cout, d, h, w):
    dhw = d * h * w
    rows1 = n * (c1 + c2)   # conv1 folded input rows (batch folded onto sublanes)
    rows2 = n * cout        # conv2 folded input rows == folded output rows

    def kernel(x1_ref, x2_ref, u3_ref, mask_ref, w1_ref, w2_ref, o_ref,
               src_ref, stack_ref):
        f32 = jnp.float32

        def conv3_in_relu(src, w_ref, rows):
            # 3x3x3 'same' conv: each tap = one XLU roll of the whole folded slab + one
            # precomputed boundary-mask multiply; the 27 shifted slabs are written into the
            # K-stacked VMEM scratch (tile-aligned row blocks) and contracted with a single
            # MXU matmul (K-accumulation inside the MXU, no per-tap pops / vector adds).
            for t, (dz, dy, dx) in enumerate(TAPS):
                s = dz * h * w + dy * w + dx
                col = src if s == 0 else pltpu.roll(src, shift=(-s) % dhw, axis=1)
                if (dz, dy, dx) != (0, 0, 0):
                    col = col * mask_ref[pl.ds(t, 1), :]   # zero wrapped / OOB positions
                stack_ref[pl.ds(t * rows, rows), :] = col
            acc = jnp.dot(w_ref[...], stack_ref[pl.ds(0, 27 * rows), :],
                          preferred_element_type=f32)
            # Conv bias omitted: InstanceNorm3d(affine=False) removes the per-(n, c) mean,
            # so a per-channel bias cancels exactly.
            # InstanceNorm3d (biased variance): per-(n, c) stats == per folded row.
            mu = jnp.mean(acc, axis=1, keepdims=True)
            ctr = acc - mu
            var = jnp.mean(ctr * ctr, axis=1, keepdims=True)
            return jnp.maximum(ctr * jax.lax.rsqrt(var + EPS), 0.0)

        # Trilinear x2 upsample of every (batch, channel) row at once: one matmul with the
        # precomputed (Ds*Hs*Ws, D*H*W) interpolation matrix.
        up = jnp.dot(x2_ref[...], u3_ref[...], preferred_element_type=f32)

        # Channel concat [skip, upsample]: two tile-aligned sublane copies.
        src_ref[pl.ds(0, n * c1), :] = x1_ref[...]
        src_ref[pl.ds(n * c1, n * c2), :] = up

        h1 = conv3_in_relu(src_ref[...], w1_ref, rows1)
        o_ref[...] = conv3_in_relu(h1, w2_ref, rows2)

    return kernel


def unet_up3_ct_forward(inputs1, inputs2, w1, b1, w2, b2):
    """UnetUp3_CT.forward.

    inputs1: (N, out_size, D, H, W) skip connection
    inputs2: (N, in_size, D/2, H/2, W/2) features from below
    w1/b1:   Conv3d(in_size+out_size, out_size, 3, padding=1) params (OIDHW / (O,))
    w2/b2:   Conv3d(out_size, out_size, 3, padding=1) params
    """
    del b1, b2  # exactly cancelled by InstanceNorm3d(affine=False) mean subtraction

    n, c2, ds, hs, ws = inputs2.shape
    d, h, w = 2 * ds, 2 * hs, 2 * ws
    c1 = inputs1.shape[1]
    cout = w1.shape[0]
    assert w1.shape[1] == c1 + c2 and w2.shape[0] == cout and w2.shape[1] == cout

    # F.pad(inputs1, 2 * [offset//2, offset//2, 0]) -- wrapper glue; a no-op in the standard
    # U-Net case where the skip already matches the upsampled size (offset == 0).
    off = d - inputs1.shape[2]
    a = off // 2
    if off != 0:
        inputs1 = jnp.pad(inputs1, ((0, 0), (0, 0), (a, 0), (0, a), (a, a)))
    assert inputs1.shape[2:] == (d, h, w), "skip-connection spatial size mismatch"

    dhw = d * h * w
    # Batch folded onto the sublane axis: (N*C, DHW) slabs, lane-dense spatial flatten.
    x1f = inputs1.reshape(n * c1, dhw).astype(jnp.float32)
    x2f = inputs2.reshape(n * c2, ds * hs * ws).astype(jnp.float32)

    # Precomputed trilinear interpolation matrix: up = x2_slab @ U3.
    u3 = jnp.asarray(np.kron(_up2_matrix_1d(ds),
                             np.kron(_up2_matrix_1d(hs), _up2_matrix_1d(ws))))
    masks = jnp.asarray(_boundary_masks(d, h, w))

    def tapify(wgt):
        # (Cout, Cin, 3, 3, 3) -> (27, Cout, Cin); tap index = (dz+1)*9 + (dy+1)*3 + (dx+1)
        co, ci = wgt.shape[0], wgt.shape[1]
        return jnp.transpose(wgt, (2, 3, 4, 0, 1)).reshape(27, co, ci).astype(jnp.float32)

    w1t, w2t = tapify(w1), tapify(w2)

    # Block-diagonal (over the folded batch) per-tap weights; the implicit channel concat
    # is realized by routing conv1's skip/upsample columns to the matching slab rows.
    # Then K-stack the 27 taps so each conv is ONE (N*Cout, 27*N*Cin) x (27*N*Cin, DHW) dot.
    cin1 = c1 + c2
    wf1 = jnp.zeros((27, n * cout, n * cin1), jnp.float32)
    wf2 = jnp.zeros((27, n * cout, n * cout), jnp.float32)
    for nn in range(n):
        ro = slice(nn * cout, (nn + 1) * cout)
        wf1 = wf1.at[:, ro, nn * c1:(nn + 1) * c1].set(w1t[:, :, :c1])
        wf1 = wf1.at[:, ro, n * c1 + nn * c2: n * c1 + (nn + 1) * c2].set(w1t[:, :, c1:])
        wf2 = wf2.at[:, ro, ro].set(w2t)
    w1s = jnp.transpose(wf1, (1, 0, 2)).reshape(n * cout, 27 * n * cin1)
    w2s = jnp.transpose(wf2, (1, 0, 2)).reshape(n * cout, 27 * n * cout)

    vmem = pl.BlockSpec(memory_space=pltpu.MemorySpace.VMEM)
    out = pl.pallas_call(
        _make_kernel(n, c1, c2, cout, d, h, w),
        out_shape=jax.ShapeDtypeStruct((n * cout, dhw), jnp.float32),
        in_specs=[vmem] * 6,
        out_specs=vmem,
        scratch_shapes=[
            pltpu.VMEM((n * cin1, dhw), jnp.float32),        # concat slab
            pltpu.VMEM((27 * n * cin1, dhw), jnp.float32),   # K-stack (rows reused by conv2)
        ],
    )(x1f, x2f, u3, masks, w1s, w2s)
    return out.reshape(n, cout, d, h, w)


# ----------------------------- pure-JAX reference ------------------------------------------
def _upsample2_trilinear_ref(x):
    def up_axis(v, axis):
        L = v.shape[axis]
        i = jnp.arange(2 * L)
        src = jnp.maximum((i + 0.5) / 2.0 - 0.5, 0.0)
        i0 = jnp.floor(src).astype(jnp.int32)
        f = (src - i0).astype(v.dtype)
        i1 = jnp.minimum(i0 + 1, L - 1)
        v0 = jnp.take(v, i0, axis=axis)
        v1 = jnp.take(v, i1, axis=axis)
        shape = [1] * v.ndim
        shape[axis] = 2 * L
        f = f.reshape(shape)
        return v0 * (1.0 - f) + v1 * f

    for ax in (2, 3, 4):
        x = up_axis(x, ax)
    return x


def reference(inputs1, inputs2, w1, b1, w2, b2):
    up = _upsample2_trilinear_ref(inputs2)
    off = up.shape[2] - inputs1.shape[2]
    a = off // 2
    if off != 0:
        inputs1 = jnp.pad(inputs1, ((0, 0), (0, 0), (a, 0), (0, a), (a, a)))
    xcat = jnp.concatenate([inputs1, up], axis=1)

    def conv_in_relu(z, wgt, bias):
        y = jax.lax.conv_general_dilated(
            z, wgt, window_strides=(1, 1, 1),
            padding=((1, 1), (1, 1), (1, 1)),
            dimension_numbers=("NCDHW", "OIDHW", "NCDHW"),
            precision=jax.lax.Precision.HIGHEST)
        y = y + bias[None, :, None, None, None]
        mu = jnp.mean(y, axis=(2, 3, 4), keepdims=True)
        var = jnp.mean((y - mu) ** 2, axis=(2, 3, 4), keepdims=True)
        y = (y - mu) * jax.lax.rsqrt(var + EPS)
        return jnp.maximum(y, 0.0)

    return conv_in_relu(conv_in_relu(xcat, w1, b1), w2, b2)


if __name__ == "__main__":
    # UnetUp3_CT(in_size=4, out_size=4): inputs2 (N, 4, 4, 4, 4), inputs1 (N, 4, 8, 8, 8).
    N, IN_SIZE, OUT_SIZE = 2, 4, 4
    DS = HS = WS = 4
    key = jax.random.PRNGKey(0)
    ks = jax.random.split(key, 6)
    inputs1 = jax.random.normal(ks[0], (N, OUT_SIZE, 2 * DS, 2 * HS, 2 * WS), jnp.float32)
    inputs2 = jax.random.normal(ks[1], (N, IN_SIZE, DS, HS, WS), jnp.float32)
    cin1 = IN_SIZE + OUT_SIZE
    w1 = 0.2 * jax.random.normal(ks[2], (OUT_SIZE, cin1, 3, 3, 3), jnp.float32)
    b1 = 0.1 * jax.random.normal(ks[3], (OUT_SIZE,), jnp.float32)
    w2 = 0.2 * jax.random.normal(ks[4], (OUT_SIZE, OUT_SIZE, 3, 3, 3), jnp.float32)
    b2 = 0.1 * jax.random.normal(ks[5], (OUT_SIZE,), jnp.float32)

    out = unet_up3_ct_forward(inputs1, inputs2, w1, b1, w2, b2)
    out = jax.block_until_ready(out)

    ref = reference(inputs1, inputs2, w1, b1, w2, b2)
    assert out.shape == ref.shape == (N, OUT_SIZE, 2 * DS, 2 * HS, 2 * WS)

    # Tolerances sized for DEFAULT-precision (single bf16 MXU pass, f32 accumulate) matmuls
    # through two conv+InstanceNorm stages; the HIGHEST-precision variant of the identical
    # kernel structure matched this f32 reference to 2e-3 max abs error.
    err = out - ref
    rel_rms = float(jnp.sqrt(jnp.mean(err * err) / jnp.mean(ref * ref)))
    max_err = float(jnp.max(jnp.abs(err)))
    assert rel_rms < 3e-2, f"rel_rms={rel_rms}, max_err={max_err}"
    assert jnp.allclose(out, ref, atol=1e-1, rtol=1e-1), f"rel_rms={rel_rms}, max_err={max_err}"
    print("KERNEL_OK")
</pallas_src>

<mosaic_0001>
module attributes {stable_mosaic.version = 11 : i64} {
  func.func @kernel(%arg0: memref<8x512xf32, #tpu.memory_space<vmem>>, %arg1: memref<8x64xf32, #tpu.memory_space<vmem>>, %arg2: memref<64x512xf32, #tpu.memory_space<vmem>>, %arg3: memref<27x512xf32, #tpu.memory_space<vmem>>, %arg4: memref<8x432xf32, #tpu.memory_space<vmem>>, %arg5: memref<8x216xf32, #tpu.memory_space<vmem>>, %arg6: memref<8x512xf32, #tpu.memory_space<vmem>>, %arg7: memref<16x512xf32, #tpu.memory_space<vmem>>, %arg8: memref<432x512xf32, #tpu.memory_space<vmem>>) attributes {dimension_semantics = [], scalar_prefetch = 0 : i64, scratch_operands = 2 : i64, tpu.core_type = #tpu.core_type<tc>} {
    %c0 = arith.constant 0 : index
    %c0_0 = arith.constant 0 : index
    %0 = vector.load %arg1[%c0, %c0_0] : memref<8x64xf32, #tpu.memory_space<vmem>>, vector<8x64xf32>
    %c0_1 = arith.constant 0 : index
    %c0_2 = arith.constant 0 : index
    %1 = vector.load %arg2[%c0_1, %c0_2] : memref<64x512xf32, #tpu.memory_space<vmem>>, vector<64x512xf32>
    %cst = arith.constant dense<0.000000e+00> : vector<8x512xf32>
    %2 = tpu.matmul %0, %1, %cst {dimension_numbers = #tpu.dot_dimension_numbers<[1], [0], [0], [1], [0, 0, 1, 1], [], []>} : vector<8x64xf32>, vector<64x512xf32>, vector<8x512xf32> -> vector<8x512xf32>
    %c0_3 = arith.constant 0 : index
    %c0_4 = arith.constant 0 : index
    %3 = vector.load %arg0[%c0_3, %c0_4] : memref<8x512xf32, #tpu.memory_space<vmem>>, vector<8x512xf32>
    %c0_5 = arith.constant 0 : index
    %c0_6 = arith.constant 0 : index
    %4 = vector.load %arg7[%c0_5, %c0_6] : memref<16x512xf32, #tpu.memory_space<vmem>>, vector<8x512xf32>
    tpu.vector_store %arg7[%c0_5, %c0_6], %3 {strides = array<i32>} : memref<16x512xf32, #tpu.memory_space<vmem>>, vector<8x512xf32>,
    %c8 = arith.constant 8 : index
    %c0_7 = arith.constant 0 : index
    %5 = vector.load %arg7[%c8, %c0_7] : memref<16x512xf32, #tpu.memory_space<vmem>>, vector<8x512xf32>
    tpu.vector_store %arg7[%c8, %c0_7], %2 {strides = array<i32>} : memref<16x512xf32, #tpu.memory_space<vmem>>, vector<8x512xf32>,
    %c0_8 = arith.constant 0 : index
    %c0_9 = arith.constant 0 : index
    %6 = vector.load %arg7[%c0_8, %c0_9] : memref<16x512xf32, #tpu.memory_space<vmem>>, vector<16x512xf32>
    %c73_i32 = arith.constant 73 : i32
    %7 = tpu.dynamic_rotate %6 by %c73_i32 dim 1 : vector<16x512xf32>, i32 -> vector<16x512xf32>
    %c0_10 = arith.constant 0 : index
    %c0_11 = arith.constant 0 : index
    %8 = vector.load %arg3[%c0_10, %c0_11] : memref<27x512xf32, #tpu.memory_space<vmem>>, vector<1x512xf32>
    %9 = vector.broadcast %8 : vector<1x512xf32> to vector<16x512xf32>
    %10 = arith.mulf %7, %9 : vector<16x512xf32>
    %c0_12 = arith.constant 0 : index
    %c0_13 = arith.constant 0 : index
    %11 = vector.load %arg8[%c0_12, %c0_13] : memref<432x512xf32, #tpu.memory_space<vmem>>, vector<16x512xf32>
    tpu.vector_store %arg8[%c0_12, %c0_13], %10 {strides = array<i32>} : memref<432x512xf32, #tpu.memory_space<vmem>>, vector<16x512xf32>,
    %c72_i32 = arith.constant 72 : i32
    %12 = tpu.dynamic_rotate %6 by %c72_i32 dim 1 : vector<16x512xf32>, i32 -> vector<16x512xf32>
    %c1 = arith.constant 1 : index
    %c0_14 = arith.constant 0 : index
    %13 = vector.load %arg3[%c1, %c0_14] : memref<27x512xf32, #tpu.memory_space<vmem>>, vector<1x512xf32>
    %14 = vector.broadcast %13 : vector<1x512xf32> to vector<16x512xf32>
    %15 = arith.mulf %12, %14 : vector<16x512xf32>
    %c16 = arith.constant 16 : index
    %c0_15 = arith.constant 0 : index
    %16 = vector.load %arg8[%c16, %c0_15] : memref<432x512xf32, #tpu.memory_space<vmem>>, vector<16x512xf32>
    tpu.vector_store %arg8[%c16, %c0_15], %15 {strides = array<i32>} : memref<432x512xf32, #tpu.memory_space<vmem>>, vector<16x512xf32>,
    %c71_i32 = arith.constant 71 : i32
    %17 = tpu.dynamic_rotate %6 by %c71_i32 dim 1 : vector<16x512xf32>, i32 -> vector<16x512xf32>
    %c2 = arith.constant 2 : index
    %c0_16 = arith.constant 0 : index
    %18 = vector.load %arg3[%c2, %c0_16] : memref<27x512xf32, #tpu.memory_space<vmem>>, vector<1x512xf32>
    %19 = vector.broadcast %18 : vector<1x512xf32> to vector<16x512xf32>
    %20 = arith.mulf %17, %19 : vector<16x512xf32>
    %c32 = arith.constant 32 : index
    %c0_17 = arith.constant 0 : index
    %21 = vector.load %arg8[%c32, %c0_17] : memref<432x512xf32, #tpu.memory_space<vmem>>, vector<16x512xf32>
    tpu.vector_store %arg8[%c32, %c0_17], %20 {strides = array<i32>} : memref<432x512xf32, #tpu.memory_space<vmem>>, vector<16x512xf32>,
    %c65_i32 = arith.constant 65 : i32
    %22 = tpu.dynamic_rotate %6 by %c65_i32 dim 1 : vector<16x512xf32>, i32 -> vector<16x512xf32>
    %c3 = arith.constant 3 : index
    %c0_18 = arith.constant 0 : index
    %23 = vector.load %arg3[%c3, %c0_18] : memref<27x512xf32, #tpu.memory_space<vmem>>, vector<1x512xf32>
    %24 = vector.broadcast %23 : vector<1x512xf32> to vector<16x512xf32>
    %25 = arith.mulf %22, %24 : vector<16x512xf32>
    %c48 = arith.constant 48 : index
    %c0_19 = arith.constant 0 : index
    %26 = vector.load %arg8[%c48, %c0_19] : memref<432x512xf32, #tpu.memory_space<vmem>>, vector<16x512xf32>
    tpu.vector_store %arg8[%c48, %c0_19], %25 {strides = array<i32>} : memref<432x512xf32, #tpu.memory_space<vmem>>, vector<16x512xf32>,
    %c64_i32 = arith.constant 64 : i32
    %27 = tpu.dynamic_rotate %6 by %c64_i32 dim 1 : vector<16x512xf32>, i32 -> vector<16x512xf32>
    %c4 = arith.constant 4 : index
    %c0_20 = arith.constant 0 : index
    %28 = vector.load %arg3[%c4, %c0_20] : memref<27x512xf32, #tpu.memory_space<vmem>>, vector<1x512xf32>
    %29 = vector.broadcast %28 : vector<1x512xf32> to vector<16x512xf32>
    %30 = arith.mulf %27, %29 : vector<16x512xf32>
    %c64 = arith.constant 64 : index
    %c0_21 = arith.constant 0 : index
    %31 = vector.load %arg8[%c64, %c0_21] : memref<432x512xf32, #tpu.memory_space<vmem>>, vector<16x512xf32>
    tpu.vector_store %arg8[%c64, %c0_21], %30 {strides = array<i32>} : memref<432x512xf32, #tpu.memory_space<vmem>>, vector<16x512xf32>,
    %c63_i32 = arith.constant 63 : i32
    %32 = tpu.dynamic_rotate %6 by %c63_i32 dim 1 : vector<16x512xf32>, i32 -> vector<16x512xf32>
    %c5 = arith.constant 5 : index
    %c0_22 = arith.constant 0 : index
    %33 = vector.load %arg3[%c5, %c0_22] : memref<27x512xf32, #tpu.memory_space<vmem>>, vector<1x512xf32>
    %34 = vector.broadcast %33 : vector<1x512xf32> to vector<16x512xf32>
    %35 = arith.mulf %32, %34 : vector<16x512xf32>
    %c80 = arith.constant 80 : index
    %c0_23 = arith.constant 0 : index
    %36 = vector.load %arg8[%c80, %c0_23] : memref<432x512xf32, #tpu.memory_space<vmem>>, vector<16x512xf32>
    tpu.vector_store %arg8[%c80, %c0_23], %35 {strides = array<i32>} : memref<432x512xf32, #tpu.memory_space<vmem>>, vector<16x512xf32>,
    %c57_i32 = arith.constant 57 : i32
    %37 = tpu.dynamic_rotate %6 by %c57_i32 dim 1 : vector<16x512xf32>, i32 -> vector<16x512xf32>
    %c6 = arith.constant 6 : index
    %c0_24 = arith.constant 0 : index
    %38 = vector.load %arg3[%c6, %c0_24] : memref<27x512xf32, #tpu.memory_space<vmem>>, vector<1x512xf32>
    %39 = vector.broadcast %38 : vector<1x512xf32> to vector<16x512xf32>
    %40 = arith.mulf %37, %39 : vector<16x512xf32>
    %c96 = arith.constant 96 : index
    %c0_25 = arith.constant 0 : index
    %41 = vector.load %arg8[%c96, %c0_25] : memref<432x512xf32, #tpu.memory_space<vmem>>, vector<16x512xf32>
    tpu.vector_store %arg8[%c96, %c0_25], %40 {strides = array<i32>} : memref<432x512xf32, #tpu.memory_space<vmem>>, vector<16x512xf32>,
    %c56_i32 = arith.constant 56 : i32
    %42 = tpu.dynamic_rotate %6 by %c56_i32 dim 1 : vector<16x512xf32>, i32 -> vector<16x512xf32>
    %c7 = arith.constant 7 : index
    %c0_26 = arith.constant 0 : index
    %43 = vector.load %arg3[%c7, %c0_26] : memref<27x512xf32, #tpu.memory_space<vmem>>, vector<1x512xf32>
    %44 = vector.broadcast %43 : vector<1x512xf32> to vector<16x512xf32>
    %45 = arith.mulf %42, %44 : vector<16x512xf32>
    %c112 = arith.constant 112 : index
    %c0_27 = arith.constant 0 : index
    %46 = vector.load %arg8[%c112, %c0_27] : memref<432x512xf32, #tpu.memory_space<vmem>>, vector<16x512xf32>
    tpu.vector_store %arg8[%c112, %c0_27], %45 {strides = array<i32>} : memref<432x512xf32, #tpu.memory_space<vmem>>, vector<16x512xf32>,
    %c55_i32 = arith.constant 55 : i32
    %47 = tpu.dynamic_rotate %6 by %c55_i32 dim 1 : vector<16x512xf32>, i32 -> vector<16x512xf32>
    %c8_28 = arith.constant 8 : index
    %c0_29 = arith.constant 0 : index
    %48 = vector.load %arg3[%c8_28, %c0_29] : memref<27x512xf32, #tpu.memory_space<vmem>>, vector<1x512xf32>
    %49 = vector.broadcast %48 : vector<1x512xf32> to vector<16x512xf32>
    %50 = arith.mulf %47, %49 : vector<16x512xf32>
    %c128 = arith.constant 128 : index
    %c0_30 = arith.constant 0 : index
    %51 = vector.load %arg8[%c128, %c0_30] : memref<432x512xf32, #tpu.memory_space<vmem>>, vector<16x512xf32>
    tpu.vector_store %arg8[%c128, %c0_30], %50 {strides = array<i32>} : memref<432x512xf32, #tpu.memory_space<vmem>>, vector<16x512xf32>,
    %c9_i32 = arith.constant 9 : i32
    %52 = tpu.dynamic_rotate %6 by %c9_i32 dim 1 : vector<16x512xf32>, i32 -> vector<16x512xf32>
    %c9 = arith.constant 9 : index
    %c0_31 = arith.constant 0 : index
    %53 = vector.load %arg3[%c9, %c0_31] : memref<27x512xf32, #tpu.memory_space<vmem>>, vector<1x512xf32>
    %54 = vector.broadcast %53 : vector<1x512xf32> to vector<16x512xf32>
    %55 = arith.mulf %52, %54 : vector<16x512xf32>
    %c144 = arith.constant 144 : index
    %c0_32 = arith.constant 0 : index
    %56 = vector.load %arg8[%c144, %c0_32] : memref<432x512xf32, #tpu.memory_space<vmem>>, vector<16x512xf32>
    tpu.vector_store %arg8[%c144, %c0_32], %55 {strides = array<i32>} : memref<432x512xf32, #tpu.memory_space<vmem>>, vector<16x512xf32>,
    %c8_i32 = arith.constant 8 : i32
    %57 = tpu.dynamic_rotate %6 by %c8_i32 dim 1 : vector<16x512xf32>, i32 -> vector<16x512xf32>
    %c10 = arith.constant 10 : index
    %c0_33 = arith.constant 0 : index
    %58 = vector.load %arg3[%c10, %c0_33] : memref<27x512xf32, #tpu.memory_space<vmem>>, vector<1x512xf32>
    %59 = vector.broadcast %58 : vector<1x512xf32> to vector<16x512xf32>
    %60 = arith.mulf %57, %59 : vector<16x512xf32>
    %c160 = arith.constant 160 : index
    %c0_34 = arith.constant 0 : index
    %61 = vector.load %arg8[%c160, %c0_34] : memref<432x512xf32, #tpu.memory_space<vmem>>, vector<16x512xf32>
    tpu.vector_store %arg8[%c160, %c0_34], %60 {strides = array<i32>} : memref<432x512xf32, #tpu.memory_space<vmem>>, vector<16x512xf32>,
    %c7_i32 = arith.constant 7 : i32
    %62 = tpu.dynamic_rotate %6 by %c7_i32 dim 1 : vector<16x512xf32>, i32 -> vector<16x512xf32>
    %c11 = arith.constant 11 : index
    %c0_35 = arith.constant 0 : index
    %63 = vector.load %arg3[%c11, %c0_35] : memref<27x512xf32, #tpu.memory_space<vmem>>, vector<1x512xf32>
    %64 = vector.broadcast %63 : vector<1x512xf32> to vector<16x512xf32>
    %65 = arith.mulf %62, %64 : vector<16x512xf32>
    %c176 = arith.constant 176 : index
    %c0_36 = arith.constant 0 : index
    %66 = vector.load %arg8[%c176, %c0_36] : memref<432x512xf32, #tpu.memory_space<vmem>>, vector<16x512xf32>
    tpu.vector_store %arg8[%c176, %c0_36], %65 {strides = array<i32>} : memref<432x512xf32, #tpu.memory_space<vmem>>, vector<16x512xf32>,
    %c1_i32 = arith.constant 1 : i32
    %67 = tpu.dynamic_rotate %6 by %c1_i32 dim 1 : vector<16x512xf32>, i32 -> vector<16x512xf32>
    %c12 = arith.constant 12 : index
    %c0_37 = arith.constant 0 : index
    %68 = vector.load %arg3[%c12, %c0_37] : memref<27x512xf32, #tpu.memory_space<vmem>>, vector<1x512xf32>
    %69 = vector.broadcast %68 : vector<1x512xf32> to vector<16x512xf32>
    %70 = arith.mulf %67, %69 : vector<16x512xf32>
    %c192 = arith.constant 192 : index
    %c0_38 = arith.constant 0 : index
    %71 = vector.load %arg8[%c192, %c0_38] : memref<432x512xf32, #tpu.memory_space<vmem>>, vector<16x512xf32>
    tpu.vector_store %arg8[%c192, %c0_38], %70 {strides = array<i32>} : memref<432x512xf32, #tpu.memory_space<vmem>>, vector<16x512xf32>,
    %c208 = arith.constant 208 : index
    %c0_39 = arith.constant 0 : index
    %72 = vector.load %arg8[%c208, %c0_39] : memref<432x512xf32, #tpu.memory_space<vmem>>, vector<16x512xf32>
    tpu.vector_store %arg8[%c208, %c0_39], %6 {strides = array<i32>} : memref<432x512xf32, #tpu.memory_space<vmem>>, vector<16x512xf32>,
    %c511_i32 = arith.constant 511 : i32
    %73 = tpu.dynamic_rotate %6 by %c511_i32 dim 1 : vector<16x512xf32>, i32 -> vector<16x512xf32>
    %c14 = arith.constant 14 : index
    %c0_40 = arith.constant 0 : index
    %74 = vector.load %arg3[%c14, %c0_40] : memref<27x512xf32, #tpu.memory_space<vmem>>, vector<1x512xf32>
    %75 = vector.broadcast %74 : vector<1x512xf32> to vector<16x512xf32>
    %76 = arith.mulf %73, %75 : vector<16x512xf32>
    %c224 = arith.constant 224 : index
    %c0_41 = arith.constant 0 : index
    %77 = vector.load %arg8[%c224, %c0_41] : memref<432x512xf32, #tpu.memory_space<vmem>>, vector<16x512xf32>
    tpu.vector_store %arg8[%c224, %c0_41], %76 {strides = array<i32>} : memref<432x512xf32, #tpu.memory_space<vmem>>, vector<16x512xf32>,
    %c505_i32 = arith.constant 505 : i32
    %78 = tpu.dynamic_rotate %6 by %c505_i32 dim 1 : vector<16x512xf32>, i32 -> vector<16x512xf32>
    %c15 = arith.constant 15 : index
    %c0_42 = arith.constant 0 : index
    %79 = vector.load %arg3[%c15, %c0_42] : memref<27x512xf32, #tpu.memory_space<vmem>>, vector<1x512xf32>
    %80 = vector.broadcast %79 : vector<1x512xf32> to vector<16x512xf32>
    %81 = arith.mulf %78, %80 : vector<16x512xf32>
    %c240 = arith.constant 240 : index
    %c0_43 = arith.constant 0 : index
    %82 = vector.load %arg8[%c240, %c0_43] : memref<432x512xf32, #tpu.memory_space<vmem>>, vector<16x512xf32>
    tpu.vector_store %arg8[%c240, %c0_43], %81 {strides = array<i32>} : memref<432x512xf32, #tpu.memory_space<vmem>>, vector<16x512xf32>,
    %c504_i32 = arith.constant 504 : i32
    %83 = tpu.dynamic_rotate %6 by %c504_i32 dim 1 : vector<16x512xf32>, i32 -> vector<16x512xf32>
    %c16_44 = arith.constant 16 : index
    %c0_45 = arith.constant 0 : index
    %84 = vector.load %arg3[%c16_44, %c0_45] : memref<27x512xf32, #tpu.memory_space<vmem>>, vector<1x512xf32>
    %85 = vector.broadcast %84 : vector<1x512xf32> to vector<16x512xf32>
    %86 = arith.mulf %83, %85 : vector<16x512xf32>
    %c256 = arith.constant 256 : index
    %c0_46 = arith.constant 0 : index
    %87 = vector.load %arg8[%c256, %c0_46] : memref<432x512xf32, #tpu.memory_space<vmem>>, vector<16x512xf32>
    tpu.vector_store %arg8[%c256, %c0_46], %86 {strides = array<i32>} : memref<432x512xf32, #tpu.memory_space<vmem>>, vector<16x512xf32>,
    %c503_i32 = arith.constant 503 : i32
    %88 = tpu.dynamic_rotate %6 by %c503_i32 dim 1 : vector<16x512xf32>, i32 -> vector<16x512xf32>
    %c17 = arith.constant 17 : index
    %c0_47 = arith.constant 0 : index
    %89 = vector.load %arg3[%c17, %c0_47] : memref<27x512xf32, #tpu.memory_space<vmem>>, vector<1x512xf32>
    %90 = vector.broadcast %89 : vector<1x512xf32> to vector<16x512xf32>
    %91 = arith.mulf %88, %90 : vector<16x512xf32>
    %c272 = arith.constant 272 : index
    %c0_48 = arith.constant 0 : index
    %92 = vector.load %arg8[%c272, %c0_48] : memref<432x512xf32, #tpu.memory_space<vmem>>, vector<16x512xf32>
    tpu.vector_store %arg8[%c272, %c0_48], %91 {strides = array<i32>} : memref<432x512xf32, #tpu.memory_space<vmem>>, vector<16x512xf32>,
    %c457_i32 = arith.constant 457 : i32
    %93 = tpu.dynamic_rotate %6 by %c457_i32 dim 1 : vector<16x512xf32>, i32 -> vector<16x512xf32>
    %c18 = arith.constant 18 : index
    %c0_49 = arith.constant 0 : index
    %94 = vector.load %arg3[%c18, %c0_49] : memref<27x512xf32, #tpu.memory_space<vmem>>, vector<1x512xf32>
    %95 = vector.broadcast %94 : vector<1x512xf32> to vector<16x512xf32>
    %96 = arith.mulf %93, %95 : vector<16x512xf32>
    %c288 = arith.constant 288 : index
    %c0_50 = arith.constant 0 : index
    %97 = vector.load %arg8[%c288, %c0_50] : memref<432x512xf32, #tpu.memory_space<vmem>>, vector<16x512xf32>
    tpu.vector_store %arg8[%c288, %c0_50], %96 {strides = array<i32>} : memref<432x512xf32, #tpu.memory_space<vmem>>, vector<16x512xf32>,
    %c456_i32 = arith.constant 456 : i32
    %98 = tpu.dynamic_rotate %6 by %c456_i32 dim 1 : vector<16x512xf32>, i32 -> vector<16x512xf32>
    %c19 = arith.constant 19 : index
    %c0_51 = arith.constant 0 : index
    %99 = vector.load %arg3[%c19, %c0_51] : memref<27x512xf32, #tpu.memory_space<vmem>>, vector<1x512xf32>
    %100 = vector.broadcast %99 : vector<1x512xf32> to vector<16x512xf32>
    %101 = arith.mulf %98, %100 : vector<16x512xf32>
    %c304 = arith.constant 304 : index
    %c0_52 = arith.constant 0 : index
    %102 = vector.load %arg8[%c304, %c0_52] : memref<432x512xf32, #tpu.memory_space<vmem>>, vector<16x512xf32>
    tpu.vector_store %arg8[%c304, %c0_52], %101 {strides = array<i32>} : memref<432x512xf32, #tpu.memory_space<vmem>>, vector<16x512xf32>,
    %c455_i32 = arith.constant 455 : i32
    %103 = tpu.dynamic_rotate %6 by %c455_i32 dim 1 : vector<16x512xf32>, i32 -> vector<16x512xf32>
    %c20 = arith.constant 20 : index
    %c0_53 = arith.constant 0 : index
    %104 = vector.load %arg3[%c20, %c0_53] : memref<27x512xf32, #tpu.memory_space<vmem>>, vector<1x512xf32>
    %105 = vector.broadcast %104 : vector<1x512xf32> to vector<16x512xf32>
    %106 = arith.mulf %103, %105 : vector<16x512xf32>
    %c320 = arith.constant 320 : index
    %c0_54 = arith.constant 0 : index
    %107 = vector.load %arg8[%c320, %c0_54] : memref<432x512xf32, #tpu.memory_space<vmem>>, vector<16x512xf32>
    tpu.vector_store %arg8[%c320, %c0_54], %106 {strides = array<i32>} : memref<432x512xf32, #tpu.memory_space<vmem>>, vector<16x512xf32>,
    %c449_i32 = arith.constant 449 : i32
    %108 = tpu.dynamic_rotate %6 by %c449_i32 dim 1 : vector<16x512xf32>, i32 -> vector<16x512xf32>
    %c21 = arith.constant 21 : index
    %c0_55 = arith.constant 0 : index
    %109 = vector.load %arg3[%c21, %c0_55] : memref<27x512xf32, #tpu.memory_space<vmem>>, vector<1x512xf32>
    %110 = vector.broadcast %109 : vector<1x512xf32> to vector<16x512xf32>
    %111 = arith.mulf %108, %110 : vector<16x512xf32>
    %c336 = arith.constant 336 : index
    %c0_56 = arith.constant 0 : index
    %112 = vector.load %arg8[%c336, %c0_56] : memref<432x512xf32, #tpu.memory_space<vmem>>, vector<16x512xf32>
    tpu.vector_store %arg8[%c336, %c0_56], %111 {strides = array<i32>} : memref<432x512xf32, #tpu.memory_space<vmem>>, vector<16x512xf32>,
    %c448_i32 = arith.constant 448 : i32
    %113 = tpu.dynamic_rotate %6 by %c448_i32 dim 1 : vector<16x512xf32>, i32 -> vector<16x512xf32>
    %c22 = arith.constant 22 : index
    %c0_57 = arith.constant 0 : index
    %114 = vector.load %arg3[%c22, %c0_57] : memref<27x512xf32, #tpu.memory_space<vmem>>, vector<1x512xf32>
    %115 = vector.broadcast %114 : vector<1x512xf32> to vector<16x512xf32>
    %116 = arith.mulf %113, %115 : vector<16x512xf32>
    %c352 = arith.constant 352 : index
    %c0_58 = arith.constant 0 : index
    %117 = vector.load %arg8[%c352, %c0_58] : memref<432x512xf32, #tpu.memory_space<vmem>>, vector<16x512xf32>
    tpu.vector_store %arg8[%c352, %c0_58], %116 {strides = array<i32>} : memref<432x512xf32, #tpu.memory_space<vmem>>, vector<16x512xf32>,
    %c447_i32 = arith.constant 447 : i32
    %118 = tpu.dynamic_rotate %6 by %c447_i32 dim 1 : vector<16x512xf32>, i32 -> vector<16x512xf32>
    %c23 = arith.constant 23 : index
    %c0_59 = arith.constant 0 : index
    %119 = vector.load %arg3[%c23, %c0_59] : memref<27x512xf32, #tpu.memory_space<vmem>>, vector<1x512xf32>
    %120 = vector.broadcast %119 : vector<1x512xf32> to vector<16x512xf32>
    %121 = arith.mulf %118, %120 : vector<16x512xf32>
    %c368 = arith.constant 368 : index
    %c0_60 = arith.constant 0 : index
    %122 = vector.load %arg8[%c368, %c0_60] : memref<432x512xf32, #tpu.memory_space<vmem>>, vector<16x512xf32>
    tpu.vector_store %arg8[%c368, %c0_60], %121 {strides = array<i32>} : memref<432x512xf32, #tpu.memory_space<vmem>>, vector<16x512xf32>,
    %c441_i32 = arith.constant 441 : i32
    %123 = tpu.dynamic_rotate %6 by %c441_i32 dim 1 : vector<16x512xf32>, i32 -> vector<16x512xf32>
    %c24 = arith.constant 24 : index
    %c0_61 = arith.constant 0 : index
    %124 = vector.load %arg3[%c24, %c0_61] : memref<27x512xf32, #tpu.memory_space<vmem>>, vector<1x512xf32>
    %125 = vector.broadcast %124 : vector<1x512xf32> to vector<16x512xf32>
    %126 = arith.mulf %123, %125 : vector<16x512xf32>
    %c384 = arith.constant 384 : index
    %c0_62 = arith.constant 0 : index
    %127 = vector.load %arg8[%c384, %c0_62] : memref<432x512xf32, #tpu.memory_space<vmem>>, vector<16x512xf32>
    tpu.vector_store %arg8[%c384, %c0_62], %126 {strides = array<i32>} : memref<432x512xf32, #tpu.memory_space<vmem>>, vector<16x512xf32>,
    %c440_i32 = arith.constant 440 : i32
    %128 = tpu.dynamic_rotate %6 by %c440_i32 dim 1 : vector<16x512xf32>, i32 -> vector<16x512xf32>
    %c25 = arith.constant 25 : index
    %c0_63 = arith.constant 0 : index
    %129 = vector.load %arg3[%c25, %c0_63] : memref<27x512xf32, #tpu.memory_space<vmem>>, vector<1x512xf32>
    %130 = vector.broadcast %129 : vector<1x512xf32> to vector<16x512xf32>
    %131 = arith.mulf %128, %130 : vector<16x512xf32>
    %c400 = arith.constant 400 : index
    %c0_64 = arith.constant 0 : index
    %132 = vector.load %arg8[%c400, %c0_64] : memref<432x512xf32, #tpu.memory_space<vmem>>, vector<16x512xf32>
    tpu.vector_store %arg8[%c400, %c0_64], %131 {strides = array<i32>} : memref<432x512xf32, #tpu.memory_space<vmem>>, vector<16x512xf32>,
    %c439_i32 = arith.constant 439 : i32
    %133 = tpu.dynamic_rotate %6 by %c439_i32 dim 1 : vector<16x512xf32>, i32 -> vector<16x512xf32>
    %c26 = arith.constant 26 : index
    %c0_65 = arith.constant 0 : index
    %134 = vector.load %arg3[%c26, %c0_65] : memref<27x512xf32, #tpu.memory_space<vmem>>, vector<1x512xf32>
    %135 = vector.broadcast %134 : vector<1x512xf32> to vector<16x512xf32>
    %136 = arith.mulf %133, %135 : vector<16x512xf32>
    %c416 = arith.constant 416 : index
    %c0_66 = arith.constant 0 : index
    %137 = vector.load %arg8[%c416, %c0_66] : memref<432x512xf32, #tpu.memory_space<vmem>>, vector<16x512xf32>
    tpu.vector_store %arg8[%c416, %c0_66], %136 {strides = array<i32>} : memref<432x512xf32, #tpu.memory_space<vmem>>, vector<16x512xf32>,
    %c0_67 = arith.constant 0 : index
    %c0_68 = arith.constant 0 : index
    %138 = vector.load %arg4[%c0_67, %c0_68] : memref<8x432xf32, #tpu.memory_space<vmem>>, vector<8x432xf32>
    %c0_69 = arith.constant 0 : index
    %c0_70 = arith.constant 0 : index
    %139 = vector.load %arg8[%c0_69, %c0_70] : memref<432x512xf32, #tpu.memory_space<vmem>>, vector<432x512xf32>
    %cst_71 = arith.constant dense<0.000000e+00> : vector<8x512xf32>
    %140 = tpu.matmul %138, %139, %cst_71 {dimension_numbers = #tpu.dot_dimension_numbers<[1], [0], [0], [1], [0, 0, 1, 1], [], []>} : vector<8x432xf32>, vector<432x512xf32>, vector<8x512xf32> -> vector<8x512xf32>
    %cst_72 = arith.constant dense<0.000000e+00> : vector<8xf32>
    %141 = vector.multi_reduction <add>, %140, %cst_72 [1] : vector<8x512xf32> to vector<8xf32>
    %142 = vector.shape_cast %141 : vector<8xf32> to vector<8x1xf32>
    %cst_73 = arith.constant 5.120000e+02 : f32
    %143 = vector.broadcast %cst_73 : f32 to vector<8x1xf32>
    %144 = arith.divf %142, %143 : vector<8x1xf32>
    %145 = vector.broadcast %144 : vector<8x1xf32> to vector<8x512xf32>
    %146 = arith.subf %140, %145 : vector<8x512xf32>
    %147 = arith.mulf %146, %146 : vector<8x512xf32>
    %cst_74 = arith.constant dense<0.000000e+00> : vector<8xf32>
    %148 = vector.multi_reduction <add>, %147, %cst_74 [1] : vector<8x512xf32> to vector<8xf32>
    %149 = vector.shape_cast %148 : vector<8xf32> to vector<8x1xf32>
    %cst_75 = arith.constant 5.120000e+02 : f32
    %150 = vector.broadcast %cst_75 : f32 to vector<8x1xf32>
    %151 = arith.divf %149, %150 : vector<8x1xf32>
    %cst_76 = arith.constant 9.99999974E-6 : f32
    %152 = vector.broadcast %cst_76 : f32 to vector<8x1xf32>
    %153 = arith.addf %151, %152 : vector<8x1xf32>
    %154 = math.rsqrt %153 : vector<8x1xf32>
    %155 = vector.broadcast %154 : vector<8x1xf32> to vector<8x512xf32>
    %156 = arith.mulf %146, %155 : vector<8x512xf32>
    %cst_77 = arith.constant 0.000000e+00 : f32
    %157 = vector.broadcast %cst_77 : f32 to vector<8x512xf32>
    %158 = arith.maximumf %156, %157 : vector<8x512xf32>
    %c73_i32_78 = arith.constant 73 : i32
    %159 = tpu.dynamic_rotate %158 by %c73_i32_78 dim 1 : vector<8x512xf32>, i32 -> vector<8x512xf32>
    %c0_79 = arith.constant 0 : index
    %c0_80 = arith.constant 0 : index
    %160 = vector.load %arg3[%c0_79, %c0_80] : memref<27x512xf32, #tpu.memory_space<vmem>>, vector<1x512xf32>
    %161 = vector.broadcast %160 : vector<1x512xf32> to vector<8x512xf32>
    %162 = arith.mulf %159, %161 : vector<8x512xf32>
    %c0_81 = arith.constant 0 : index
    %c0_82 = arith.constant 0 : index
    %163 = vector.load %arg8[%c0_81, %c0_82] : memref<432x512xf32, #tpu.memory_space<vmem>>, vector<8x512xf32>
    tpu.vector_store %arg8[%c0_81, %c0_82], %162 {strides = array<i32>} : memref<432x512xf32, #tpu.memory_space<vmem>>, vector<8x512xf32>,
    %c72_i32_83 = arith.constant 72 : i32
    %164 = tpu.dynamic_rotate %158 by %c72_i32_83 dim 1 : vector<8x512xf32>, i32 -> vector<8x512xf32>
    %c1_84 = arith.constant 1 : index
    %c0_85 = arith.constant 0 : index
    %165 = vector.load %arg3[%c1_84, %c0_85] : memref<27x512xf32, #tpu.memory_space<vmem>>, vector<1x512xf32>
    %166 = vector.broadcast %165 : vector<1x512xf32> to vector<8x512xf32>
    %167 = arith.mulf %164, %166 : vector<8x512xf32>
    %c8_86 = arith.constant 8 : index
    %c0_87 = arith.constant 0 : index
    %168 = vector.load %arg8[%c8_86, %c0_87] : memref<432x512xf32, #tpu.memory_space<vmem>>, vector<8x512xf32>
    tpu.vector_store %arg8[%c8_86, %c0_87], %167 {strides = array<i32>} : memref<432x512xf32, #tpu.memory_space<vmem>>, vector<8x512xf32>,
    %c71_i32_88 = arith.constant 71 : i32
    %169 = tpu.dynamic_rotate %158 by %c71_i32_88 dim 1 : vector<8x512xf32>, i32 -> vector<8x512xf32>
    %c2_89 = arith.constant 2 : index
    %c0_90 = arith.constant 0 : index
    %170 = vector.load %arg3[%c2_89, %c0_90] : memref<27x512xf32, #tpu.memory_space<vmem>>, vector<1x512xf32>
    %171 = vector.broadcast %170 : vector<1x512xf32> to vector<8x512xf32>
    %172 = arith.mulf %169, %171 : vector<8x512xf32>
    %c16_91 = arith.constant 16 : index
    %c0_92 = arith.constant 0 : index
    %173 = vector.load %arg8[%c16_91, %c0_92] : memref<432x512xf32, #tpu.memory_space<vmem>>, vector<8x512xf32>
    tpu.vector_store %arg8[%c16_91, %c0_92], %172 {strides = array<i32>} : memref<432x512xf32, #tpu.memory_space<vmem>>, vector<8x512xf32>,
    %c65_i32_93 = arith.constant 65 : i32
    %174 = tpu.dynamic_rotate %158 by %c65_i32_93 dim 1 : vector<8x512xf32>, i32 -> vector<8x512xf32>
    %c3_94 = arith.constant 3 : index
    %c0_95 = arith.constant 0 : index
    %175 = vector.load %arg3[%c3_94, %c0_95] : memref<27x512xf32, #tpu.memory_space<vmem>>, vector<1x512xf32>
    %176 = vector.broadcast %175 : vector<1x512xf32> to vector<8x512xf32>
    %177 = arith.mulf %174, %176 : vector<8x512xf32>
    %c24_96 = arith.constant 24 : index
    %c0_97 = arith.constant 0 : index
    %178 = vector.load %arg8[%c24_96, %c0_97] : memref<432x512xf32, #tpu.memory_space<vmem>>, vector<8x512xf32>
    tpu.vector_store %arg8[%c24_96, %c0_97], %177 {strides = array<i32>} : memref<432x512xf32, #tpu.memory_space<vmem>>, vector<8x512xf32>,
    %c64_i32_98 = arith.constant 64 : i32
    %179 = tpu.dynamic_rotate %158 by %c64_i32_98 dim 1 : vector<8x512xf32>, i32 -> vector<8x512xf32>
    %c4_99 = arith.constant 4 : index
    %c0_100 = arith.constant 0 : index
    %180 = vector.load %arg3[%c4_99, %c0_100] : memref<27x512xf32, #tpu.memory_space<vmem>>, vector<1x512xf32>
    %181 = vector.broadcast %180 : vector<1x512xf32> to vector<8x512xf32>
    %182 = arith.mulf %179, %181 : vector<8x512xf32>
    %c32_101 = arith.constant 32 : index
    %c0_102 = arith.constant 0 : index
    %183 = vector.load %arg8[%c32_101, %c0_102] : memref<432x512xf32, #tpu.memory_space<vmem>>, vector<8x512xf32>
    tpu.vector_store %arg8[%c32_101, %c0_102], %182 {strides = array<i32>} : memref<432x512xf32, #tpu.memory_space<vmem>>, vector<8x512xf32>,
    %c63_i32_103 = arith.constant 63 : i32
    %184 = tpu.dynamic_rotate %158 by %c63_i32_103 dim 1 : vector<8x512xf32>, i32 -> vector<8x512xf32>
    %c5_104 = arith.constant 5 : index
    %c0_105 = arith.constant 0 : index
    %185 = vector.load %arg3[%c5_104, %c0_105] : memref<27x512xf32, #tpu.memory_space<vmem>>, vector<1x512xf32>
    %186 = vector.broadcast %185 : vector<1x512xf32> to vector<8x512xf32>
    %187 = arith.mulf %184, %186 : vector<8x512xf32>
    %c40 = arith.constant 40 : index
    %c0_106 = arith.constant 0 : index
    %188 = vector.load %arg8[%c40, %c0_106] : memref<432x512xf32, #tpu.memory_space<vmem>>, vector<8x512xf32>
    tpu.vector_store %arg8[%c40, %c0_106], %187 {strides = array<i32>} : memref<432x512xf32, #tpu.memory_space<vmem>>, vector<8x512xf32>,
    %c57_i32_107 = arith.constant 57 : i32
    %189 = tpu.dynamic_rotate %158 by %c57_i32_107 dim 1 : vector<8x512xf32>, i32 -> vector<8x512xf32>
    %c6_108 = arith.constant 6 : index
    %c0_109 = arith.constant 0 : index
    %190 = vector.load %arg3[%c6_108, %c0_109] : memref<27x512xf32, #tpu.memory_space<vmem>>, vector<1x512xf32>
    %191 = vector.broadcast %190 : vector<1x512xf32> to vector<8x512xf32>
    %192 = arith.mulf %189, %191 : vector<8x512xf32>
    %c48_110 = arith.constant 48 : index
    %c0_111 = arith.constant 0 : index
    %193 = vector.load %arg8[%c48_110, %c0_111] : memref<432x512xf32, #tpu.memory_space<vmem>>, vector<8x512xf32>
    tpu.vector_store %arg8[%c48_110, %c0_111], %192 {strides = array<i32>} : memref<432x512xf32, #tpu.memory_space<vmem>>, vector<8x512xf32>,
    %c56_i32_112 = arith.constant 56 : i32
    %194 = tpu.dynamic_rotate %158 by %c56_i32_112 dim 1 : vector<8x512xf32>, i32 -> vector<8x512xf32>
    %c7_113 = arith.constant 7 : index
    %c0_114 = arith.constant 0 : index
    %195 = vector.load %arg3[%c7_113, %c0_114] : memref<27x512xf32, #tpu.memory_space<vmem>>, vector<1x512xf32>
    %196 = vector.broadcast %195 : vector<1x512xf32> to vector<8x512xf32>
    %197 = arith.mulf %194, %196 : vector<8x512xf32>
    %c56 = arith.constant 56 : index
    %c0_115 = arith.constant 0 : index
    %198 = vector.load %arg8[%c56, %c0_115] : memref<432x512xf32, #tpu.memory_space<vmem>>, vector<8x512xf32>
    tpu.vector_store %arg8[%c56, %c0_115], %197 {strides = array<i32>} : memref<432x512xf32, #tpu.memory_space<vmem>>, vector<8x512xf32>,
    %c55_i32_116 = arith.constant 55 : i32
    %199 = tpu.dynamic_rotate %158 by %c55_i32_116 dim 1 : vector<8x512xf32>, i32 -> vector<8x512xf32>
    %c8_117 = arith.constant 8 : index
    %c0_118 = arith.constant 0 : index
    %200 = vector.load %arg3[%c8_117, %c0_118] : memref<27x512xf32, #tpu.memory_space<vmem>>, vector<1x512xf32>
    %201 = vector.broadcast %200 : vector<1x512xf32> to vector<8x512xf32>
    %202 = arith.mulf %199, %201 : vector<8x512xf32>
    %c64_119 = arith.constant 64 : index
    %c0_120 = arith.constant 0 : index
    %203 = vector.load %arg8[%c64_119, %c0_120] : memref<432x512xf32, #tpu.memory_space<vmem>>, vector<8x512xf32>
    tpu.vector_store %arg8[%c64_119, %c0_120], %202 {strides = array<i32>} : memref<432x512xf32, #tpu.memory_space<vmem>>, vector<8x512xf32>,
    %c9_i32_121 = arith.constant 9 : i32
    %204 = tpu.dynamic_rotate %158 by %c9_i32_121 dim 1 : vector<8x512xf32>, i32 -> vector<8x512xf32>
    %c9_122 = arith.constant 9 : index
    %c0_123 = arith.constant 0 : index
    %205 = vector.load %arg3[%c9_122, %c0_123] : memref<27x512xf32, #tpu.memory_space<vmem>>, vector<1x512xf32>
    %206 = vector.broadcast %205 : vector<1x512xf32> to vector<8x512xf32>
    %207 = arith.mulf %204, %206 : vector<8x512xf32>
    %c72 = arith.constant 72 : index
    %c0_124 = arith.constant 0 : index
    %208 = vector.load %arg8[%c72, %c0_124] : memref<432x512xf32, #tpu.memory_space<vmem>>, vector<8x512xf32>
    tpu.vector_store %arg8[%c72, %c0_124], %207 {strides = array<i32>} : memref<432x512xf32, #tpu.memory_space<vmem>>, vector<8x512xf32>,
    %c8_i32_125 = arith.constant 8 : i32
    %209 = tpu.dynamic_rotate %158 by %c8_i32_125 dim 1 : vector<8x512xf32>, i32 -> vector<8x512xf32>
    %c10_126 = arith.constant 10 : index
    %c0_127 = arith.constant 0 : index
    %210 = vector.load %arg3[%c10_126, %c0_127] : memref<27x512xf32, #tpu.memory_space<vmem>>, vector<1x512xf32>
    %211 = vector.broadcast %210 : vector<1x512xf32> to vector<8x512xf32>
    %212 = arith.mulf %209, %211 : vector<8x512xf32>
    %c80_128 = arith.constant 80 : index
    %c0_129 = arith.constant 0 : index
    %213 = vector.load %arg8[%c80_128, %c0_129] : memref<432x512xf32, #tpu.memory_space<vmem>>, vector<8x512xf32>
    tpu.vector_store %arg8[%c80_128, %c0_129], %212 {strides = array<i32>} : memref<432x512xf32, #tpu.memory_space<vmem>>, vector<8x512xf32>,
    %c7_i32_130 = arith.constant 7 : i32
    %214 = tpu.dynamic_rotate %158 by %c7_i32_130 dim 1 : vector<8x512xf32>, i32 -> vector<8x512xf32>
    %c11_131 = arith.constant 11 : index
    %c0_132 = arith.constant 0 : index
    %215 = vector.load %arg3[%c11_131, %c0_132] : memref<27x512xf32, #tpu.memory_space<vmem>>, vector<1x512xf32>
    %216 = vector.broadcast %215 : vector<1x512xf32> to vector<8x512xf32>
    %217 = arith.mulf %214, %216 : vector<8x512xf32>
    %c88 = arith.constant 88 : index
    %c0_133 = arith.constant 0 : index
    %218 = vector.load %arg8[%c88, %c0_133] : memref<432x512xf32, #tpu.memory_space<vmem>>, vector<8x512xf32>
    tpu.vector_store %arg8[%c88, %c0_133], %217 {strides = array<i32>} : memref<432x512xf32, #tpu.memory_space<vmem>>, vector<8x512xf32>,
    %c1_i32_134 = arith.constant 1 : i32
    %219 = tpu.dynamic_rotate %158 by %c1_i32_134 dim 1 : vector<8x512xf32>, i32 -> vector<8x512xf32>
    %c12_135 = arith.constant 12 : index
    %c0_136 = arith.constant 0 : index
    %220 = vector.load %arg3[%c12_135, %c0_136] : memref<27x512xf32, #tpu.memory_space<vmem>>, vector<1x512xf32>
    %221 = vector.broadcast %220 : vector<1x512xf32> to vector<8x512xf32>
    %222 = arith.mulf %219, %221 : vector<8x512xf32>
    %c96_137 = arith.constant 96 : index
    %c0_138 = arith.constant 0 : index
    %223 = vector.load %arg8[%c96_137, %c0_138] : memref<432x512xf32, #tpu.memory_space<vmem>>, vector<8x512xf32>
    tpu.vector_store %arg8[%c96_137, %c0_138], %222 {strides = array<i32>} : memref<432x512xf32, #tpu.memory_space<vmem>>, vector<8x512xf32>,
    %c104 = arith.constant 104 : index
    %c0_139 = arith.constant 0 : index
    %224 = vector.load %arg8[%c104, %c0_139] : memref<432x512xf32, #tpu.memory_space<vmem>>, vector<8x512xf32>
    tpu.vector_store %arg8[%c104, %c0_139], %158 {strides = array<i32>} : memref<432x512xf32, #tpu.memory_space<vmem>>, vector<8x512xf32>,
    %c511_i32_140 = arith.constant 511 : i32
    %225 = tpu.dynamic_rotate %158 by %c511_i32_140 dim 1 : vector<8x512xf32>, i32 -> vector<8x512xf32>
    %c14_141 = arith.constant 14 : index
    %c0_142 = arith.constant 0 : index
    %226 = vector.load %arg3[%c14_141, %c0_142] : memref<27x512xf32, #tpu.memory_space<vmem>>, vector<1x512xf32>
    %227 = vector.broadcast %226 : vector<1x512xf32> to vector<8x512xf32>
    %228 = arith.mulf %225, %227 : vector<8x512xf32>
    %c112_143 = arith.constant 112 : index
    %c0_144 = arith.constant 0 : index
    %229 = vector.load %arg8[%c112_143, %c0_144] : memref<432x512xf32, #tpu.memory_space<vmem>>, vector<8x512xf32>
    tpu.vector_store %arg8[%c112_143, %c0_144], %228 {strides = array<i32>} : memref<432x512xf32, #tpu.memory_space<vmem>>, vector<8x512xf32>,
    %c505_i32_145 = arith.constant 505 : i32
    %230 = tpu.dynamic_rotate %158 by %c505_i32_145 dim 1 : vector<8x512xf32>, i32 -> vector<8x512xf32>
    %c15_146 = arith.constant 15 : index
    %c0_147 = arith.constant 0 : index
    %231 = vector.load %arg3[%c15_146, %c0_147] : memref<27x512xf32, #tpu.memory_space<vmem>>, vector<1x512xf32>
    %232 = vector.broadcast %231 : vector<1x512xf32> to vector<8x512xf32>
    %233 = arith.mulf %230, %232 : vector<8x512xf32>
    %c120 = arith.constant 120 : index
    %c0_148 = arith.constant 0 : index
    %234 = vector.load %arg8[%c120, %c0_148] : memref<432x512xf32, #tpu.memory_space<vmem>>, vector<8x512xf32>
    tpu.vector_store %arg8[%c120, %c0_148], %233 {strides = array<i32>} : memref<432x512xf32, #tpu.memory_space<vmem>>, vector<8x512xf32>,
    %c504_i32_149 = arith.constant 504 : i32
    %235 = tpu.dynamic_rotate %158 by %c504_i32_149 dim 1 : vector<8x512xf32>, i32 -> vector<8x512xf32>
    %c16_150 = arith.constant 16 : index
    %c0_151 = arith.constant 0 : index
    %236 = vector.load %arg3[%c16_150, %c0_151] : memref<27x512xf32, #tpu.memory_space<vmem>>, vector<1x512xf32>
    %237 = vector.broadcast %236 : vector<1x512xf32> to vector<8x512xf32>
    %238 = arith.mulf %235, %237 : vector<8x512xf32>
    %c128_152 = arith.constant 128 : index
    %c0_153 = arith.constant 0 : index
    %239 = vector.load %arg8[%c128_152, %c0_153] : memref<432x512xf32, #tpu.memory_space<vmem>>, vector<8x512xf32>
    tpu.vector_store %arg8[%c128_152, %c0_153], %238 {strides = array<i32>} : memref<432x512xf32, #tpu.memory_space<vmem>>, vector<8x512xf32>,
    %c503_i32_154 = arith.constant 503 : i32
    %240 = tpu.dynamic_rotate %158 by %c503_i32_154 dim 1 : vector<8x512xf32>, i32 -> vector<8x512xf32>
    %c17_155 = arith.constant 17 : index
    %c0_156 = arith.constant 0 : index
    %241 = vector.load %arg3[%c17_155, %c0_156] : memref<27x512xf32, #tpu.memory_space<vmem>>, vector<1x512xf32>
    %242 = vector.broadcast %241 : vector<1x512xf32> to vector<8x512xf32>
    %243 = arith.mulf %240, %242 : vector<8x512xf32>
    %c136 = arith.constant 136 : index
    %c0_157 = arith.constant 0 : index
    %244 = vector.load %arg8[%c136, %c0_157] : memref<432x512xf32, #tpu.memory_space<vmem>>, vector<8x512xf32>
    tpu.vector_store %arg8[%c136, %c0_157], %243 {strides = array<i32>} : memref<432x512xf32, #tpu.memory_space<vmem>>, vector<8x512xf32>,
    %c457_i32_158 = arith.constant 457 : i32
    %245 = tpu.dynamic_rotate %158 by %c457_i32_158 dim 1 : vector<8x512xf32>, i32 -> vector<8x512xf32>
    %c18_159 = arith.constant 18 : index
    %c0_160 = arith.constant 0 : index
    %246 = vector.load %arg3[%c18_159, %c0_160] : memref<27x512xf32, #tpu.memory_space<vmem>>, vector<1x512xf32>
    %247 = vector.broadcast %246 : vector<1x512xf32> to vector<8x512xf32>
    %248 = arith.mulf %245, %247 : vector<8x512xf32>
    %c144_161 = arith.constant 144 : index
    %c0_162 = arith.constant 0 : index
    %249 = vector.load %arg8[%c144_161, %c0_162] : memref<432x512xf32, #tpu.memory_space<vmem>>, vector<8x512xf32>
    tpu.vector_store %arg8[%c144_161, %c0_162], %248 {strides = array<i32>} : memref<432x512xf32, #tpu.memory_space<vmem>>, vector<8x512xf32>,
    %c456_i32_163 = arith.constant 456 : i32
    %250 = tpu.dynamic_rotate %158 by %c456_i32_163 dim 1 : vector<8x512xf32>, i32 -> vector<8x512xf32>
    %c19_164 = arith.constant 19 : index
    %c0_165 = arith.constant 0 : index
    %251 = vector.load %arg3[%c19_164, %c0_165] : memref<27x512xf32, #tpu.memory_space<vmem>>, vector<1x512xf32>
    %252 = vector.broadcast %251 : vector<1x512xf32> to vector<8x512xf32>
    %253 = arith.mulf %250, %252 : vector<8x512xf32>
    %c152 = arith.constant 152 : index
    %c0_166 = arith.constant 0 : index
    %254 = vector.load %arg8[%c152, %c0_166] : memref<432x512xf32, #tpu.memory_space<vmem>>, vector<8x512xf32>
    tpu.vector_store %arg8[%c152, %c0_166], %253 {strides = array<i32>} : memref<432x512xf32, #tpu.memory_space<vmem>>, vector<8x512xf32>,
    %c455_i32_167 = arith.constant 455 : i32
    %255 = tpu.dynamic_rotate %158 by %c455_i32_167 dim 1 : vector<8x512xf32>, i32 -> vector<8x512xf32>
    %c20_168 = arith.constant 20 : index
    %c0_169 = arith.constant 0 : index
    %256 = vector.load %arg3[%c20_168, %c0_169] : memref<27x512xf32, #tpu.memory_space<vmem>>, vector<1x512xf32>
    %257 = vector.broadcast %256 : vector<1x512xf32> to vector<8x512xf32>
    %258 = arith.mulf %255, %257 : vector<8x512xf32>
    %c160_170 = arith.constant 160 : index
    %c0_171 = arith.constant 0 : index
    %259 = vector.load %arg8[%c160_170, %c0_171] : memref<432x512xf32, #tpu.memory_space<vmem>>, vector<8x512xf32>
    tpu.vector_store %arg8[%c160_170, %c0_171], %258 {strides = array<i32>} : memref<432x512xf32, #tpu.memory_space<vmem>>, vector<8x512xf32>,
    %c449_i32_172 = arith.constant 449 : i32
    %260 = tpu.dynamic_rotate %158 by %c449_i32_172 dim 1 : vector<8x512xf32>, i32 -> vector<8x512xf32>
    %c21_173 = arith.constant 21 : index
    %c0_174 = arith.constant 0 : index
    %261 = vector.load %arg3[%c21_173, %c0_174] : memref<27x512xf32, #tpu.memory_space<vmem>>, vector<1x512xf32>
    %262 = vector.broadcast %261 : vector<1x512xf32> to vector<8x512xf32>
    %263 = arith.mulf %260, %262 : vector<8x512xf32>
    %c168 = arith.constant 168 : index
    %c0_175 = arith.constant 0 : index
    %264 = vector.load %arg8[%c168, %c0_175] : memref<432x512xf32, #tpu.memory_space<vmem>>, vector<8x512xf32>
    tpu.vector_store %arg8[%c168, %c0_175], %263 {strides = array<i32>} : memref<432x512xf32, #tpu.memory_space<vmem>>, vector<8x512xf32>,
    %c448_i32_176 = arith.constant 448 : i32
    %265 = tpu.dynamic_rotate %158 by %c448_i32_176 dim 1 : vector<8x512xf32>, i32 -> vector<8x512xf32>
    %c22_177 = arith.constant 22 : index
    %c0_178 = arith.constant 0 : index
    %266 = vector.load %arg3[%c22_177, %c0_178] : memref<27x512xf32, #tpu.memory_space<vmem>>, vector<1x512xf32>
    %267 = vector.broadcast %266 : vector<1x512xf32> to vector<8x512xf32>
    %268 = arith.mulf %265, %267 : vector<8x512xf32>
    %c176_179 = arith.constant 176 : index
    %c0_180 = arith.constant 0 : index
    %269 = vector.load %arg8[%c176_179, %c0_180] : memref<432x512xf32, #tpu.memory_space<vmem>>, vector<8x512xf32>
    tpu.vector_store %arg8[%c176_179, %c0_180], %268 {strides = array<i32>} : memref<432x512xf32, #tpu.memory_space<vmem>>, vector<8x512xf32>,
    %c447_i32_181 = arith.constant 447 : i32
    %270 = tpu.dynamic_rotate %158 by %c447_i32_181 dim 1 : vector<8x512xf32>, i32 -> vector<8x512xf32>
    %c23_182 = arith.constant 23 : index
    %c0_183 = arith.constant 0 : index
    %271 = vector.load %arg3[%c23_182, %c0_183] : memref<27x512xf32, #tpu.memory_space<vmem>>, vector<1x512xf32>
    %272 = vector.broadcast %271 : vector<1x512xf32> to vector<8x512xf32>
    %273 = arith.mulf %270, %272 : vector<8x512xf32>
    %c184 = arith.constant 184 : index
    %c0_184 = arith.constant 0 : index
    %274 = vector.load %arg8[%c184, %c0_184] : memref<432x512xf32, #tpu.memory_space<vmem>>, vector<8x512xf32>
    tpu.vector_store %arg8[%c184, %c0_184], %273 {strides = array<i32>} : memref<432x512xf32, #tpu.memory_space<vmem>>, vector<8x512xf32>,
    %c441_i32_185 = arith.constant 441 : i32
    %275 = tpu.dynamic_rotate %158 by %c441_i32_185 dim 1 : vector<8x512xf32>, i32 -> vector<8x512xf32>
    %c24_186 = arith.constant 24 : index
    %c0_187 = arith.constant 0 : index
    %276 = vector.load %arg3[%c24_186, %c0_187] : memref<27x512xf32, #tpu.memory_space<vmem>>, vector<1x512xf32>
    %277 = vector.broadcast %276 : vector<1x512xf32> to vector<8x512xf32>
    %278 = arith.mulf %275, %277 : vector<8x512xf32>
    %c192_188 = arith.constant 192 : index
    %c0_189 = arith.constant 0 : index
    %279 = vector.load %arg8[%c192_188, %c0_189] : memref<432x512xf32, #tpu.memory_space<vmem>>, vector<8x512xf32>
    tpu.vector_store %arg8[%c192_188, %c0_189], %278 {strides = array<i32>} : memref<432x512xf32, #tpu.memory_space<vmem>>, vector<8x512xf32>,
    %c440_i32_190 = arith.constant 440 : i32
    %280 = tpu.dynamic_rotate %158 by %c440_i32_190 dim 1 : vector<8x512xf32>, i32 -> vector<8x512xf32>
    %c25_191 = arith.constant 25 : index
    %c0_192 = arith.constant 0 : index
    %281 = vector.load %arg3[%c25_191, %c0_192] : memref<27x512xf32, #tpu.memory_space<vmem>>, vector<1x512xf32>
    %282 = vector.broadcast %281 : vector<1x512xf32> to vector<8x512xf32>
    %283 = arith.mulf %280, %282 : vector<8x512xf32>
    %c200 = arith.constant 200 : index
    %c0_193 = arith.constant 0 : index
    %284 = vector.load %arg8[%c200, %c0_193] : memref<432x512xf32, #tpu.memory_space<vmem>>, vector<8x512xf32>
    tpu.vector_store %arg8[%c200, %c0_193], %283 {strides = array<i32>} : memref<432x512xf32, #tpu.memory_space<vmem>>, vector<8x512xf32>,
    %c439_i32_194 = arith.constant 439 : i32
    %285 = tpu.dynamic_rotate %158 by %c439_i32_194 dim 1 : vector<8x512xf32>, i32 -> vector<8x512xf32>
    %c26_195 = arith.constant 26 : index
    %c0_196 = arith.constant 0 : index
    %286 = vector.load %arg3[%c26_195, %c0_196] : memref<27x512xf32, #tpu.memory_space<vmem>>, vector<1x512xf32>
    %287 = vector.broadcast %286 : vector<1x512xf32> to vector<8x512xf32>
    %288 = arith.mulf %285, %287 : vector<8x512xf32>
    %c208_197 = arith.constant 208 : index
    %c0_198 = arith.constant 0 : index
    %289 = vector.load %arg8[%c208_197, %c0_198] : memref<432x512xf32, #tpu.memory_space<vmem>>, vector<8x512xf32>
    tpu.vector_store %arg8[%c208_197, %c0_198], %288 {strides = array<i32>} : memref<432x512xf32, #tpu.memory_space<vmem>>, vector<8x512xf32>,
    %c0_199 = arith.constant 0 : index
    %c0_200 = arith.constant 0 : index
    %290 = vector.load %arg5[%c0_199, %c0_200] : memref<8x216xf32, #tpu.memory_space<vmem>>, vector<8x216xf32>
    %c0_201 = arith.constant 0 : index
    %c0_202 = arith.constant 0 : index
    %291 = vector.load %arg8[%c0_201, %c0_202] : memref<432x512xf32, #tpu.memory_space<vmem>>, vector<216x512xf32>
    %cst_203 = arith.constant dense<0.000000e+00> : vector<8x512xf32>
    %292 = tpu.matmul %290, %291, %cst_203 {dimension_numbers = #tpu.dot_dimension_numbers<[1], [0], [0], [1], [0, 0, 1, 1], [], []>} : vector<8x216xf32>, vector<216x512xf32>, vector<8x512xf32> -> vector<8x512xf32>
    %cst_204 = arith.constant dense<0.000000e+00> : vector<8xf32>
    %293 = vector.multi_reduction <add>, %292, %cst_204 [1] : vector<8x512xf32> to vector<8xf32>
    %294 = vector.shape_cast %293 : vector<8xf32> to vector<8x1xf32>
    %cst_205 = arith.constant 5.120000e+02 : f32
    %295 = vector.broadcast %cst_205 : f32 to vector<8x1xf32>
    %296 = arith.divf %294, %295 : vector<8x1xf32>
    %297 = vector.broadcast %296 : vector<8x1xf32> to vector<8x512xf32>
    %298 = arith.subf %292, %297 : vector<8x512xf32>
    %299 = arith.mulf %298, %298 : vector<8x512xf32>
    %cst_206 = arith.constant dense<0.000000e+00> : vector<8xf32>
    %300 = vector.multi_reduction <add>, %299, %cst_206 [1] : vector<8x512xf32> to vector<8xf32>
    %301 = vector.shape_cast %300 : vector<8xf32> to vector<8x1xf32>
    %cst_207 = arith.constant 5.120000e+02 : f32
    %302 = vector.broadcast %cst_207 : f32 to vector<8x1xf32>
    %303 = arith.divf %301, %302 : vector<8x1xf32>
    %cst_208 = arith.constant 9.99999974E-6 : f32
    %304 = vector.broadcast %cst_208 : f32 to vector<8x1xf32>
    %305 = arith.addf %303, %304 : vector<8x1xf32>
    %306 = math.rsqrt %305 : vector<8x1xf32>
    %307 = vector.broadcast %306 : vector<8x1xf32> to vector<8x512xf32>
    %308 = arith.mulf %298, %307 : vector<8x512xf32>
    %cst_209 = arith.constant 0.000000e+00 : f32
    %309 = vector.broadcast %cst_209 : f32 to vector<8x512xf32>
    %310 = arith.maximumf %308, %309 : vector<8x512xf32>
    %c0_210 = arith.constant 0 : index
    %c0_211 = arith.constant 0 : index
    %311 = vector.load %arg6[%c0_210, %c0_211] : memref<8x512xf32, #tpu.memory_space<vmem>>, vector<8x512xf32>
    tpu.vector_store %arg6[%c0_210, %c0_211], %310 {strides = array<i32>} : memref<8x512xf32, #tpu.memory_space<vmem>>, vector<8x512xf32>,
    return
  }
}

</mosaic_0001>

<bundles_post_ra>
// kernel: tpu_custom_call.1
= control target key start
LH: loop header
LB: loop body
LE: loop exit
PB: predicated region body
PF: predicated region fallthrough
CT: control target
= control target key end

     0   :  { %11 = vsyncpa [#allocation5], 0  ;;  %s6516_s0 = inlined_call_operand.hbm [shape: f32[8,512], index: 0, kind: input, shape index: {}]   ;;  %s6517_s1 = inlined_call_operand.hbm [shape: f32[8,64], index: 1, kind: input, shape index: {}]   ;;  %s6518_s2 = inlined_call_operand.hbm [shape: f32[64,512], index: 2, kind: input, shape index: {}]   ;;  %s6519_s3 = inlined_call_operand.hbm [shape: f32[27,512], index: 3, kind: input, shape index: {}]   ;;  %s6520_s4 = inlined_call_operand.hbm [shape: f32[8,432], index: 4, kind: input, shape index: {}]   ;;  %s6521_s5 = inlined_call_operand.hbm [shape: f32[8,216], index: 5, kind: input, shape index: {}]   ;;  %s6522_s6 = inlined_call_operand.hbm [shape: f32[8,512], index: 6, kind: output, shape index: {}]  }
   0x1   :  { %12 = vsyncpa [#allocation8], 0 }
   0x2   :  { %13 = vsyncpa [#allocation11], 0 }
   0x3   :  { %14 = vsyncpa [#allocation14], 0 }
   0x4   :  { %15 = vsyncpa [#allocation6], 0  ;;  %s3779_s21 = smov [#allocation7]  }
   0x5   :  { %s32_s22 = sshll.u32 %s3779_s21, 4  ;;  %s33_s22 = int_to_ptr.vmem [resolvable:$true] %s32_s22 }
   0x6   :  { %s3637_s23 = scalar_lea.vmem %s33_s22, 128  ;;  %p3642_p1 = scmp.lt.s32.totalorder %s33_s22, %s33_s22 }
   0x7   :  { %p3638_p0 = scmp.ne.s32.totalorder %s33_s22, %s3637_s23  ;;  %p3643_p2 = scmp.lt.s32.totalorder %s3637_s23, %s3637_s23 }
   0x9   :  { %p3644_p3 = por %p3643_p2, %p3642_p1 }
   0xb   :  { %p3645_p4 = pnand %p3644_p3, %p3638_p0 }
   0xd   :  { %3648 = shalt.err (!%p3645_p4)
}
   0xe   :  { %35 = dma.hbm_to_vmem [thread:$0]  %s6517_s1, 128, %s33_s22, [#allocation8]  }
   0xf   :  { %s3780_s26 = smov [#allocation10]   ;;  %s3781_s28 = smov [#allocation4]  }
  0x10   :  { %s53_s27 = sshll.u32 %s3780_s26, 4  ;;  %s22_s29 = sshll.u32 %s3781_s28, 4  ;;  %s54_s27 = int_to_ptr.vmem [resolvable:$true] %s53_s27  ;;  %s23_s29 = int_to_ptr.vmem [resolvable:$true] %s22_s29 }
  0x11   :  { %s3657_s30 = scalar_lea.vmem %s54_s27, 2048  ;;  %p3662_p6 = scmp.lt.s32.totalorder %s54_s27, %s54_s27 }
  0x12   :  { %p3658_p5 = scmp.ne.s32.totalorder %s54_s27, %s3657_s30  ;;  %p3663_p7 = scmp.lt.s32.totalorder %s3657_s30, %s3657_s30 }
  0x14   :  { %p3664_p8 = por %p3663_p7, %p3662_p6 }
  0x16   :  { %p3665_p9 = pnand %p3664_p8, %p3658_p5 }
  0x18   :  { %3668 = shalt.err (!%p3665_p9)
}
  0x19   :  { %s3782_s7 = smov 512   ;;  %s3783_s8 = smov 32  }
  0x1a   :  { %59 = dma.hbm_to_vmem [thread:$0]  %s6519_s3, 2048, %s54_s27, [#allocation11], %s3782_s7, %s3782_s7, %s3783_s8  }
  0x1b   :  { %s3677_s1 = scalar_lea.vmem %s23_s29, 512  ;;  %p3682_p11 = scmp.lt.s32.totalorder %s23_s29, %s23_s29 }
  0x1c   :  { %p3678_p10 = scmp.ne.s32.totalorder %s23_s29, %s3677_s1  ;;  %p3683_p12 = scmp.lt.s32.totalorder %s3677_s1, %s3677_s1 }
  0x1e   :  { %p3684_p13 = por %p3683_p12, %p3682_p11 }
  0x20   :  { %p3685_p0 = pnand %p3684_p13, %p3678_p10 }
  0x22   :  { %3688 = shalt.err (!%p3685_p0)
}
  0x23   :  { %25 = dma.hbm_to_vmem [thread:$0]  %s6516_s0, 512, %s23_s29, [#allocation5]  }
  0x24   :  { %s3784_s13 = smov [#allocation9]   ;;  %s3785_s15 = smov [#allocation12]  }
  0x25   :  { %s41_s14 = sshll.u32 %s3784_s13, 4  ;;  %s66_s16 = sshll.u32 %s3785_s15, 4  ;;  %s42_s14 = int_to_ptr.vmem [resolvable:$true] %s41_s14  ;;  %s67_s16 = int_to_ptr.vmem [resolvable:$true] %s66_s16 }
  0x26   :  { %s3697_s17 = scalar_lea.vmem %s42_s14, 4096  ;;  %p3702_p2 = scmp.lt.s32.totalorder %s42_s14, %s42_s14 }
  0x27   :  { %p3698_p1 = scmp.ne.s32.totalorder %s42_s14, %s3697_s17  ;;  %p3703_p3 = scmp.lt.s32.totalorder %s3697_s17, %s3697_s17 }
  0x29   :  { %p3704_p4 = por %p3703_p3, %p3702_p2 }
  0x2b   :  { %p3705_p5 = pnand %p3704_p4, %p3698_p1 }
  0x2d   :  { %3708 = shalt.err (!%p3705_p5)
}
  0x2e   :  { %47 = dma.hbm_to_vmem [thread:$0]  %s6518_s2, 4096, %s42_s14, [#allocation8], %s3782_s7, %s3782_s7, %s3783_s8  }
  0x2f   :  { %s3717_s19 = scalar_lea.vmem %s67_s16, 512  ;;  %p3722_p7 = scmp.lt.s32.totalorder %s67_s16, %s67_s16 }
  0x30   :  { %p3718_p6 = scmp.ne.s32.totalorder %s67_s16, %s3717_s19  ;;  %p3723_p8 = scmp.lt.s32.totalorder %s3717_s19, %s3717_s19 }
  0x32   :  { %p3724_p9 = por %p3723_p8, %p3722_p7 }
  0x34   :  { %p3725_p10 = pnand %p3724_p9, %p3718_p6 }
  0x36   :  { %3728 = shalt.err (!%p3725_p10)
}
  0x37   :  { %69 = dma.hbm_to_vmem [thread:$0]  %s6520_s4, 512, %s67_s16, [#allocation11]  }
  0x38   :  { %s3786_s21 = smov [#allocation13]  }
  0x39   :  { %s76_s22 = sshll.u32 %s3786_s21, 4  ;;  %s77_s22 = int_to_ptr.vmem [resolvable:$true] %s76_s22 }
  0x3a   :  { %s3737_s23 = scalar_lea.vmem %s77_s22, 256  ;;  %p3742_p12 = scmp.lt.s32.totalorder %s77_s22, %s77_s22 }
  0x3b   :  { %p3738_p11 = scmp.ne.s32.totalorder %s77_s22, %s3737_s23  ;;  %p3743_p13 = scmp.lt.s32.totalorder %s3737_s23, %s3737_s23 }
  0x3d   :  { %p3744_p0 = por %p3743_p13, %p3742_p12 }
  0x3f   :  { %p3745_p1 = pnand %p3744_p0, %p3738_p11 }
  0x41   :  { %3748 = shalt.err (!%p3745_p1)
}
  0x42   :  { %79 = dma.hbm_to_vmem [thread:$0]  %s6521_s5, 256, %s77_s22, [#allocation14]  }
  0x43   :  { %3769 = dma.done.wait [#allocation5], 512  }
  0x44   :  { %3770 = vsyncadd [#allocation5], 4294966784 }
  0x45   :  { %3771 = dma.done.wait [#allocation8], 4224  }
  0x46   :  { %3772 = vsyncadd [#allocation8], 4294963072 }
  0x47   :  { %3773 = dma.done.wait [#allocation11], 2560  }
  0x48   :  { %3774 = vsyncadd [#allocation11], 4294964736 }
  0x49   :  { %3775 = dma.done.wait [#allocation14], 256  }
  0x4a   :  { %3776 = vsyncadd [#allocation14], 4294967040  ;;  %v3787_v0 = vmov 0.0   ;;  %v128_v1 = vld [vmem:[#allocation9 + $0xe8] sm:$0xff]  ;;  %v130_v2 = vld [vmem:[#allocation9 + $0xf8] sm:$0xff]  ;;  %vm131_vm0 = vcmask 523264  }
  0x4b   :  { %199 = vmatprep.mubr.f32.mxu0 %v3787_v0  ;;  %270 = vmatprep.mubr.f32.mxu1 %v3787_v0  ;;  %v127_v3 = vld [vmem:[#allocation9 + $0xe0] sm:$0xff]  ;;  %v129_v4 = vld [vmem:[#allocation9 + $0xf0] sm:$0xff]  ;;  %v124_v5 = vld [vmem:[#allocation9 + $0xc8] sm:$0xff]  ;;  %s3788_s4 = smov 63   ;;  %s3789_s5 = smov 56   ;;  %vm1965_vm1 = vcmask 392192  }
  0x4c   :  { %151 = vmatprep.subr.mxu0 %v128_v1  ;;  %222 = vmatprep.subr.mxu1 %v130_v2  ;;  %v126_v6 = vld [vmem:[#allocation9 + $0xd8] sm:$0xff]  ;;  %v123_v7 = vld [vmem:[#allocation9 + $0xc0] sm:$0xff]  ;;  %v125_v8 = vld [vmem:[#allocation9 + $0xd0] sm:$0xff]  ;;  %s3790_s25 = smov 64   ;;  %s3791_s26 = smov 57  }
  0x4d   :  { %152 = vmatpush1.msra.mxu0 %v127_v3  ;;  %223 = vmatpush1.msra.mxu1 %v129_v4  ;;  %v120_v9 = vld [vmem:[#allocation9 + $0xa8] sm:$0xff]  ;;  %v122_v10 = vld [vmem:[#allocation9 + $0xb8] sm:$0xff]  ;;  %v119_v11 = vld [vmem:[#allocation9 + $0xa0] sm:$0xff]  ;;  %s3792_s27 = smov 65   ;;  %s3793_s28 = smov 71  }
  0x4e   :  { %153 = vmatprep.subr.mxu0 %v124_v5  ;;  %224 = vmatprep.subr.mxu1 %v126_v6  ;;  %v121_v12 = vld [vmem:[#allocation9 + $0xb0] sm:$0xff]  ;;  %v116_v13 = vld [vmem:[#allocation9 + $0x88] sm:$0xff]  ;;  %v118_v14 = vld [vmem:[#allocation9 + $0x98] sm:$0xff]  ;;  %s3794_s29 = smov 72   ;;  %s3795_s30 = smov 73  }
  0x4f   :  { %154 = vmatpush1.msra.mxu0 %v123_v7  ;;  %225 = vmatpush1.msra.mxu1 %v125_v8  ;;  %v115_v15 = vld [vmem:[#allocation9 + $0x80] sm:$0xff]  ;;  %v117_v16 = vld [vmem:[#allocation9 + $0x90] sm:$0xff]  ;;  %v112_v17 = vld [vmem:[#allocation9 + $0x68] sm:$0xff]  ;;  %s3796_s7 = smov 119   ;;  %s3797_s8 = smov 120  }
  0x50   :  { %155 = vmatprep.subr.mxu0 %v120_v9  ;;  %226 = vmatprep.subr.mxu1 %v122_v10  ;;  %v114_v18 = vld [vmem:[#allocation9 + $0x78] sm:$0xff]  ;;  %v111_v19 = vld [vmem:[#allocation9 + $0x60] sm:$0xff]  ;;  %v113_v20 = vld [vmem:[#allocation9 + $0x70] sm:$0xff]  ;;  %s3798_s9 = smov 55   ;;  %s3799_s10 = smov 121  }
  0x51   :  { %156 = vmatpush1.msra.mxu0 %v119_v11  ;;  %227 = vmatpush1.msra.mxu1 %v121_v12  ;;  %v108_v21 = vld [vmem:[#allocation9 + $0x48] sm:$0xff]  ;;  %v110_v22 = vld [vmem:[#allocation9 + $0x58] sm:$0xff]  ;;  %v107_v23 = vld [vmem:[#allocation9 + $0x40] sm:$0xff]  ;;  %s3800_s1 = smov 127   ;;  %s3801_s11 = smov 1  }
  0x52   :  { %157 = vmatprep.subr.mxu0 %v116_v13  ;;  %228 = vmatprep.subr.mxu1 %v118_v14  ;;  %v109_v24 = vld [vmem:[#allocation9 + $0x50] sm:$0xff]  ;;  %v104_v25 = vld [vmem:[#allocation9 + $0x28] sm:$0xff]  ;;  %v106_v26 = vld [vmem:[#allocation9 + $0x38] sm:$0xff]  ;;  %s3802_s12 = smov 7   ;;  %s3803_s13 = smov 8  }
  0x53   :  { %158 = vmatpush1.msra.mxu0 %v115_v15  ;;  %229 = vmatpush1.msra.mxu1 %v117_v16  ;;  %v103_v27 = vld [vmem:[#allocation9 + $0x20] sm:$0xff]  ;;  %v105_v28 = vld [vmem:[#allocation9 + $0x30] sm:$0xff]  ;;  %v100_v29 = vld [vmem:[#allocation9 + $0x8] sm:$0xff]  ;;  %s3804_s14 = smov 9   ;;  %s3805_s15 = smov [#allocation15]  }
  0x54   :  { %159 = vmatprep.subr.mxu0 %v112_v17  ;;  %230 = vmatprep.subr.mxu1 %v114_v18  ;;  %v102_v30 = vld [vmem:[#allocation9 + $0x18] sm:$0xff]  ;;  %v99_v31 = vld [vmem:[#allocation9] sm:$0xff]  ;;  %v101_v32 = vld [vmem:[#allocation9 + $0x10] sm:$0xff]  ;;  %s3568_s16 = sshll.u32 %s3805_s15, 4  ;;  %s3569_s16 = int_to_ptr.vmem [resolvable:$true] %s3568_s16 }
  0x55   :  { %160 = vmatpush1.msra.mxu0 %v111_v19  ;;  %231 = vmatpush1.msra.mxu1 %v113_v20  ;;  %v98_v33 = vld [vmem:[#allocation7] sm:$0xff]  ;;  %v3859_v34 = vld [vmem:[#allocation4 + $0x8] sm:$0xff]  ;;  %v3861_v35 = vld [vmem:[#allocation4 + $0x10] sm:$0xff]  ;;  %s3749_s17 = scalar_lea.vmem %s3569_s16, 512  ;;  %p3754_p3 = scmp.lt.s32.totalorder %s3569_s16, %s3569_s16 }
  0x56   :  { %161 = vmatprep.subr.mxu0 %v108_v21  ;;  %232 = vmatprep.subr.mxu1 %v110_v22  ;;  %v3867_v36 = vld [vmem:[#allocation4] sm:$0xff]  ;;  %v3873_v37 = vld [vmem:[#allocation4 + $0x18] sm:$0xff]  ;;  %p3750_p2 = scmp.ne.s32.totalorder %s3569_s16, %s3749_s17  ;;  %p3755_p4 = scmp.lt.s32.totalorder %s3749_s17, %s3749_s17 }
  0x57   :  { %162 = vmatpush1.msra.mxu0 %v107_v23  ;;  %233 = vmatpush1.msra.mxu1 %v109_v24 }
  0x58   :  { %163 = vmatprep.subr.mxu0 %v104_v25  ;;  %234 = vmatprep.subr.mxu1 %v106_v26  ;;  %v1748_v26 = vld [vmem:[#allocation12 + $0x18] sm:$0xff]  ;;  %p3756_p5 = por %p3755_p4, %p3754_p3 }
  0x59   :  { %164 = vmatpush1.msra.mxu0 %v103_v27  ;;  %235 = vmatpush1.msra.mxu1 %v105_v28 }
  0x5a   :  { %165 = vmatprep.subr.mxu0 %v100_v29  ;;  %236 = vmatprep.subr.mxu1 %v102_v30  ;;  %p3757_p6 = pnand %p3756_p5, %p3750_p2 }
  0x5b   :  { %166 = vmatpush1.msra.mxu0 %v99_v31  ;;  %237 = vmatpush1.msra.mxu1 %v101_v32 }
  0x5c   :  { %3580 = vmatmul.mubr.msk.f32.vlgmr.msra.gmra.mxu0 %vm131_vm0, %v98_v33  ;;  %3581 = vmatmul.mubr.msk.f32.vlgmr.msra.gmra.mxu1 %vm131_vm0, %v98_v33 }
  0x5d   :  { %622 = vrot.lane.b32.xlu0 %v3859_v34, %s3788_s4  ;;  %626 = vrot.lane.b32.xlu1 %v3861_v35, %s3788_s4 }
  0x5e   :  { %3582 = vmatprep.mubr.msk.f32.mxu1 %vm1965_vm1, %v1748_v26 }
  0x61   :  { %746 = vrot.lane.b32.xlu0 %v3867_v36, %s3789_s5  ;;  %750 = vrot.lane.b32.xlu1 %v3859_v34, %s3789_s5 }
  0x65   :  { %618 = vrot.lane.b32.xlu0 %v3867_v36, %s3788_s4  ;;  %758 = vrot.lane.b32.xlu1 %v3873_v37, %s3789_s5 }
  0x69   :  { %558 = vrot.lane.b32.xlu0 %v3859_v34, %s3790_s25  ;;  %562 = vrot.lane.b32.xlu1 %v3861_v35, %s3790_s25 }
  0x6d   :  { %682 = vrot.lane.b32.xlu0 %v3867_v36, %s3791_s26  ;;  %686 = vrot.lane.b32.xlu1 %v3859_v34, %s3791_s26 }
  0x71   :  { %554 = vrot.lane.b32.xlu0 %v3867_v36, %s3790_s25  ;;  %694 = vrot.lane.b32.xlu1 %v3873_v37, %s3791_s26 }
  0x75   :  { %494 = vrot.lane.b32.xlu0 %v3859_v34, %s3792_s27  ;;  %498 = vrot.lane.b32.xlu1 %v3861_v35, %s3792_s27 }
  0x79   :  { %490 = vrot.lane.b32.xlu0 %v3867_v36, %s3792_s27  ;;  %630 = vrot.lane.b32.xlu1 %v3873_v37, %s3788_s4 }
  0x7d   :  { %430 = vrot.lane.b32.xlu0 %v3859_v34, %s3793_s28  ;;  %434 = vrot.lane.b32.xlu1 %v3861_v35, %s3793_s28 }
  0x81   :  { %426 = vrot.lane.b32.xlu0 %v3867_v36, %s3793_s28  ;;  %566 = vrot.lane.b32.xlu1 %v3873_v37, %s3790_s25 }
  0x85   :  { %366 = vrot.lane.b32.xlu0 %v3859_v34, %s3794_s29  ;;  %370 = vrot.lane.b32.xlu1 %v3861_v35, %s3794_s29 }
  0x89   :  { %362 = vrot.lane.b32.xlu0 %v3867_v36, %s3794_s29  ;;  %502 = vrot.lane.b32.xlu1 %v3873_v37, %s3792_s27 }
  0x8d   :  { %301 = vrot.lane.b32.xlu0 %v3859_v34, %s3795_s30  ;;  %305 = vrot.lane.b32.xlu1 %v3861_v35, %s3795_s30 }
  0x91   :  { %297 = vrot.lane.b32.xlu0 %v3867_v36, %s3795_s30  ;;  %438 = vrot.lane.b32.xlu1 %v3873_v37, %s3793_s28 }
  0x95   :  { %1334 = vrot.lane.b32.xlu0 %v3859_v34, %s3796_s7  ;;  %1338 = vrot.lane.b32.xlu1 %v3861_v35, %s3796_s7 }
  0x99   :  { %374 = vrot.lane.b32.xlu0 %v3873_v37, %s3794_s29  ;;  %1330 = vrot.lane.b32.xlu1 %v3867_v36, %s3796_s7 }
  0x9d   :  { %1270 = vrot.lane.b32.xlu0 %v3859_v34, %s3797_s8  ;;  %1274 = vrot.lane.b32.xlu1 %v3861_v35, %s3797_s8 }
  0xa1   :  { %309 = vrot.lane.b32.xlu0 %v3873_v37, %s3795_s30  ;;  %1266 = vrot.lane.b32.xlu1 %v3867_v36, %s3797_s8 }
  0xa5   :  { %814 = vrot.lane.b32.xlu0 %v3859_v34, %s3798_s9  ;;  %818 = vrot.lane.b32.xlu1 %v3861_v35, %s3798_s9 }
  0xa9   :  { %1206 = vrot.lane.b32.xlu0 %v3859_v34, %s3799_s10  ;;  %1210 = vrot.lane.b32.xlu1 %v3861_v35, %s3799_s10 }
  0xad   :  { %810 = vrot.lane.b32.xlu0 %v3867_v36, %s3798_s9  ;;  %1202 = vrot.lane.b32.xlu1 %v3867_v36, %s3799_s10 }
  0xb1   :  { %754 = vrot.lane.b32.xlu0 %v3861_v35, %s3789_s5  ;;  %1142 = vrot.lane.b32.xlu1 %v3859_v34, %s3800_s1 }
  0xb5   :  { %1138 = vrot.lane.b32.xlu1 %v3867_v36, %s3800_s1  ;;  %1146 = vrot.lane.b32.xlu0 %v3861_v35, %s3800_s1 }
  0xb9   :  { %690 = vrot.lane.b32.xlu1 %v3861_v35, %s3791_s26  ;;  %1070 = vrot.lane.b32.xlu0 %v3859_v34, %s3801_s11 }
  0xbd   :  { %1066 = vrot.lane.b32.xlu1 %v3867_v36, %s3801_s11  ;;  %1006 = vrot.lane.b32.xlu0 %v3859_v34, %s3802_s12 }
  0xc1   :  { %1078 = vrot.lane.b32.xlu1 %v3873_v37, %s3801_s11 }
  0xc5   :  { %1002 = vrot.lane.b32.xlu1 %v3867_v36, %s3802_s12 }
  0xcf   :  { %v3971_v38 = vpop.permute.xlu1 %626  ;;  %v3977_v41 = vpop.permute.xlu0 %622 }
  0xd0   :  { %6713 = vst [vmem:[#allocation21_spill] sm:$0xff] %v3971_v38 }
  0xd3   :  { %v3973_v39 = vpop.permute.xlu1 %750  ;;  %v3981_v43 = vpop.permute.xlu0 %746 }
  0xd7   :  { %v3975_v40 = vpop.permute.xlu1 %758  ;;  %v3985_v45 = vpop.permute.xlu0 %618 }
  0xd8   :  { %6714 = vst [vmem:[#allocation22_spill] sm:$0xff] %v3975_v40 }
  0xdb   :  { %v3979_v42 = vpop.permute.xlu1 %562  ;;  %v3989_v47 = vpop.permute.xlu0 %558 }
  0xdf   :  { %v3983_v44 = vpop.permute.xlu1 %686  ;;  %v3993_v49 = vpop.permute.xlu0 %682 }
  0xe0   :  { %6715 = vst [vmem:[#allocation23_spill] sm:$0xff] %v3983_v44 }
  0xe3   :  { %v3987_v46 = vpop.permute.xlu1 %694  ;;  %v3997_v51 = vpop.permute.xlu0 %554 }
  0xe4   :  { %6716 = vst [vmem:[#allocation24_spill] sm:$0xff] %v3987_v46 }
  0xe7   :  { %v3991_v48 = vpop.permute.xlu1 %498  ;;  %v4009_v55 = vpop.permute.xlu0 %494 }
  0xe8   :  { %6717 = vst [vmem:[#allocation25_spill] sm:$0xff] %v3991_v48 }
  0xeb   :  { %v3995_v50 = vpop.permute.xlu1 %630  ;;  %v4021_v57 = vpop.permute.xlu0 %490 }
  0xec   :  { %6718 = vst [vmem:[#allocation26_spill] sm:$0xff] %v3995_v50 }
  0xef   :  { %v4007_v54 = vpop.permute.xlu1 %434  ;;  %v4029_v59 = vpop.permute.xlu0 %430 }
  0xf0   :  { %6721 = vst [vmem:[#allocation29_spill] sm:$0xff] %v4007_v54 }
  0xf3   :  { %v4015_v56 = vpop.permute.xlu1 %566  ;;  %v4041_v61 = vpop.permute.xlu0 %426 }
  0xf4   :  { %6722 = vst [vmem:[#allocation30_spill] sm:$0xff] %v4015_v56 }
  0xf7   :  { %v4027_v58 = vpop.permute.xlu1 %370  ;;  %v4049_v63 = vpop.permute.xlu0 %366 }
  0xf8   :  { %6723 = vst [vmem:[#allocation31_spill] sm:$0xff] %v4027_v58  ;;  %6726 = vst [vmem:[#allocation34_spill] sm:$0xff] %v4049_v63  ;;  %v4442_v63 = vld [vmem:[#allocation10 + $0x20] ss:$8 sm:$0xf] }
  0xf9   :  { %6802 = vst [vmem:[#allocation110_spill] sm:$0xff] %v4442_v63  ;;  %v4444_v58 = vld [vmem:[#allocation10 + $0x62] ss:$8 sm:$0xf] }
  0xfa   :  { %6803 = vst [vmem:[#allocation111_spill] sm:$0xff] %v4444_v58 }
  0xfb   :  { %v4035_v60 = vpop.permute.xlu1 %502  ;;  %v4061_v1 = vpop.permute.xlu0 %362 }
  0xfc   :  { %6724 = vst [vmem:[#allocation32_spill] sm:$0xff] %v4035_v60  ;;  %6728 = vst [vmem:[#allocation36_spill] sm:$0xff] %v4061_v1  ;;  %v4362_v60 = vld [vmem:[#allocation10 + $0x43] ss:$8 sm:$0xf] }
  0xff   :  { %v4047_v62 = vpop.permute.xlu1 %305  ;;  %v4069_v3 = vpop.permute.xlu0 %301 }
 0x100   :  { %6725 = vst [vmem:[#allocation33_spill] sm:$0xff] %v4047_v62  ;;  %6730 = vst [vmem:[#allocation38_spill] sm:$0xff] %v4069_v3  ;;  %v4384_v62 = vld [vmem:[#allocation10] ss:$8 sm:$0xf] }
 0x101   :  { %6788 = vst [vmem:[#allocation96_spill] sm:$0xff] %v4384_v62 }
 0x103   :  { %v4055_v0 = vpop.permute.xlu1 %438  ;;  %v4081_v5 = vpop.permute.xlu0 %297 }
 0x104   :  { %6727 = vst [vmem:[#allocation35_spill] sm:$0xff] %v4055_v0  ;;  %6732 = vst [vmem:[#allocation40_spill] sm:$0xff] %v4081_v5  ;;  %v4321_v0 = vld [vmem:[#allocation10 + $0x45] ss:$8 sm:$0xf] }
 0x107   :  { %v4067_v2 = vpop.permute.xlu1 %1338  ;;  %v4089_v7 = vpop.permute.xlu0 %1334 }
 0x108   :  { %6729 = vst [vmem:[#allocation37_spill] sm:$0xff] %v4067_v2  ;;  %6734 = vst [vmem:[#allocation42_spill] sm:$0xff] %v4089_v7  ;;  %v4360_v2 = vld [vmem:[#allocation10 + $0x1] ss:$8 sm:$0xf] }
 0x109   :  { %6783 = vst [vmem:[#allocation91_spill] sm:$0xff] %v4360_v2 }
 0x10b   :  { %v4075_v4 = vpop.permute.xlu1 %1330  ;;  %v4103_v10 = vpop.permute.xlu0 %374 }
 0x10c   :  { %6731 = vst [vmem:[#allocation39_spill] sm:$0xff] %v4075_v4  ;;  %6737 = vst [vmem:[#allocation45_spill] sm:$0xff] %v4103_v10  ;;  %v4319_v10 = vld [vmem:[#allocation10 + $0x3] ss:$8 sm:$0xf] }
 0x10d   :  { %6778 = vst [vmem:[#allocation86_spill] sm:$0xff] %v4319_v10  ;;  %v4339_v4 = vld [vmem:[#allocation10 + $0x2] ss:$8 sm:$0xf] }
 0x10f   :  { %v4087_v6 = vpop.permute.xlu1 %1274  ;;  %v4113_v13 = vpop.permute.xlu0 %1270 }
 0x110   :  { %6733 = vst [vmem:[#allocation41_spill] sm:$0xff] %v4087_v6  ;;  %6740 = vst [vmem:[#allocation48_spill] sm:$0xff] %v4113_v13 }
 0x113   :  { %v4097_v9 = vpop.permute.xlu1 %1266  ;;  %v4125_v15 = vpop.permute.xlu0 %309 }
 0x114   :  { %6736 = vst [vmem:[#allocation44_spill] sm:$0xff] %v4097_v9  ;;  %6742 = vst [vmem:[#allocation50_spill] sm:$0xff] %v4125_v15  ;;  %v4294_v15 = vld [vmem:[#allocation10 + $0x5] ss:$8 sm:$0xf] }
 0x115   :  { %v4296_v9 = vld [vmem:[#allocation10 + $0x61] ss:$8 sm:$0xf] }
 0x117   :  { %v4111_v12 = vpop.permute.xlu1 %818  ;;  %v4133_v17 = vpop.permute.xlu0 %814 }
 0x118   :  { %6739 = vst [vmem:[#allocation47_spill] sm:$0xff] %v4111_v12  ;;  %6744 = vst [vmem:[#allocation52_spill] sm:$0xff] %v4133_v17 }
 0x11b   :  { %v4119_v14 = vpop.permute.xlu1 %1210  ;;  %v4145_v19 = vpop.permute.xlu0 %1206 }
 0x11c   :  { %v3999_v52 = vpop.f32.mrf.mxu0  ;;  %v4001_v53 = vpop.f32.mrf.mxu1  ;;  %6741 = vst [vmem:[#allocation49_spill] sm:$0xff] %v4119_v14  ;;  %6746 = vst [vmem:[#allocation54_spill] sm:$0xff] %v4145_v19 }
 0x11d   :  { %6719 = vst [vmem:[#allocation27_spill] sm:$0xff] %v3999_v52  ;;  %6720 = vst [vmem:[#allocation28_spill] sm:$0xff] %v4001_v53  ;;  %628 = vrot.lane.b32.xlu0 %v4001_v53, %s3788_s4  ;;  %748 = vrot.lane.b32.xlu1 %v3999_v52, %s3789_s5 }
 0x11e   :  { %v4095_v8 = vpop.f32.mrf.mxu0  ;;  %v4105_v11 = vpop.f32.mrf.mxu1 }
 0x11f   :  { %6735 = vst [vmem:[#allocation43_spill] sm:$0xff] %v4095_v8  ;;  %6738 = vst [vmem:[#allocation46_spill] sm:$0xff] %v4105_v11  ;;  %v4131_v16 = vpop.permute.xlu1 %1202  ;;  %v4153_v21 = vpop.permute.xlu0 %810 }
 0x120   :  { %6743 = vst [vmem:[#allocation51_spill] sm:$0xff] %v4131_v16  ;;  %6748 = vst [vmem:[#allocation56_spill] sm:$0xff] %v4153_v21 }
 0x121   :  { %620 = vrot.lane.b32.xlu0 %v3999_v52, %s3788_s4  ;;  %564 = vrot.lane.b32.xlu1 %v4001_v53, %s3790_s25 }
 0x123   :  { %v4139_v18 = vpop.permute.xlu1 %1142  ;;  %v4165_v23 = vpop.permute.xlu0 %754 }
 0x124   :  { %6745 = vst [vmem:[#allocation53_spill] sm:$0xff] %v4139_v18  ;;  %6750 = vst [vmem:[#allocation58_spill] sm:$0xff] %v4165_v23  ;;  %v313_v23 = vlaneseq }
 0x125   :  { %684 = vrot.lane.b32.xlu0 %v3999_v52, %s3791_s26  ;;  %500 = vrot.lane.b32.xlu1 %v4001_v53, %s3792_s27 }
 0x126   :  { %v4276_v21 = vshrl.u32 %v313_v23, 7 }
 0x127   :  { %v4151_v20 = vpop.permute.xlu1 %1138  ;;  %v4173_v25 = vpop.permute.xlu0 %1146 }
 0x128   :  { %6747 = vst [vmem:[#allocation55_spill] sm:$0xff] %v4151_v20  ;;  %6752 = vst [vmem:[#allocation60_spill] sm:$0xff] %v4173_v25  ;;  %v4289_v12 = vsub.s32 2, %v4276_v21  ;;  %v4401_v56 = vsub.s32 1, %v4276_v21 }
 0x129   :  { %556 = vrot.lane.b32.xlu0 %v3999_v52, %s3790_s25  ;;  %436 = vrot.lane.b32.xlu1 %v4001_v53, %s3793_s28 }
 0x12a   :  { %6773 = vst [vmem:[#allocation81_spill] sm:$0xff] %v4289_v12  ;;  %6792 = vst [vmem:[#allocation100_spill] sm:$0xff] %v4401_v56 }
 0x12b   :  { %v4159_v22 = vpop.permute.xlu1 %690  ;;  %v4181_v28 = vpop.permute.xlu0 %1070 }
 0x12c   :  { %6749 = vst [vmem:[#allocation57_spill] sm:$0xff] %v4159_v22  ;;  %6754 = vst [vmem:[#allocation62_spill] sm:$0xff] %v4181_v28 }
 0x12d   :  { %492 = vrot.lane.b32.xlu0 %v3999_v52, %s3792_s27  ;;  %372 = vrot.lane.b32.xlu1 %v4001_v53, %s3794_s29 }
 0x12f   :  { %v4171_v24 = vpop.permute.xlu1 %1066  ;;  %v4194_v30 = vpop.permute.xlu0 %1006 }
 0x130   :  { %6751 = vst [vmem:[#allocation59_spill] sm:$0xff] %v4171_v24  ;;  %6756 = vst [vmem:[#allocation64_spill] sm:$0xff] %v4194_v30 }
 0x131   :  { %428 = vrot.lane.b32.xlu0 %v3999_v52, %s3793_s28  ;;  %307 = vrot.lane.b32.xlu1 %v4001_v53, %s3795_s30 }
 0x133   :  { %v4179_v27 = vpop.permute.xlu1 %1078 }
 0x134   :  { %6753 = vst [vmem:[#allocation61_spill] sm:$0xff] %v4179_v27 }
 0x135   :  { %364 = vrot.lane.b32.xlu0 %v3999_v52, %s3794_s29  ;;  %1340 = vrot.lane.b32.xlu1 %v4001_v53, %s3796_s7 }
 0x137   :  { %v4192_v29 = vpop.permute.xlu1 %1002 }
 0x138   :  { %6755 = vst [vmem:[#allocation63_spill] sm:$0xff] %v4192_v29 }
 0x139   :  { %299 = vrot.lane.b32.xlu0 %v3999_v52, %s3795_s30  ;;  %1332 = vrot.lane.b32.xlu1 %v3999_v52, %s3796_s7 }
 0x13d   :  { %812 = vrot.lane.b32.xlu0 %v3999_v52, %s3798_s9  ;;  %1276 = vrot.lane.b32.xlu1 %v4001_v53, %s3797_s8 }
 0x141   :  { %756 = vrot.lane.b32.xlu0 %v4001_v53, %s3789_s5  ;;  %1268 = vrot.lane.b32.xlu1 %v3999_v52, %s3797_s8 }
 0x145   :  { %1148 = vrot.lane.b32.xlu0 %v4001_v53, %s3800_s1  ;;  %820 = vrot.lane.b32.xlu1 %v4001_v53, %s3798_s9 }
 0x149   :  { %692 = vrot.lane.b32.xlu0 %v4001_v53, %s3791_s26  ;;  %1212 = vrot.lane.b32.xlu1 %v4001_v53, %s3799_s10 }
 0x14d   :  { %1068 = vrot.lane.b32.xlu0 %v3999_v52, %s3801_s11  ;;  %1204 = vrot.lane.b32.xlu1 %v3999_v52, %s3799_s10 }
 0x151   :  { %1004 = vrot.lane.b32.xlu0 %v3999_v52, %s3802_s12  ;;  %1140 = vrot.lane.b32.xlu1 %v3999_v52, %s3800_s1 }
 0x155   :  { %752 = vrot.lane.b32.xlu1 %v4095_v8, %s3789_s5  ;;  %624 = vrot.lane.b32.xlu0 %v4095_v8, %s3788_s4 }
 0x159   :  { %760 = vrot.lane.b32.xlu1 %v4105_v11, %s3789_s5  ;;  %560 = vrot.lane.b32.xlu0 %v4095_v8, %s3790_s25 }
 0x15d   :  { %688 = vrot.lane.b32.xlu1 %v4095_v8, %s3791_s26  ;;  %496 = vrot.lane.b32.xlu0 %v4095_v8, %s3792_s27 }
 0x161   :  { %696 = vrot.lane.b32.xlu1 %v4105_v11, %s3791_s26  ;;  %432 = vrot.lane.b32.xlu0 %v4095_v8, %s3793_s28 }
 0x165   :  { %632 = vrot.lane.b32.xlu1 %v4105_v11, %s3788_s4  ;;  %368 = vrot.lane.b32.xlu0 %v4095_v8, %s3794_s29 }
 0x169   :  { %568 = vrot.lane.b32.xlu1 %v4105_v11, %s3790_s25  ;;  %303 = vrot.lane.b32.xlu0 %v4095_v8, %s3795_s30 }
 0x16d   :  { %504 = vrot.lane.b32.xlu1 %v4105_v11, %s3792_s27  ;;  %940 = vrot.lane.b32.xlu0 %v3999_v52, %s3803_s13 }
 0x171   :  { %440 = vrot.lane.b32.xlu1 %v4105_v11, %s3793_s28  ;;  %1336 = vrot.lane.b32.xlu0 %v4095_v8, %s3796_s7 }
 0x175   :  { %1014 = vrot.lane.b32.xlu1 %v3873_v37, %s3802_s12  ;;  %376 = vrot.lane.b32.xlu0 %v4105_v11, %s3794_s29 }
 0x179   :  { %938 = vrot.lane.b32.xlu1 %v3867_v36, %s3803_s13  ;;  %1272 = vrot.lane.b32.xlu0 %v4095_v8, %s3797_s8 }
 0x17d   :  { %1144 = vrot.lane.b32.xlu1 %v4095_v8, %s3800_s1  ;;  %311 = vrot.lane.b32.xlu0 %v4105_v11, %s3795_s30 }
 0x181   :  { %1072 = vrot.lane.b32.xlu1 %v4095_v8, %s3801_s11  ;;  %816 = vrot.lane.b32.xlu0 %v4095_v8, %s3798_s9 }
 0x185   :  { %1008 = vrot.lane.b32.xlu1 %v4095_v8, %s3802_s12  ;;  %1208 = vrot.lane.b32.xlu0 %v4095_v8, %s3799_s10 }
 0x189   :  { %944 = vrot.lane.b32.xlu1 %v4095_v8, %s3803_s13  ;;  %1080 = vrot.lane.b32.xlu0 %v4105_v11, %s3801_s11 }
 0x18d   :  { %950 = vrot.lane.b32.xlu1 %v3873_v37, %s3803_s13  ;;  %1016 = vrot.lane.b32.xlu0 %v4105_v11, %s3802_s12 }
 0x18f   :  { %v4200_v31 = vpop.permute.xlu0 %628  ;;  %v4202_v32 = vpop.permute.xlu1 %748 }
 0x190   :  { %6757 = vst [vmem:[#allocation65_spill] sm:$0xff] %v4200_v31 }
 0x191   :  { %880 = vrot.lane.b32.xlu1 %v4095_v8, %s3804_s14  ;;  %952 = vrot.lane.b32.xlu0 %v4105_v11, %s3803_s13 }
 0x193   :  { %v4208_v33 = vpop.permute.xlu0 %620  ;;  %v4210_v26 = vpop.permute.xlu1 %564 }
 0x194   :  { %6758 = vst [vmem:[#allocation66_spill] sm:$0xff] %v4210_v26 }
 0x195   :  { %874 = vrot.lane.b32.xlu1 %v3867_v36, %s3804_s14  ;;  %942 = vrot.lane.b32.xlu0 %v3859_v34, %s3803_s13  ;;  %v1746_v36 = vld [vmem:[#allocation12 + $0x8] sm:$0xff] }
 0x196   :  { %2033 = vmatprep.mubr.f32.mxu0 %v1746_v36 }
 0x197   :  { %v4216_v29 = vpop.permute.xlu0 %684  ;;  %v4218_v30 = vpop.permute.xlu1 %500 }
 0x198   :  { %6759 = vst [vmem:[#allocation67_spill] sm:$0xff] %v4218_v30 }
 0x199   :  { %886 = vrot.lane.b32.xlu1 %v3873_v37, %s3804_s14  ;;  %876 = vrot.lane.b32.xlu0 %v3999_v52, %s3804_s14 }
 0x19b   :  { %v4224_v27 = vpop.permute.xlu0 %556  ;;  %v4226_v8 = vpop.permute.xlu1 %436 }
 0x19c   :  { %6760 = vst [vmem:[#allocation68_spill] sm:$0xff] %v4226_v8 }
 0x19d   :  { %822 = vrot.lane.b32.xlu1 %v3873_v37, %s3798_s9  ;;  %888 = vrot.lane.b32.xlu0 %v4105_v11, %s3804_s14 }
 0x19f   :  { %v4232_v24 = vpop.permute.xlu0 %492  ;;  %v4234_v28 = vpop.permute.xlu1 %372 }
 0x1a0   :  { %6761 = vst [vmem:[#allocation69_spill] sm:$0xff] %v4234_v28  ;;  %v4423_v28 = vld [vmem:[#allocation10 + $0x40] ss:$8 sm:$0xf] }
 0x1a1   :  { %1214 = vrot.lane.b32.xlu1 %v3873_v37, %s3799_s10  ;;  %878 = vrot.lane.b32.xlu0 %v3859_v34, %s3804_s14  ;;  %6797 = vst [vmem:[#allocation105_spill] sm:$0xff] %v4423_v28 }
 0x1a3   :  { %v4240_v52 = vpop.permute.xlu0 %428  ;;  %v4242_v20 = vpop.permute.xlu1 %307 }
 0x1a4   :  { %6762 = vst [vmem:[#allocation70_spill] sm:$0xff] %v4242_v20  ;;  %v4394_v20 = vrot.slane %v4339_v4, %v4289_v12 }
 0x1a5   :  { %1150 = vrot.lane.b32.xlu1 %v3873_v37, %s3800_s1  ;;  %824 = vrot.lane.b32.xlu0 %v4105_v11, %s3798_s9 }
 0x1a6   :  { %6790 = vst [vmem:[#allocation98_spill] sm:$0xff] %v4394_v20  ;;  %v4415_v20 = vrot.slane %v4360_v2, %v4289_v12 }
 0x1a7   :  { %v4248_v18 = vpop.permute.xlu0 %364  ;;  %v4250_v25 = vpop.permute.xlu1 %1340 }
 0x1a8   :  { %6763 = vst [vmem:[#allocation71_spill] sm:$0xff] %v4248_v18  ;;  %6764 = vst [vmem:[#allocation72_spill] sm:$0xff] %v4250_v25  ;;  %v4341_v25 = vld [vmem:[#allocation10 + $0x44] ss:$8 sm:$0xf] }
 0x1a9   :  { %1344 = vrot.lane.b32.xlu1 %v4105_v11, %s3796_s7  ;;  %1216 = vrot.lane.b32.xlu0 %v4105_v11, %s3799_s10  ;;  %6795 = vst [vmem:[#allocation103_spill] sm:$0xff] %v4415_v20  ;;  %v4421_v18 = vld [vmem:[#allocation10 + $0x41] ss:$8 sm:$0xf]  ;;  %v4436_v20 = vrot.slane %v4384_v62, %v4289_v12 }
 0x1ab   :  { %v4256_v34 = vpop.permute.xlu0 %299  ;;  %v4258_v36 = vpop.permute.xlu1 %1332  ;;  %6800 = vst [vmem:[#allocation108_spill] sm:$0xff] %v4436_v20  ;;  %v4459_v20 = vsub.s32 3, %v4276_v21 }
 0x1ac   :  { %6765 = vst [vmem:[#allocation73_spill] sm:$0xff] %v4256_v34  ;;  %6766 = vst [vmem:[#allocation74_spill] sm:$0xff] %v4258_v36 }
 0x1ad   :  { %1342 = vrot.lane.b32.xlu1 %v3873_v37, %s3796_s7  ;;  %1152 = vrot.lane.b32.xlu0 %v4105_v11, %s3800_s1  ;;  %6807 = vst [vmem:[#allocation115_spill] sm:$0xff] %v4459_v20 }
 0x1af   :  { %v4264_v22 = vpop.permute.xlu0 %812  ;;  %v4266_v16 = vpop.permute.xlu1 %1276 }
 0x1b0   :  { %6767 = vst [vmem:[#allocation75_spill] sm:$0xff] %v4264_v22  ;;  %6768 = vst [vmem:[#allocation76_spill] sm:$0xff] %v4266_v16  ;;  %v4316_v16 = vld [vmem:[#allocation10 + $0x6] ss:$8 sm:$0xf] }
 0x1b1   :  { %1280 = vrot.lane.b32.xlu1 %v4105_v11, %s3797_s8  ;;  %1076 = vrot.lane.b32.xlu0 %v4001_v53, %s3801_s11  ;;  %v4286_v11 = vand.u32 127, %v313_v23  ;;  %v4304_v23 = vld [vmem:[#allocation10 + $0x7] ss:$8 sm:$0xf] }
 0x1b3   :  { %v4272_v19 = vpop.permute.xlu0 %756  ;;  %v4274_v14 = vpop.permute.xlu1 %1268  ;;  %vm6689_vm2 = vcmp.lt.s32.totalorder %v4286_v11, 63  ;;  %vm762_vm3 = vcmp.lt.s32.totalorder %v4286_v11, 56  ;;  %vm570_vm4 = vcmp.lt.s32.totalorder %v4286_v11, 64  ;;  %vm506_vm5 = vcmp.lt.s32.totalorder %v4286_v11, 65 }
 0x1b4   :  { %6769 = vst [vmem:[#allocation77_spill] sm:$0xff] %v4272_v19  ;;  %6770 = vst [vmem:[#allocation78_spill] sm:$0xff] %v4274_v14  ;;  %v4292_v19 = vsub.s32 0, %v4276_v21  ;;  %v4314_v14 = vld [vmem:[#allocation10 + $0x46] ss:$8 sm:$0xf] }
 0x1b5   :  { %1278 = vrot.lane.b32.xlu1 %v3873_v37, %s3797_s8  ;;  %1074 = vrot.lane.b32.xlu0 %v3861_v35, %s3801_s11  ;;  %v4302_v37 = vld [vmem:[#allocation10 + $0x47] ss:$8 sm:$0xf]  ;;  %vm6688_vm6 = vcmp.lt.s32.totalorder %v4286_v11, 57  ;;  %vm442_vm7 = vcmp.lt.s32.totalorder %v4286_v11, 71  ;;  %vm378_vm8 = vcmp.lt.s32.totalorder %v4286_v11, 72 }
 0x1b6   :  { %6774 = vst [vmem:[#allocation82_spill] sm:$0xff] %v4292_v19  ;;  %v4337_v36 = vrot.slane %v4302_v37, %v4292_v19  ;;  %v4358_v7 = vrot.slane %v4314_v14, %v4292_v19  ;;  %v4370_v3 = vrot.slane %v4316_v16, %v4292_v19  ;;  %v4419_v1 = vrot.slane %v4362_v60, %v4292_v19 }
 0x1b7   :  { %v4282_v22 = vpop.permute.xlu0 %1148  ;;  %v4284_v17 = vpop.permute.xlu1 %820  ;;  %vm315_vm9 = vcmp.lt.s32.totalorder %v4286_v11, 73  ;;  %vm1346_vm10 = vcmp.lt.s32.totalorder %v4286_v11, 119  ;;  %vm1282_vm11 = vcmp.lt.s32.totalorder %v4286_v11, 120  ;;  %vm826_vm12 = vcmp.lt.s32.totalorder %v4286_v11, 55 }
 0x1b8   :  { %6771 = vst [vmem:[#allocation79_spill] sm:$0xff] %v4282_v22  ;;  %6772 = vst [vmem:[#allocation80_spill] sm:$0xff] %v4284_v17  ;;  %v4306_v22 = vld [vmem:[#allocation10 + $0x4] ss:$8 sm:$0xf]  ;;  %vm1218_vm13 = vcmp.lt.s32.totalorder %v4286_v11, 121 }
 0x1b9   :  { %946 = vrot.lane.b32.xlu1 %v3861_v35, %s3803_s13  ;;  %1012 = vrot.lane.b32.xlu0 %v4001_v53, %s3802_s12  ;;  %v4308_v17 = vld [vmem:[#allocation10 + $0x60] ss:$8 sm:$0xf]  ;;  %6796 = vst [vmem:[#allocation104_spill] sm:$0xff] %v4419_v1  ;;  %vm1154_vm14 = vcmp.lt.s32.totalorder %v4286_v11, 127  ;;  %vm1082_vm15 = vcmp.lt.s32.totalorder %v4286_v11, 1 }
 0x1ba   :  { %6775 = vst [vmem:[#allocation83_spill] sm:$0xff] %v4308_v17  ;;  %vm1018_vm0 = vcmp.lt.s32.totalorder %v4286_v11, 7 }
 0x1bb   :  { %v4310_v13 = vpop.permute.xlu0 %692  ;;  %v4312_v6 = vpop.permute.xlu1 %1212 }
 0x1bc   :  { %6776 = vst [vmem:[#allocation84_spill] sm:$0xff] %v4310_v13  ;;  %6777 = vst [vmem:[#allocation85_spill] sm:$0xff] %v4312_v6  ;;  %v4329_v13 = vrot.slane %v4294_v15, %v4289_v12  ;;  %v4333_v6 = vrot.slane %v4296_v9, %v4292_v19 }
 0x1bd   :  { %882 = vrot.lane.b32.xlu1 %v3861_v35, %s3804_s14  ;;  %1010 = vrot.lane.b32.xlu0 %v3861_v35, %s3802_s12  ;;  %v4346_v35 = vrot.slane %v4304_v23, %v4292_v19 }
 0x1be   :  { %6779 = vst [vmem:[#allocation87_spill] sm:$0xff] %v4329_v13  ;;  %6780 = vst [vmem:[#allocation88_spill] sm:$0xff] %v4333_v6  ;;  %v4350_v13 = vrot.slane %v4306_v22, %v4289_v12  ;;  %v4354_v6 = vrot.slane %v4308_v17, %v4292_v19  ;;  %v4382_v17 = vrot.slane %v4294_v15, %v4292_v19 }
 0x1bf   :  { %v4364_v5 = vpop.permute.xlu0 %1068  ;;  %v4366_v34 = vpop.permute.xlu1 %1204 }
 0x1c0   :  { %6781 = vst [vmem:[#allocation89_spill] sm:$0xff] %v4350_v13  ;;  %6782 = vst [vmem:[#allocation90_spill] sm:$0xff] %v4354_v6  ;;  %v4374_v13 = vrot.slane %v4319_v10, %v4289_v12  ;;  %v4378_v6 = vrot.slane %v4321_v0, %v4292_v19 }
 0x1c1   :  { %6784 = vst [vmem:[#allocation92_spill] sm:$0xff] %v4364_v5  ;;  %6785 = vst [vmem:[#allocation93_spill] sm:$0xff] %v4366_v34  ;;  %v4386_v5 = vld [vmem:[#allocation10 + $0x42] ss:$8 sm:$0xf]  ;;  %v4390_v34 = vrot.slane %v4302_v37, %v4289_v12  ;;  %948 = vrot.lane.b32.xlu0 %v4001_v53, %s3803_s13 }
 0x1c2   :  { %6786 = vst [vmem:[#allocation94_spill] sm:$0xff] %v4374_v13  ;;  %6787 = vst [vmem:[#allocation95_spill] sm:$0xff] %v4382_v17  ;;  %v4398_v13 = vrot.slane %v4341_v25, %v4292_v19  ;;  %v4407_v17 = vrot.slane %v4306_v22, %v4292_v19  ;;  %v4440_v1 = vrot.slane %v4386_v5, %v4292_v19 }
 0x1c3   :  { %6789 = vst [vmem:[#allocation97_spill] sm:$0xff] %v4390_v34  ;;  %v4411_v34 = vrot.slane %v4314_v14, %v4289_v12  ;;  %v4446_v50 = vpop.permute.xlu0 %1004  ;;  %v4481_v21 = vrot.slane %v4386_v5, %v4289_v12 }
 0x1c4   :  { %6791 = vst [vmem:[#allocation99_spill] sm:$0xff] %v4398_v13  ;;  %6793 = vst [vmem:[#allocation101_spill] sm:$0xff] %v4407_v17  ;;  %v4428_v17 = vrot.slane %v4319_v10, %v4292_v19  ;;  %v4448_v10 = vpop.permute.xlu1 %1140  ;;  %v4465_v13 = vld [vmem:[#allocation10 + $0x27] ss:$8 sm:$0xf] }
 0x1c5   :  { %6794 = vst [vmem:[#allocation102_spill] sm:$0xff] %v4411_v34  ;;  %v4432_v34 = vrot.slane %v4321_v0, %v4289_v12  ;;  %6801 = vst [vmem:[#allocation109_spill] sm:$0xff] %v4440_v1  ;;  %v4463_v1 = vrot.slane %v4360_v2, %v4292_v19  ;;  %884 = vrot.lane.b32.xlu0 %v4001_v53, %s3804_s14  ;;  %v4495_v2 = vrot.slane %v4444_v58, %v4292_v19 }
 0x1c6   :  { %6798 = vst [vmem:[#allocation106_spill] sm:$0xff] %v4428_v17  ;;  %6804 = vst [vmem:[#allocation112_spill] sm:$0xff] %v4446_v50  ;;  %v4452_v17 = vrot.slane %v4339_v4, %v4292_v19  ;;  %v4469_v50 = vrot.slane %v4362_v60, %v4289_v12  ;;  %v4505_v53 = vrot.slane %v4304_v23, %v4289_v12 }
 0x1c7   :  { %6799 = vst [vmem:[#allocation107_spill] sm:$0xff] %v4432_v34  ;;  %6805 = vst [vmem:[#allocation113_spill] sm:$0xff] %v4448_v10  ;;  %v4456_v34 = vrot.slane %v4341_v25, %v4289_v12  ;;  %v4473_v10 = vrot.slane %v4421_v18, %v4292_v19 }
 0x1c8   :  { %6808 = vst [vmem:[#allocation116_spill] sm:$0xff] %v4463_v1  ;;  %6809 = vst [vmem:[#allocation117_spill] sm:$0xff] %v4465_v13  ;;  %v4487_v1 = vrot.slane %v4423_v28, %v4292_v19  ;;  %v4543_v28 = vrot.slane %v4296_v9, %v4401_v56 }
 0x1c9   :  { %6806 = vst [vmem:[#allocation114_spill] sm:$0xff] %v4456_v34  ;;  %6810 = vst [vmem:[#allocation118_spill] sm:$0xff] %v4469_v50  ;;  %v4477_v34 = vrot.slane %v4384_v62, %v4292_v19  ;;  %v4491_v50 = vrot.slane %v4442_v63, %v4289_v12  ;;  %v4509_v62 = vpop.permute.xlu1 %752  ;;  %v781_v63 = vrot.slane %v4304_v23, %v4401_v56 }
 0x1ca   :  { %6811 = vst [vmem:[#allocation119_spill] sm:$0xff] %v4473_v10  ;;  %6813 = vst [vmem:[#allocation121_spill] sm:$0xff] %v4481_v21  ;;  %v4501_v21 = vrot.slane %v4465_v13, %v4292_v19 }
 0x1cb   :  { %6812 = vst [vmem:[#allocation120_spill] sm:$0xff] %v4477_v34  ;;  %6814 = vst [vmem:[#allocation122_spill] sm:$0xff] %v4487_v1  ;;  %v1599_v34 = vrot.slane %v4302_v37, %v4401_v56  ;;  %v4507_v1 = vld [vmem:[#allocation10 + $0x26] ss:$8 sm:$0xf] }
 0x1cc   :  { %6815 = vst [vmem:[#allocation123_spill] sm:$0xff] %v4491_v50  ;;  %6816 = vst [vmem:[#allocation124_spill] sm:$0xff] %v4495_v2  ;;  %v625_v50 = vpop.permute.xlu0 %624  ;;  %v4515_v2 = vrot.slane %v4294_v15, %v4401_v56  ;;  %v4559_v10 = vrot.slane %v4507_v1, %v4292_v19  ;;  %v4599_v19 = vsel %vm762_vm3, %v3975_v40, %v3981_v43 }
 0x1cd   :  { %6817 = vst [vmem:[#allocation125_spill] sm:$0xff] %v4501_v21  ;;  %6818 = vst [vmem:[#allocation126_spill] sm:$0xff] %v4505_v53  ;;  %v4521_v21 = vsel %vm6689_vm2, %v3977_v41, %v3971_v38  ;;  %v4527_v53 = vsel %vm762_vm3, %v4202_v32, %v4509_v62  ;;  %v4532_v13 = vsel %vm6689_vm2, %v625_v50, %v4200_v31  ;;  %v4563_v12 = vpop.permute.xlu1 %760 }
 0x1ce   :  { %6819 = vst [vmem:[#allocation127_spill] sm:$0xff] %v4507_v1  ;;  %6820 = vst [vmem:[#allocation128_spill] sm:$0xff] %v4509_v62  ;;  %v4537_v58 = vsel %vm6689_vm2, %v4208_v33, %v625_v50  ;;  %v4547_v62 = vrot.slane %v4294_v15, %v4459_v20  ;;  %v4551_v31 = vrot.slane %v4302_v37, %v4459_v20 }
 0x1cf   :  { %6821 = vst [vmem:[#allocation129_spill] sm:$0xff] %v4527_v53  ;;  %6822 = vst [vmem:[#allocation130_spill] sm:$0xff] %v4532_v13  ;;  %v1616_v38 = vmul.f32 %v4337_v36, %v4537_v58  ;;  %v639_v50 = vsel %vm6689_vm2, %v3985_v45, %v3977_v41  ;;  %v799_v9 = vmul.f32 %v781_v63, %v4527_v53 }
 0x1d0   :  { %6823 = vst [vmem:[#allocation131_spill] sm:$0xff] %v4543_v28  ;;  %6824 = vst [vmem:[#allocation132_spill] sm:$0xff] %v4547_v62  ;;  %v1617_v28 = vmul.f32 %v1599_v34, %v4532_v13  ;;  %v561_v15 = vpop.permute.xlu0 %560  ;;  %v1613_v62 = vmul.f32 %v1599_v34, %v4521_v21  ;;  %v1560_v37 = vrot.slane %v4314_v14, %v4401_v56 }
 0x1d1   :  { %6825 = vst [vmem:[#allocation133_spill] sm:$0xff] %v4551_v31  ;;  %6826 = vst [vmem:[#allocation134_spill] sm:$0xff] %v4559_v10  ;;  %v4570_v31 = vrot.slane %v4316_v16, %v4401_v56  ;;  %v4574_v41 = vrot.slane %v4306_v22, %v4401_v56  ;;  %v4580_v13 = vsel %vm762_vm3, %v3981_v43, %v3973_v39  ;;  %1969 = vmatprep.subr.mxu0 %v799_v9 }
 0x1d2   :  { %6827 = vst [vmem:[#allocation135_spill] sm:$0xff] %v4563_v12  ;;  %v4587_v34 = vsel %vm762_vm3, %v4563_v12, %v4202_v32  ;;  %2040 = vmatprep.subr.mxu1 %v1617_v28  ;;  %v4592_v10 = vsel %vm570_vm4, %v561_v15, %v4210_v26  ;;  %v1612_v53 = vmul.f32 %v4337_v36, %v639_v50  ;;  %6830 = vst [vmem:[#allocation138_spill] sm:$0xff] %v4599_v19  ;;  %v6842_v12 = vld [vmem:[#allocation34_spill] sm:$0xff] }
 0x1d3   :  { %6828 = vst [vmem:[#allocation136_spill] sm:$0xff] %v4587_v34  ;;  %6829 = vst [vmem:[#allocation137_spill] sm:$0xff] %v4592_v10  ;;  %v798_v9 = vmul.f32 %v4346_v35, %v4587_v34  ;;  %v4606_v28 = vsel %vm570_vm4, %v4224_v27, %v561_v15  ;;  %2041 = vmatpush1.msra.mxu1 %v1616_v38  ;;  %v4612_v32 = vsel %vm570_vm4, %v3989_v47, %v3979_v42  ;;  %v4624_v38 = vpop.permute.xlu1 %688 }
 0x1d4   :  { %v4618_v43 = vsel %vm570_vm4, %v3997_v51, %v3989_v47  ;;  %v1577_v36 = vmul.f32 %v4358_v7, %v4606_v28  ;;  %2042 = vmatprep.subr.mxu1 %v1613_v62  ;;  %v1578_v15 = vmul.f32 %v1560_v37, %v4592_v10  ;;  %6831 = vst [vmem:[#allocation139_spill] sm:$0xff] %v4624_v38  ;;  %v497_v34 = vpop.permute.xlu0 %496 }
 0x1d5   :  { %2043 = vmatpush1.msra.mxu1 %v1612_v53  ;;  %1970 = vmatpush1.msra.mxu0 %v798_v9  ;;  %v795_v26 = vmul.f32 %v781_v63, %v4580_v13  ;;  %v1521_v40 = vrot.slane %v4321_v0, %v4401_v56  ;;  %v1482_v47 = vrot.slane %v4341_v25, %v4401_v56 }
 0x1d6   :  { %v794_v62 = vmul.f32 %v4346_v35, %v4599_v19  ;;  %v4637_v53 = vsel %vm6688_vm6, %v4216_v29, %v4624_v38  ;;  %2044 = vmatprep.subr.mxu1 %v1578_v15  ;;  %v4642_v63 = vsel %vm506_vm5, %v497_v34, %v4218_v30  ;;  %v4647_v9 = vsel %vm506_vm5, %v4232_v24, %v497_v34 }
 0x1d7   :  { %6832 = vst [vmem:[#allocation140_spill] sm:$0xff] %v4637_v53  ;;  %6833 = vst [vmem:[#allocation141_spill] sm:$0xff] %v4642_v63  ;;  %v1573_v35 = vmul.f32 %v4358_v7, %v4618_v43  ;;  %v4655_v19 = vsel %vm506_vm5, %v4009_v55, %v3991_v48  ;;  %v4661_v15 = vsel %vm506_vm5, %v4021_v57, %v4009_v55  ;;  %1971 = vmatprep.subr.mxu0 %v795_v26  ;;  %v4676_v26 = vpop.permute.xlu1 %696 }
 0x1d8   :  { %v1574_v30 = vmul.f32 %v1560_v37, %v4612_v32  ;;  %v1538_v7 = vmul.f32 %v4378_v6, %v4647_v9  ;;  %2045 = vmatpush1.msra.mxu1 %v1577_v36  ;;  %1972 = vmatpush1.msra.mxu0 %v794_v62  ;;  %v735_v34 = vmul.f32 %v4570_v31, %v4637_v53  ;;  %v433_v37 = vpop.permute.xlu0 %432 }
 0x1d9   :  { %v1539_v48 = vmul.f32 %v1521_v40, %v4642_v63  ;;  %v4674_v55 = vsel %vm6688_vm6, %v3993_v49, %v3983_v44  ;;  %6834 = vst [vmem:[#allocation142_spill] sm:$0xff] %v4676_v26  ;;  %v1443_v10 = vrot.slane %v4362_v60, %v4401_v56  ;;  %v667_v36 = vmul.f32 %v4515_v2, %v639_v50 }
 0x1da   :  { %2046 = vmatprep.subr.mxu1 %v1574_v30  ;;  %v4683_v62 = vrot.slane %v4386_v5, %v4401_v56  ;;  %v4689_v63 = vsel %vm6688_vm6, %v3987_v46, %v3993_v49  ;;  %1973 = vmatprep.subr.mxu0 %v735_v34  ;;  %v4696_v30 = vsel %vm6688_vm6, %v4676_v26, %v4216_v29 }
 0x1db   :  { %6835 = vst [vmem:[#allocation143_spill] sm:$0xff] %v4689_v63  ;;  %2047 = vmatpush1.msra.mxu1 %v1573_v35  ;;  %6836 = vst [vmem:[#allocation144_spill] sm:$0xff] %v4696_v30  ;;  %v4701_v50 = vsel %vm442_vm7, %v433_v37, %v4226_v8  ;;  %v1534_v53 = vmul.f32 %v4378_v6, %v4661_v15  ;;  %v734_v49 = vmul.f32 %v4370_v3, %v4696_v30  ;;  %v6839_v8 = vld [vmem:[#allocation26_spill] sm:$0xff]  ;;  %v4736_v26 = vpop.permute.xlu1 %632 }
 0x1dc   :  { %6837 = vst [vmem:[#allocation145_spill] sm:$0xff] %v4701_v50  ;;  %2048 = vmatprep.subr.mxu1 %v1539_v48  ;;  %v4710_v35 = vsel %vm442_vm7, %v4240_v52, %v433_v37  ;;  %v1535_v29 = vmul.f32 %v1521_v40, %v4655_v19  ;;  %v4717_v34 = vsel %vm442_vm7, %v4029_v59, %v4007_v54  ;;  %v6838_v48 = vld [vmem:[#allocation99_spill] sm:$0xff] }
 0x1dd   :  { %v4723_v6 = vsel %vm442_vm7, %v4041_v61, %v4029_v59  ;;  %v1499_v30 = vmul.f32 %v6838_v48, %v4710_v35  ;;  %2049 = vmatpush1.msra.mxu1 %v1538_v7  ;;  %v1500_v37 = vmul.f32 %v1482_v47, %v4701_v50  ;;  %v730_v40 = vmul.f32 %v4370_v3, %v4689_v63  ;;  %v369_v59 = vpop.permute.xlu0 %368  ;;  %v6841_v7 = vld [vmem:[#allocation31_spill] sm:$0xff]  ;;  %v6845_v3 = vld [vmem:[#allocation69_spill] sm:$0xff] }
 0x1de   :  { %v4734_v54 = vsel %vm6689_vm2, %v6839_v8, %v3985_v45  ;;  %2050 = vmatprep.subr.mxu1 %v1535_v29  ;;  %1974 = vmatpush1.msra.mxu0 %v734_v49  ;;  %6840 = vst [vmem:[#allocation99_spill] sm:$0xff] %v4736_v26  ;;  %v731_v46 = vmul.f32 %v4570_v31, %v4674_v55  ;;  %v6847_v29 = vld [vmem:[#allocation71_spill] sm:$0xff] }
 0x1df   :  { %v4744_v50 = vsel %vm378_vm8, %v6842_v12, %v6841_v7  ;;  %2051 = vmatpush1.msra.mxu1 %v1534_v53  ;;  %v4750_v45 = vsel %vm6689_vm2, %v4736_v26, %v4208_v33  ;;  %v4755_v49 = vsel %vm378_vm8, %v369_v59, %v6845_v3  ;;  %v4760_v31 = vsel %vm378_vm8, %v6847_v29, %v369_v59  ;;  %v6848_v53 = vld [vmem:[#allocation36_spill] sm:$0xff]  ;;  %v6849_v33 = vld [vmem:[#allocation95_spill] sm:$0xff] }
 0x1e0   :  { %6843 = vst [vmem:[#allocation26_spill] sm:$0xff] %v4744_v50  ;;  %6844 = vst [vmem:[#allocation34_spill] sm:$0xff] %v4750_v45  ;;  %v1495_v63 = vmul.f32 %v6838_v48, %v4723_v6  ;;  %v4768_v7 = vsel %vm378_vm8, %v6848_v53, %v6842_v12  ;;  %v670_v26 = vmul.f32 %v6849_v33, %v4750_v45  ;;  %2052 = vmatprep.subr.mxu1 %v1500_v37  ;;  %v6850_v59 = vld [vmem:[#allocation104_spill] sm:$0xff]  ;;  %v6851_v45 = vld [vmem:[#allocation30_spill] sm:$0xff]  ;;  %v4787_v37 = vpop.permute.xlu1 %568 }
 0x1e1   :  { %6846 = vst [vmem:[#allocation146_spill] sm:$0xff] %v4755_v49  ;;  %v1496_v3 = vmul.f32 %v1482_v47, %v4717_v34  ;;  %v1460_v44 = vmul.f32 %v6850_v59, %v4760_v31  ;;  %1975 = vmatprep.subr.mxu0 %v731_v46  ;;  %2053 = vmatpush1.msra.mxu1 %v1499_v30  ;;  %6852 = vst [vmem:[#allocation71_spill] sm:$0xff] %v4787_v37  ;;  %v304_v46 = vpop.permute.xlu0 %303 }
 0x1e2   :  { %v671_v48 = vmul.f32 %v4515_v2, %v4537_v58  ;;  %v1461_v38 = vmul.f32 %v1443_v10, %v4755_v49  ;;  %v666_v12 = vmul.f32 %v6849_v33, %v4734_v54  ;;  %v4785_v47 = vsel %vm570_vm4, %v6851_v45, %v3997_v51  ;;  %1976 = vmatpush1.msra.mxu0 %v730_v40  ;;  %v6854_v51 = vld [vmem:[#allocation70_spill] sm:$0xff]  ;;  %v6861_v49 = vld [vmem:[#allocation109_spill] sm:$0xff] }
 0x1e3   :  { %2054 = vmatprep.subr.mxu1 %v1496_v3  ;;  %v1457_v30 = vmul.f32 %v1443_v10, %v4744_v50  ;;  %v1456_v58 = vmul.f32 %v6850_v59, %v4768_v7  ;;  %v4796_v2 = vsel %vm570_vm4, %v4787_v37, %v4224_v27  ;;  %v4801_v40 = vsel %vm315_vm9, %v304_v46, %v6854_v51  ;;  %v6856_v3 = vld [vmem:[#allocation33_spill] sm:$0xff]  ;;  %v6857_v33 = vld [vmem:[#allocation38_spill] sm:$0xff] }
 0x1e4   :  { %1977 = vmatprep.subr.mxu0 %v671_v48  ;;  %2055 = vmatpush1.msra.mxu1 %v1495_v63  ;;  %6853 = vst [vmem:[#allocation36_spill] sm:$0xff] %v4796_v2  ;;  %6855 = vst [vmem:[#allocation95_spill] sm:$0xff] %v4801_v40  ;;  %v4807_v10 = vsel %vm315_vm9, %v6857_v33, %v6856_v3  ;;  %v6859_v59 = vld [vmem:[#allocation101_spill] sm:$0xff]  ;;  %v607_v50 = vmul.f32 %v4574_v41, %v4606_v28 }
 0x1e5   :  { %6858 = vst [vmem:[#allocation104_spill] sm:$0xff] %v4807_v10  ;;  %v606_v63 = vmul.f32 %v6859_v59, %v4796_v2  ;;  %1978 = vmatpush1.msra.mxu0 %v670_v26  ;;  %2056 = vmatprep.subr.mxu1 %v1461_v38  ;;  %v6860_v48 = vld [vmem:[#allocation73_spill] sm:$0xff]  ;;  %v1422_v3 = vmul.f32 %v4683_v62, %v4801_v40  ;;  %v6862_v2 = vld [vmem:[#allocation40_spill] sm:$0xff]  ;;  %v4828_v26 = vpop.permute.xlu1 %504 }
 0x1e6   :  { %v4814_v27 = vsel %vm315_vm9, %v6860_v48, %v304_v46  ;;  %1979 = vmatprep.subr.mxu0 %v667_v36  ;;  %2057 = vmatpush1.msra.mxu1 %v1460_v44  ;;  %v4826_v38 = vsel %vm315_vm9, %v6862_v2, %v6857_v33  ;;  %v4830_v46 = vpop.permute.xlu0 %940  ;;  %v6863_v44 = vld [vmem:[#allocation86_spill] sm:$0xff]  ;;  %v4836_v28 = vrot.slane %v4304_v23, %v4459_v20  ;;  %v6864_v40 = vld [vmem:[#allocation32_spill] sm:$0xff] }
 0x1e7   :  { %v1421_v51 = vmul.f32 %v6861_v49, %v4814_v27  ;;  %1980 = vmatpush1.msra.mxu0 %v666_v12  ;;  %2058 = vmatprep.subr.mxu1 %v1457_v30  ;;  %v525_v36 = vrot.slane %v6863_v44, %v4401_v56  ;;  %v4842_v37 = vsel %vm506_vm5, %v6864_v40, %v4021_v57  ;;  %v6867_v33 = vld [vmem:[#allocation106_spill] sm:$0xff] }
 0x1e8   :  { %6865 = vst [vmem:[#allocation30_spill] sm:$0xff] %v4842_v37  ;;  %1981 = vmatprep.subr.mxu0 %v607_v50  ;;  %2059 = vmatpush1.msra.mxu1 %v1456_v58  ;;  %v4848_v12 = vsel %vm506_vm5, %v4828_v26, %v4232_v24  ;;  %v603_v30 = vmul.f32 %v4574_v41, %v4618_v43 }
 0x1e9   :  { %6866 = vst [vmem:[#allocation38_spill] sm:$0xff] %v4848_v12  ;;  %v602_v23 = vmul.f32 %v6859_v59, %v4785_v47  ;;  %v542_v57 = vmul.f32 %v6867_v33, %v4848_v12  ;;  %1982 = vmatpush1.msra.mxu0 %v606_v63  ;;  %2060 = vmatprep.subr.mxu1 %v1422_v3  ;;  %v4866_v59 = vpop.permute.xlu1 %440  ;;  %v6868_v63 = vld [vmem:[#allocation37_spill] sm:$0xff] }
 0x1ea   :  { %v1418_v50 = vmul.f32 %v4683_v62, %v4807_v10  ;;  %v1417_v24 = vmul.f32 %v6861_v49, %v4826_v38  ;;  %1983 = vmatprep.subr.mxu0 %v603_v30  ;;  %2061 = vmatpush1.msra.mxu1 %v1421_v51  ;;  %v543_v41 = vmul.f32 %v525_v36, %v4647_v9  ;;  %v1337_v3 = vpop.permute.xlu0 %1336  ;;  %v6869_v51 = vld [vmem:[#allocation42_spill] sm:$0xff] }
 0x1eb   :  { %v461_v43 = vrot.slane %v4339_v4, %v4401_v56  ;;  %v538_v58 = vmul.f32 %v6867_v33, %v4842_v37  ;;  %1984 = vmatpush1.msra.mxu0 %v602_v23  ;;  %v539_v62 = vmul.f32 %v525_v36, %v4661_v15  ;;  %v1365_v49 = vrot.slane %v4421_v18, %v4401_v56  ;;  %v6871_v23 = vld [vmem:[#allocation72_spill] sm:$0xff]  ;;  %v6872_v36 = vld [vmem:[#allocation39_spill] sm:$0xff]  ;;  %v6951_v37 = vld [vmem:[#allocation53_spill] sm:$0xff] }
 0x1ec   :  { %2062 = vmatprep.subr.mxu1 %v1418_v50  ;;  %v1349_v9 = vsel %vm1346_vm10, %v6869_v51, %v6868_v63  ;;  %1985 = vmatprep.subr.mxu0 %v543_v41  ;;  %v4879_v30 = vsel %vm442_vm7, %v4866_v59, %v4240_v52  ;;  %v1350_v15 = vsel %vm1346_vm10, %v1337_v3, %v6871_v23  ;;  %v6873_v50 = vld [vmem:[#allocation74_spill] sm:$0xff]  ;;  %v6874_v52 = vld [vmem:[#allocation35_spill] sm:$0xff]  ;;  %v6876_v23 = vld [vmem:[#allocation81_spill] sm:$0xff] }
 0x1ed   :  { %2063 = vmatpush1.msra.mxu1 %v1417_v24  ;;  %6870 = vst [vmem:[#allocation101_spill] sm:$0xff] %v4879_v30  ;;  %v1351_v18 = vsel %vm1346_vm10, %v6872_v36, %v6869_v51  ;;  %v478_v33 = vmul.f32 %v4452_v17, %v4879_v30  ;;  %1986 = vmatpush1.msra.mxu0 %v542_v57  ;;  %v6877_v51 = vld [vmem:[#allocation119_spill] sm:$0xff]  ;;  %v4905_v30 = vpop.permute.xlu1 %1014 }
 0x1ee   :  { %v1352_v24 = vsel %vm1346_vm10, %v6873_v50, %v1337_v3  ;;  %v1383_v41 = vmul.f32 %v1365_v49, %v1350_v15  ;;  %v4897_v63 = vsel %vm442_vm7, %v6874_v52, %v4041_v61  ;;  %v4901_v12 = vrot.slane %v4316_v16, %v6876_v23  ;;  %1987 = vmatprep.subr.mxu0 %v539_v62  ;;  %v4907_v3 = vpop.permute.xlu0 %376  ;;  %v6880_v50 = vld [vmem:[#allocation91_spill] sm:$0xff] }
 0x1ef   :  { %6875 = vst [vmem:[#allocation73_spill] sm:$0xff] %v4897_v63  ;;  %v1382_v36 = vmul.f32 %v6877_v51, %v1352_v24  ;;  %v479_v57 = vmul.f32 %v461_v43, %v4710_v35  ;;  %1988 = vmatpush1.msra.mxu0 %v538_v58  ;;  %6878 = vst [vmem:[#allocation109_spill] sm:$0xff] %v4905_v30  ;;  %v1379_v15 = vmul.f32 %v1365_v49, %v1349_v9  ;;  %v6883_v9 = vld [vmem:[#allocation83_spill] sm:$0xff]  ;;  %v6886_v24 = vld [vmem:[#allocation105_spill] sm:$0xff] }
 0x1f0   :  { %2064 = vmatprep.subr.mxu1 %v1383_v41  ;;  %6879 = vst [vmem:[#allocation40_spill] sm:$0xff] %v4907_v3  ;;  %v397_v61 = vrot.slane %v6880_v50, %v4401_v56  ;;  %v4913_v10 = vrot.slane %v4306_v22, %v4459_v20  ;;  %v1378_v23 = vmul.f32 %v6877_v51, %v1351_v18  ;;  %v6882_v22 = vld [vmem:[#allocation116_spill] sm:$0xff] }
 0x1f1   :  { %1989 = vmatprep.subr.mxu0 %v479_v57  ;;  %v4920_v35 = vsel %vm378_vm8, %v4907_v3, %v6847_v29  ;;  %v475_v58 = vmul.f32 %v461_v43, %v4723_v6  ;;  %2065 = vmatpush1.msra.mxu1 %v1382_v36  ;;  %v474_v62 = vmul.f32 %v4452_v17, %v4897_v63  ;;  %v6884_v29 = vld [vmem:[#allocation45_spill] sm:$0xff]  ;;  %v4944_v36 = vpop.permute.xlu1 %938  ;;  %v6889_v57 = vld [vmem:[#allocation78_spill] sm:$0xff]  ;;  %v6894_v63 = vld [vmem:[#allocation87_spill] sm:$0xff] }
 0x1f2   :  { %6881 = vst [vmem:[#allocation86_spill] sm:$0xff] %v4920_v35  ;;  %1990 = vmatpush1.msra.mxu0 %v478_v33  ;;  %v414_v49 = vmul.f32 %v6882_v22, %v4920_v35  ;;  %2066 = vmatprep.subr.mxu1 %v1379_v15  ;;  %v4930_v18 = vrot.slane %v6883_v9, %v4401_v56  ;;  %v1273_v33 = vpop.permute.xlu0 %1272  ;;  %v6891_v9 = vld [vmem:[#allocation41_spill] sm:$0xff]  ;;  %v6944_v3 = vld [vmem:[#allocation139_spill] sm:$0xff] }
 0x1f3   :  { %v4936_v6 = vsel %vm378_vm8, %v6884_v29, %v6848_v53  ;;  %1991 = vmatprep.subr.mxu0 %v475_v58  ;;  %v415_v17 = vmul.f32 %v397_v61, %v4760_v31  ;;  %2067 = vmatpush1.msra.mxu1 %v1378_v23  ;;  %v4942_v43 = vrot.slane %v4314_v14, %v4459_v20  ;;  %v6888_v14 = vld [vmem:[#allocation76_spill] sm:$0xff]  ;;  %v6948_v29 = vld [vmem:[#allocation57_spill] sm:$0xff] }
 0x1f4   :  { %6885 = vst [vmem:[#allocation32_spill] sm:$0xff] %v4936_v6  ;;  %1992 = vmatpush1.msra.mxu0 %v474_v62  ;;  %v1301_v41 = vrot.slane %v6886_v24, %v4401_v56  ;;  %v4950_v53 = vrot.slane %v4316_v16, %v4459_v20  ;;  %v4954_v51 = vrot.slane %v6863_v44, %v4459_v20  ;;  %v6890_v58 = vld [vmem:[#allocation96_spill] sm:$0xff]  ;;  %v6893_v24 = vld [vmem:[#allocation122_spill] sm:$0xff] }
 0x1f5   :  { %v4958_v31 = vrot.slane %v4321_v0, %v4459_v20  ;;  %1993 = vmatprep.subr.mxu0 %v415_v17  ;;  %v1286_v23 = vsel %vm1282_vm11, %v1273_v33, %v6888_v14  ;;  %v1288_v15 = vsel %vm1282_vm11, %v6889_v57, %v1273_v33  ;;  %v411_v16 = vmul.f32 %v397_v61, %v4768_v7  ;;  %v6892_v0 = vld [vmem:[#allocation48_spill] sm:$0xff] }
 0x1f6   :  { %v333_v62 = vrot.slane %v6890_v58, %v4401_v56  ;;  %v410_v44 = vmul.f32 %v6882_v22, %v4936_v6  ;;  %v1285_v17 = vsel %vm1282_vm11, %v6892_v0, %v6891_v9  ;;  %1994 = vmatpush1.msra.mxu0 %v414_v49  ;;  %v1318_v14 = vmul.f32 %v6893_v24, %v1288_v15  ;;  %v6895_v7 = vld [vmem:[#allocation44_spill] sm:$0xff]  ;;  %v6905_v9 = vld [vmem:[#allocation21_spill] sm:$0xff] }
 0x1f7   :  { %6887 = vst [vmem:[#allocation106_spill] sm:$0xff] %v4958_v31  ;;  %v1319_v35 = vmul.f32 %v1301_v41, %v1286_v23  ;;  %v4978_v33 = vmul.f32 %v6894_v63, %v4521_v21  ;;  %v1287_v61 = vsel %vm1282_vm11, %v6895_v7, %v6892_v0  ;;  %1995 = vmatprep.subr.mxu0 %v411_v16  ;;  %v6896_v49 = vld [vmem:[#allocation88_spill] sm:$0xff]  ;;  %v4994_v21 = vpop.permute.xlu1 %1144  ;;  %v4996_v23 = vpop.permute.xlu0 %311  ;;  %v6932_v6 = vld [vmem:[#allocation49_spill] sm:$0xff]  ;;  %v6949_v31 = vld [vmem:[#allocation23_spill] sm:$0xff] }
 0x1f8   :  { %v351_v22 = vmul.f32 %v333_v62, %v4814_v27  ;;  %v4987_v57 = vrot.slane %v4339_v4, %v4459_v20  ;;  %v4991_v15 = vmul.f32 %v6896_v49, %v4580_v13  ;;  %1996 = vmatpush1.msra.mxu0 %v410_v44  ;;  %6897 = vst [vmem:[#allocation42_spill] sm:$0xff] %v4996_v23  ;;  %v6900_v27 = vld [vmem:[#allocation50_spill] sm:$0xff]  ;;  %v6906_v7 = vld [vmem:[#allocation120_spill] sm:$0xff] }
 0x1f9   :  { %2068 = vmatprep.subr.mxu1 %v1319_v35  ;;  %v5000_v16 = vrot.slane %v6880_v50, %v4459_v20  ;;  %v5004_v4 = vrot.slane %v4341_v25, %v4459_v20  ;;  %v5010_v13 = vsel %vm315_vm9, %v6900_v27, %v6862_v2  ;;  %v5016_v35 = vsel %vm315_vm9, %v4996_v23, %v6860_v48  ;;  %v6904_v25 = vld [vmem:[#allocation89_spill] sm:$0xff]  ;;  %v6933_v23 = vld [vmem:[#allocation54_spill] sm:$0xff]  ;;  %v6940_v27 = vld [vmem:[#allocation131_spill] sm:$0xff] }
 0x1fa   :  { %6901 = vst [vmem:[#allocation91_spill] sm:$0xff] %v5010_v13  ;;  %1997 = vmatprep.subr.mxu0 %v351_v22  ;;  %6902 = vst [vmem:[#allocation116_spill] sm:$0xff] %v5016_v35  ;;  %v1315_v44 = vmul.f32 %v1301_v41, %v1285_v17  ;;  %v5020_v50 = vrot.slane %v4362_v60, %v4459_v20  ;;  %v5024_v0 = vmul.f32 %v6904_v25, %v4612_v32  ;;  %v6907_v41 = vld [vmem:[#allocation90_spill] sm:$0xff] }
 0x1fb   :  { %6898 = vst [vmem:[#allocation35_spill] sm:$0xff] %v5000_v16  ;;  %6899 = vst [vmem:[#allocation119_spill] sm:$0xff] %v5004_v4  ;;  %v635_v2 = vsel %vm6689_vm2, %v6905_v9, %v6839_v8  ;;  %v1314_v22 = vmul.f32 %v6893_v24, %v1287_v61  ;;  %v350_v48 = vmul.f32 %v6906_v7, %v5016_v35  ;;  %2069 = vmatpush1.msra.mxu1 %v1318_v14  ;;  %v6910_v9 = vld [vmem:[#allocation94_spill] sm:$0xff]  ;;  %v6913_v61 = vld [vmem:[#allocation97_spill] sm:$0xff] }
 0x1fc   :  { %6903 = vst [vmem:[#allocation83_spill] sm:$0xff] %v5020_v50  ;;  %v5035_v17 = vmul.f32 %v6907_v41, %v4674_v55  ;;  %2070 = vmatprep.subr.mxu1 %v1315_v44  ;;  %v347_v60 = vmul.f32 %v333_v62, %v4826_v38  ;;  %v5040_v32 = vrot.slane %v6890_v58, %v4459_v20  ;;  %v5053_v55 = vpop.permute.xlu1 %1072  ;;  %v817_v38 = vpop.permute.xlu0 %816  ;;  %v6912_v58 = vld [vmem:[#allocation111_spill] sm:$0xff]  ;;  %v6916_v35 = vld [vmem:[#allocation52_spill] sm:$0xff]  ;;  %v6934_v16 = vld [vmem:[#allocation117_spill] sm:$0xff] }
 0x1fd   :  { %v5044_v8 = vrot.slane %v4386_v5, %v4459_v20  ;;  %v5048_v24 = vmul.f32 %v6910_v9, %v4655_v19  ;;  %v346_v14 = vmul.f32 %v6906_v7, %v5010_v13  ;;  %2071 = vmatpush1.msra.mxu1 %v1314_v22  ;;  %1998 = vmatpush1.msra.mxu0 %v350_v48  ;;  %v6915_v44 = vld [vmem:[#allocation47_spill] sm:$0xff]  ;;  %v6918_v7 = vld [vmem:[#allocation80_spill] sm:$0xff] }
 0x1fe   :  { %6908 = vst [vmem:[#allocation105_spill] sm:$0xff] %v5040_v32  ;;  %v1716_v62 = vrot.slane %v6912_v58, %v4401_v56  ;;  %v5058_v5 = vmul.f32 %v6913_v61, %v635_v2  ;;  %v5064_v19 = vsel %vm826_vm12, %v6916_v35, %v6915_v44  ;;  %v5069_v22 = vsel %vm826_vm12, %v817_v38, %v6918_v7  ;;  %v6920_v20 = vld [vmem:[#allocation75_spill] sm:$0xff]  ;;  %v6922_v58 = vld [vmem:[#allocation56_spill] sm:$0xff]  ;;  %v6926_v32 = vld [vmem:[#allocation98_spill] sm:$0xff] }
 0x1ff   :  { %6909 = vst [vmem:[#allocation96_spill] sm:$0xff] %v5044_v8  ;;  %6911 = vst [vmem:[#allocation48_spill] sm:$0xff] %v5048_v24  ;;  %v5074_v48 = vsel %vm826_vm12, %v6920_v20, %v817_v38  ;;  %1999 = vmatprep.subr.mxu0 %v347_v60  ;;  %v6924_v44 = vld [vmem:[#allocation124_spill] sm:$0xff]  ;;  %v5090_v38 = vmul.f32 %v6926_v32, %v4717_v34  ;;  %v5096_v60 = vsel %vm570_vm4, %v3979_v42, %v6851_v45 }
 0x200   :  { %6914 = vst [vmem:[#allocation122_spill] sm:$0xff] %v5058_v5  ;;  %6917 = vst [vmem:[#allocation87_spill] sm:$0xff] %v5064_v19  ;;  %v5080_v5 = vsel %vm826_vm12, %v6922_v58, %v6916_v35  ;;  %v1733_v61 = vmul.f32 %v6924_v44, %v5074_v48  ;;  %2000 = vmatpush1.msra.mxu0 %v346_v14  ;;  %v1734_v8 = vmul.f32 %v1716_v62, %v5069_v22  ;;  %v6925_v7 = vld [vmem:[#allocation132_spill] sm:$0xff]  ;;  %v6928_v35 = vld [vmem:[#allocation77_spill] sm:$0xff]  ;;  %v1209_v42 = vpop.permute.xlu0 %1208 }
 0x201   :  { %6919 = vst [vmem:[#allocation88_spill] sm:$0xff] %v5069_v22  ;;  %6921 = vst [vmem:[#allocation89_spill] sm:$0xff] %v5074_v48  ;;  %v5086_v13 = vmul.f32 %v6925_v7, %v635_v2  ;;  %v6929_v50 = vld [vmem:[#allocation128_spill] sm:$0xff]  ;;  %v6930_v22 = vld [vmem:[#allocation133_spill] sm:$0xff]  ;;  %v1221_v34 = vsel %vm1218_vm13, %v6933_v23, %v6932_v6  ;;  %v1730_v45 = vmul.f32 %v1716_v62, %v5064_v19 }
 0x202   :  { %6923 = vst [vmem:[#allocation21_spill] sm:$0xff] %v5080_v5  ;;  %6927 = vst [vmem:[#allocation120_spill] sm:$0xff] %v5090_v38  ;;  %v5102_v14 = vsel %vm762_vm3, %v6929_v50, %v6928_v35  ;;  %v5106_v2 = vmul.f32 %v6930_v22, %v4734_v54  ;;  %v5112_v38 = vpop.permute.xlu1 %1008  ;;  %2092 = vmatprep.subr.mxu1 %v1734_v8  ;;  %v1237_v4 = vrot.slane %v6934_v16, %v4401_v56  ;;  %v6936_v22 = vld [vmem:[#allocation85_spill] sm:$0xff]  ;;  %v6938_v19 = vld [vmem:[#allocation51_spill] sm:$0xff] }
 0x203   :  { %v1173_v50 = vrot.slane %v4507_v1, %v4401_v56  ;;  %v1729_v54 = vmul.f32 %v6924_v44, %v5080_v5  ;;  %v1222_v8 = vsel %vm1218_vm13, %v1209_v42, %v6936_v22  ;;  %v6937_v58 = vld [vmem:[#allocation93_spill] sm:$0xff]  ;;  %2093 = vmatpush2.msra.mxu1 %v1733_v61  ;;  %v1223_v1 = vsel %vm1218_vm13, %v6938_v19, %v6933_v23  ;;  %v6941_v22 = vld [vmem:[#allocation82_spill] sm:$0xff]  ;;  %v6945_v19 = vld [vmem:[#allocation79_spill] sm:$0xff] }
 0x204   :  { %6931 = vst [vmem:[#allocation90_spill] sm:$0xff] %v5106_v2  ;;  %v6935_v2 = vld [vmem:[#allocation58_spill] sm:$0xff]  ;;  %v1224_v62 = vsel %vm1218_vm13, %v6937_v58, %v1209_v42  ;;  %v6939_v16 = vld [vmem:[#allocation125_spill] sm:$0xff]  ;;  %2094 = vmatprep.subr.mxu1 %v1730_v45  ;;  %v1695_v48 = vmul.f32 %v6940_v27, %v5102_v14  ;;  %v6943_v58 = vld [vmem:[#allocation84_spill] sm:$0xff]  ;;  %v1158_v45 = vsel %vm1154_vm14, %v4994_v21, %v6945_v19 }
 0x205   :  { %v765_v6 = vsel %vm762_vm3, %v3973_v39, %v6935_v2  ;;  %v5135_v44 = vld [vmem:[#allocation10 + $0x24] ss:$8 sm:$0xf]  ;;  %v1254_v5 = vmul.f32 %v6939_v16, %v1224_v62  ;;  %v1255_v39 = vmul.f32 %v1237_v4, %v1222_v8  ;;  %v5150_v23 = vsel %vm6688_vm6, %v6944_v3, %v6943_v58  ;;  %2095 = vmatpush2.msra.mxu1 %v1729_v54 }
 0x206   :  { %v5142_v20 = vrot.slane %v5135_v44, %v6941_v22  ;;  %v6942_v42 = vld [vmem:[#allocation129_spill] sm:$0xff]  ;;  %v5160_v32 = vpop.permute.xlu1 %944  ;;  %2096 = vmatprep.subr.mxu1 %v1695_v48  ;;  %v1691_v3 = vmul.f32 %v6940_v27, %v765_v6  ;;  %v1250_v24 = vmul.f32 %v6939_v16, %v1223_v1  ;;  %v701_v54 = vsel %vm6688_vm6, %v6949_v31, %v6948_v29  ;;  %v6950_v19 = vld [vmem:[#allocation60_spill] sm:$0xff]  ;;  %v6952_v48 = vld [vmem:[#allocation55_spill] sm:$0xff] }
 0x207   :  { %v1694_v61 = vmul.f32 %v6896_v49, %v6942_v42  ;;  %v6946_v8 = vld [vmem:[#allocation113_spill] sm:$0xff]  ;;  %6947 = vst [vmem:[#allocation94_spill] sm:$0xff] %v5160_v32  ;;  %2001 = vmatprep.subr.mxu0 %v1255_v39  ;;  %v5162_v49 = vpop.permute.xlu0 %1080  ;;  %v1251_v42 = vmul.f32 %v1237_v4, %v1221_v34  ;;  %v1159_v4 = vsel %vm1154_vm14, %v6952_v48, %v6951_v37  ;;  %v6953_v16 = vld [vmem:[#allocation135_spill] sm:$0xff]  ;;  %v6955_v34 = vld [vmem:[#allocation140_spill] sm:$0xff] }
 0x208   :  { %v1160_v62 = vsel %vm1154_vm14, %v6946_v8, %v4994_v21  ;;  %v1157_v21 = vsel %vm1154_vm14, %v6951_v37, %v6950_v19  ;;  %2002 = vmatpush2.msra.mxu0 %v1254_v5  ;;  %v5178_v27 = vld [vmem:[#allocation10 + $0x23] ss:$8 sm:$0xf]  ;;  %v1191_v1 = vmul.f32 %v1173_v50, %v1158_v45  ;;  %v1656_v31 = vmul.f32 %v4930_v18, %v5150_v23 }
 0x209   :  { %2097 = vmatpush2.msra.mxu1 %v1694_v61  ;;  %2003 = vmatprep.subr.mxu0 %v1251_v42  ;;  %v5187_v5 = vsel %vm762_vm3, %v6928_v35, %v6953_v16  ;;  %v1655_v39 = vmul.f32 %v6907_v41, %v6955_v34  ;;  %v6956_v37 = vld [vmem:[#allocation134_spill] sm:$0xff]  ;;  %v1187_v16 = vmul.f32 %v1173_v50, %v1157_v21  ;;  %v6963_v50 = vld [vmem:[#allocation59_spill] sm:$0xff] }
 0x20a   :  { %2098 = vmatprep.subr.mxu1 %v1691_v3  ;;  %6954 = vst [vmem:[#allocation111_spill] sm:$0xff] %v5187_v5  ;;  %v1190_v61 = vmul.f32 %v6956_v37, %v1160_v62  ;;  %2004 = vmatpush2.msra.mxu0 %v1250_v24  ;;  %v6957_v45 = vld [vmem:[#allocation22_spill] sm:$0xff]  ;;  %v5199_v3 = vpop.permute.xlu1 %950  ;;  %v1652_v41 = vmul.f32 %v4930_v18, %v701_v54 }
 0x20b   :  { %2099 = vmatpush2.msra.mxu1 %v4991_v15  ;;  %v5197_v42 = vsel %vm762_vm3, %v6935_v2, %v6957_v45  ;;  %6959 = vst [vmem:[#allocation124_spill] sm:$0xff] %v5199_v3  ;;  %2005 = vmatprep.subr.mxu0 %v1191_v1  ;;  %v5201_v35 = vpop.permute.xlu0 %1016  ;;  %v1186_v62 = vmul.f32 %v6956_v37, %v1159_v4  ;;  %v6960_v2 = vld [vmem:[#allocation24_spill] sm:$0xff]  ;;  %v5221_v4 = vld [vmem:[#allocation12 + $0x10] sm:$0xff]  ;;  %v6965_v34 = vld [vmem:[#allocation126_spill] sm:$0xff] }
 0x20c   :  { %6958 = vst [vmem:[#allocation52_spill] sm:$0xff] %v5197_v42  ;;  %2100 = vmatprep.subr.mxu1 %v1656_v31  ;;  %2006 = vmatpush2.msra.mxu0 %v1190_v61  ;;  %v1101_v15 = vrot.slane %v5135_v44, %v4401_v56  ;;  %v1037_v24 = vrot.slane %v5178_v27, %v4401_v56  ;;  %v6962_v31 = vld [vmem:[#allocation62_spill] sm:$0xff]  ;;  %6964 = vst [vmem:[#allocation77_spill] sm:$0xff] %v5221_v4  ;;  %v6966_v37 = vld [vmem:[#allocation92_spill] sm:$0xff] }
 0x20d   :  { %2101 = vmatpush2.msra.mxu1 %v1655_v39  ;;  %v5213_v1 = vsel %vm6688_vm6, %v6948_v29, %v6960_v2  ;;  %v1087_v18 = vsel %vm1082_vm15, %v6963_v50, %v6962_v31  ;;  %2007 = vmatprep.subr.mxu0 %v1187_v16  ;;  %v801_v21 = vmul.f32 %v4836_v28, %v5187_v5  ;;  %v6967_v16 = vld [vmem:[#allocation142_spill] sm:$0xff]  ;;  %v6972_v2 = vld [vmem:[#allocation27_spill] sm:$0xff] }
 0x20e   :  { %6961 = vst [vmem:[#allocation132_spill] sm:$0xff] %v5213_v1  ;;  %2102 = vmatprep.subr.mxu1 %v1652_v41  ;;  %v796_v39 = vmul.f32 %v6965_v34, %v765_v6  ;;  %v1088_v29 = vsel %vm1082_vm15, %v6966_v37, %v5053_v55  ;;  %2008 = vmatpush2.msra.mxu0 %v1186_v62  ;;  %v5244_v62 = vpop.permute.xlu1 %880  ;;  %v5267_v5 = vld [vmem:[#allocation10 + $0x22] ss:$8 sm:$0xf] }
 0x20f   :  { %2103 = vmatpush2.msra.mxu1 %v5035_v17  ;;  %v797_v61 = vmul.f32 %v4836_v28, %v5197_v42  ;;  %v800_v45 = vmul.f32 %v6965_v34, %v5102_v14  ;;  %v5238_v6 = vsel %vm6688_vm6, %v6943_v58, %v6967_v16  ;;  %v1090_v41 = vsel %vm1082_vm15, %v5162_v49, %v6966_v37  ;;  %v6970_v17 = vld [vmem:[#allocation43_spill] sm:$0xff]  ;;  %v5247_v28 = vpop.permute.xlu0 %952  ;;  %v6973_v16 = vld [vmem:[#allocation61_spill] sm:$0xff]  ;;  %v6974_v42 = vld [vmem:[#allocation64_spill] sm:$0xff] }
 0x210   :  { %6968 = vst [vmem:[#allocation128_spill] sm:$0xff] %v5238_v6  ;;  %6969 = vst [vmem:[#allocation54_spill] sm:$0xff] %v5244_v62  ;;  %2009 = vmatprep.subr.mxu0 %v6970_v17  ;;  %2111 = vmatprep.subr.mxu1 %v801_v21  ;;  %v732_v14 = vmul.f32 %v4901_v12, %v701_v54  ;;  %v1115_v58 = vmul.f32 %v1101_v15, %v1087_v18  ;;  %v6975_v17 = vld [vmem:[#allocation63_spill] sm:$0xff]  ;;  %vm954_vm6 = vcmp.lt.s32.totalorder %v4286_v11, 8 }
 0x211   :  { %6971 = vst [vmem:[#allocation58_spill] sm:$0xff] %v5247_v28  ;;  %2010 = vmatpush2.msra.mxu0 %v6972_v2  ;;  %2105 = vmatmul.mubr.f32.vlgmr.msra.gmra.mxu1 %v5221_v4  ;;  %v733_v34 = vmul.f32 %v4950_v53, %v5213_v1  ;;  %v1089_v37 = vsel %vm1082_vm15, %v6973_v16, %v6963_v50  ;;  %v3617_v54 = vld [vmem:[#allocation4 + $0x8] sm:$0xff]  ;;  %v6976_v4 = vld [vmem:[#allocation112_spill] sm:$0xff]  ;;  %v3618_v50 = vld [vmem:[#allocation4] sm:$0xff] }
 0x212   :  { %v1023_v21 = vsel %vm1018_vm0, %v6975_v17, %v6974_v42  ;;  %2112 = vmatpush1.msra.mxu1 %v800_v45  ;;  %2011 = vmatprep.subr.mxu0 %v3617_v54  ;;  %v1119_v2 = vmul.f32 %v1101_v15, %v1088_v29  ;;  %v1024_v18 = vsel %vm1018_vm0, %v6976_v4, %v5112_v38  ;;  %v6977_v54 = vld [vmem:[#allocation99_spill] sm:$0xff]  ;;  %v6978_v15 = vld [vmem:[#allocation65_spill] sm:$0xff] }
 0x213   :  { %v1118_v1 = vmul.f32 %v5142_v20, %v1090_v41  ;;  %2113 = vmatprep.subr.mxu1 %v797_v61  ;;  %2012 = vmatpush2.msra.mxu0 %v3618_v50  ;;  %v737_v31 = vmul.f32 %v4950_v53, %v5238_v6  ;;  %v736_v45 = vmul.f32 %v4901_v12, %v5150_v23  ;;  %v5284_v41 = vpop.permute.xlu1 %874  ;;  %v5286_v53 = vpop.permute.xlu0 %942  ;;  %v7019_v6 = vld [vmem:[#allocation119_spill] sm:$0xff]  ;;  %v7045_v42 = vld [vmem:[#allocation97_spill] sm:$0xff] }
 0x214   :  { %v5277_v29 = vsel %vm6689_vm2, %v6978_v15, %v6977_v54  ;;  %v1026_v61 = vsel %vm1018_vm0, %v5201_v35, %v6976_v4  ;;  %2114 = vmatpush1.msra.mxu1 %v796_v39  ;;  %2013 = vmatprep.subr.mxu0 %v1119_v2  ;;  %6979 = vst [vmem:[#allocation125_spill] sm:$0xff] %v5286_v53  ;;  %v6981_v2 = vld [vmem:[#allocation71_spill] sm:$0xff]  ;;  %vm890_vm2 = vcmp.lt.s32.totalorder %v4286_v11, 9 }
 0x215   :  { %v1114_v12 = vmul.f32 %v5142_v20, %v1089_v37  ;;  %v1033_v23 = vrot.slane %v5178_v27, %v6941_v22  ;;  %2115 = vmatprep.subr.mxu1 %v737_v31  ;;  %2014 = vmatpush2.msra.mxu0 %v1118_v1  ;;  %v1051_v50 = vmul.f32 %v1037_v24, %v1023_v21  ;;  %v5301_v1 = vld [vmem:[#allocation10 + $0x21] ss:$8 sm:$0xf] }
 0x216   :  { %v1025_v54 = vsel %vm1018_vm0, %v4905_v30, %v6975_v17  ;;  %v973_v4 = vrot.slane %v5267_v5, %v4401_v56  ;;  %2116 = vmatpush1.msra.mxu1 %v736_v45  ;;  %2015 = vmatprep.subr.mxu0 %v1115_v58  ;;  %v1055_v39 = vmul.f32 %v1037_v24, %v1024_v18  ;;  %v6980_v17 = vld [vmem:[#allocation130_spill] sm:$0xff] }
 0x217   :  { %v960_v20 = vsel %vm954_vm6, %v4830_v46, %v5160_v32  ;;  %v1054_v37 = vmul.f32 %v1033_v23, %v1026_v61  ;;  %2117 = vmatprep.subr.mxu1 %v733_v34  ;;  %2016 = vmatpush2.msra.mxu0 %v1114_v12  ;;  %v673_v31 = vmul.f32 %v6925_v7, %v5277_v29  ;;  %v6982_v45 = vld [vmem:[#allocation66_spill] sm:$0xff]  ;;  %v5317_v34 = vpop.permute.xlu1 %886  ;;  %v877_v18 = vpop.permute.xlu0 %876 }
 0x218   :  { %v672_v21 = vmul.f32 %v6894_v63, %v6980_v17  ;;  %v5311_v24 = vsel %vm570_vm4, %v6982_v45, %v6981_v2  ;;  %v962_v58 = vsel %vm954_vm6, %v5247_v28, %v4830_v46  ;;  %2118 = vmatpush1.msra.mxu1 %v732_v14  ;;  %6983 = vst [vmem:[#allocation131_spill] sm:$0xff] %v5317_v34 }
 0x219   :  { %2017 = vmatprep.subr.mxu0 %v1055_v39  ;;  %v1050_v7 = vmul.f32 %v1033_v23, %v1025_v54  ;;  %v969_v63 = vrot.slane %v5267_v5, %v6941_v22  ;;  %v905_v15 = vrot.slane %v5301_v1, %v6941_v22  ;;  %2119 = vmatprep.subr.mxu1 %v673_v31  ;;  %v6984_v39 = vld [vmem:[#allocation137_spill] sm:$0xff]  ;;  %v6985_v31 = vld [vmem:[#allocation67_spill] sm:$0xff] }
 0x21a   :  { %2018 = vmatpush2.msra.mxu0 %v1054_v37  ;;  %v959_v46 = vsel %vm954_vm6, %v4944_v36, %v5286_v53  ;;  %v909_v14 = vrot.slane %v5301_v1, %v4401_v56  ;;  %2120 = vmatpush1.msra.mxu1 %v672_v21  ;;  %v991_v61 = vmul.f32 %v973_v4, %v960_v20  ;;  %v6988_v21 = vld [vmem:[#allocation102_spill] sm:$0xff] }
 0x21b   :  { %2019 = vmatprep.subr.mxu0 %v1051_v50  ;;  %v961_v12 = vsel %vm954_vm6, %v5199_v3, %v4944_v36  ;;  %v990_v23 = vmul.f32 %v969_v63, %v962_v58  ;;  %2121 = vmatprep.subr.mxu1 %v5086_v13  ;;  %v609_v54 = vmul.f32 %v4913_v10, %v5311_v24  ;;  %v5349_v13 = vpop.permute.xlu1 %822  ;;  %v5351_v20 = vpop.permute.xlu0 %888  ;;  %v7031_v3 = vld [vmem:[#allocation121_spill] sm:$0xff] }
 0x21c   :  { %2020 = vmatpush2.msra.mxu0 %v1050_v7  ;;  %v608_v37 = vmul.f32 %v6904_v25, %v6984_v39  ;;  %v5343_v50 = vsel %vm506_vm5, %v6985_v31, %v4828_v26  ;;  %v896_v36 = vsel %vm890_vm2, %v877_v18, %v5244_v62  ;;  %2122 = vmatpush1.msra.mxu1 %v4978_v33  ;;  %v6989_v33 = vld [vmem:[#allocation25_spill] sm:$0xff]  ;;  %v6994_v39 = vld [vmem:[#allocation26_spill] sm:$0xff] }
 0x21d   :  { %6986 = vst [vmem:[#allocation129_spill] sm:$0xff] %v5349_v13  ;;  %2021 = vmatprep.subr.mxu0 %v991_v61  ;;  %6987 = vst [vmem:[#allocation84_spill] sm:$0xff] %v5351_v20  ;;  %v987_v17 = vmul.f32 %v973_v4, %v959_v46  ;;  %2123 = vmatprep.subr.mxu1 %v609_v54  ;;  %v898_v25 = vsel %vm890_vm2, %v5351_v20, %v877_v18  ;;  %v6990_v4 = vld [vmem:[#allocation110_spill] sm:$0xff]  ;;  %v6991_v61 = vld [vmem:[#allocation141_spill] sm:$0xff] }
 0x21e   :  { %2022 = vmatpush2.msra.mxu0 %v990_v23  ;;  %v605_v26 = vmul.f32 %v4913_v10, %v5096_v60  ;;  %v5360_v2 = vmul.f32 %v6988_v21, %v5096_v60  ;;  %v507_v45 = vsel %vm506_vm5, %v6989_v33, %v6864_v40  ;;  %v986_v58 = vmul.f32 %v969_v63, %v961_v12  ;;  %v6992_v23 = vld [vmem:[#allocation68_spill] sm:$0xff]  ;;  %v6999_v33 = vld [vmem:[#allocation106_spill] sm:$0xff]  ;;  %v7029_v20 = vld [vmem:[#allocation83_spill] sm:$0xff] }
 0x21f   :  { %2124 = vmatpush1.msra.mxu1 %v608_v37  ;;  %v845_v7 = vrot.slane %v6990_v4, %v4401_v56  ;;  %v927_v46 = vmul.f32 %v909_v14, %v896_v36  ;;  %v926_v18 = vmul.f32 %v905_v15, %v898_v25  ;;  %2023 = vmatprep.subr.mxu0 %v987_v17  ;;  %v5379_v63 = vpop.permute.xlu1 %1214  ;;  %v5381_v12 = vpop.permute.xlu0 %878  ;;  %v6995_v37 = vld [vmem:[#allocation103_spill] sm:$0xff]  ;;  %v6997_v25 = vld [vmem:[#allocation29_spill] sm:$0xff]  ;;  %v7016_v56 = vld [vmem:[#allocation56_spill] sm:$0xff] }
 0x220   :  { %2125 = vmatprep.subr.mxu1 %v605_v26  ;;  %v545_v10 = vmul.f32 %v4954_v51, %v5343_v50  ;;  %v544_v60 = vmul.f32 %v6910_v9, %v6991_v61  ;;  %v5376_v40 = vsel %vm442_vm7, %v6992_v23, %v4866_v59  ;;  %2024 = vmatpush2.msra.mxu0 %v986_v58 }
 0x221   :  { %2126 = vmatpush1.msra.mxu1 %v5024_v0  ;;  %6993 = vst [vmem:[#allocation139_spill] sm:$0xff] %v5381_v12  ;;  %v5385_v54 = vmul.f32 %v4942_v43, %v4785_v47  ;;  %v897_v9 = vsel %vm890_vm2, %v5317_v34, %v5284_v41  ;;  %2025 = vmatprep.subr.mxu0 %v927_v46  ;;  %v6996_v47 = vld [vmem:[#allocation107_spill] sm:$0xff]  ;;  %v3619_v46 = vld [vmem:[#allocation12 + $0x8] sm:$0xff] }
 0x222   :  { %2127 = vmatprep.subr.mxu1 %v545_v10  ;;  %v895_v59 = vsel %vm890_vm2, %v5284_v41, %v5381_v12  ;;  %v541_v0 = vmul.f32 %v4954_v51, %v507_v45  ;;  %v5398_v31 = vmul.f32 %v6995_v37, %v6994_v39  ;;  %v5401_v36 = vmul.f32 %v6996_v47, %v507_v45  ;;  %v6998_v51 = vld [vmem:[#allocation30_spill] sm:$0xff]  ;;  %v7000_v45 = vld [vmem:[#allocation45_spill] sm:$0xff]  ;;  %v7001_v10 = vld [vmem:[#allocation31_spill] sm:$0xff] }
 0x223   :  { %v923_v17 = vmul.f32 %v909_v14, %v895_v59  ;;  %2026 = vmatpush2.msra.mxu0 %v926_v18  ;;  %2128 = vmatpush1.msra.mxu1 %v544_v60  ;;  %v443_v26 = vsel %vm442_vm7, %v6997_v25, %v6874_v52  ;;  %v481_v41 = vmul.f32 %v4987_v57, %v5376_v40  ;;  %v7002_v52 = vld [vmem:[#allocation48_spill] sm:$0xff]  ;;  %v5420_v60 = vpop.permute.xlu1 %1150  ;;  %v5422_v23 = vpop.permute.xlu0 %824  ;;  %v7004_v59 = vld [vmem:[#allocation145_spill] sm:$0xff]  ;;  %v7025_v12 = vld [vmem:[#allocation70_spill] sm:$0xff] }
 0x224   :  { %2129 = vmatprep.subr.mxu1 %v541_v0  ;;  %v5411_v58 = vmul.f32 %v6999_v33, %v6998_v51  ;;  %2175 = vmatprep.mubr.f32.mxu1 %v3619_v46  ;;  %v379_v14 = vsel %vm378_vm8, %v7001_v10, %v7000_v45  ;;  %v922_v18 = vmul.f32 %v905_v15, %v897_v9  ;;  %v7005_v0 = vld [vmem:[#allocation98_spill] sm:$0xff]  ;;  %v7006_v25 = vld [vmem:[#allocation40_spill] sm:$0xff]  ;;  %v7007_v51 = vld [vmem:[#allocation69_spill] sm:$0xff] }
 0x225   :  { %v841_v61 = vrot.slane %v6990_v4, %v6941_v22  ;;  %2130 = vmatpush1.msra.mxu1 %v7002_v52  ;;  %2027 = vmatprep.subr.mxu0 %v923_v17  ;;  %7003 = vst [vmem:[#allocation113_spill] sm:$0xff] %v5422_v23  ;;  %v480_v39 = vmul.f32 %v7005_v0, %v7004_v59  ;;  %v7008_v15 = vld [vmem:[#allocation75_spill] sm:$0xff]  ;;  %v7010_v9 = vld [vmem:[#allocation89_spill] sm:$0xff]  ;;  %v7011_v45 = vld [vmem:[#allocation104_spill] sm:$0xff] }
 0x226   :  { %v5430_v46 = vsel %vm378_vm8, %v7007_v51, %v7006_v25  ;;  %2131 = vmatprep.subr.mxu1 %v481_v41  ;;  %v5436_v4 = vsel %vm826_vm12, %v5422_v23, %v7008_v15  ;;  %v863_v17 = vmul.f32 %v845_v7, %v7010_v9  ;;  %v7012_v10 = vld [vmem:[#allocation108_spill] sm:$0xff]  ;;  %v7013_v59 = vld [vmem:[#allocation114_spill] sm:$0xff]  ;;  %2028 = vmatpush2.msra.mxu0 %v922_v18  ;;  %v7015_v51 = vld [vmem:[#allocation33_spill] sm:$0xff] }
 0x227   :  { %7009 = vst [vmem:[#allocation57_spill] sm:$0xff] %v5436_v4  ;;  %v5441_v52 = vmul.f32 %v7012_v10, %v7011_v45  ;;  %v5444_v0 = vmul.f32 %v7013_v59, %v443_v26  ;;  %v862_v22 = vmul.f32 %v841_v61, %v5436_v4  ;;  %v477_v41 = vmul.f32 %v4987_v57, %v443_v26  ;;  %v7014_v25 = vld [vmem:[#allocation50_spill] sm:$0xff]  ;;  %v7018_v45 = vld [vmem:[#allocation73_spill] sm:$0xff]  ;;  %v5465_v57 = vpop.permute.xlu1 %1344  ;;  %v7022_v26 = vld [vmem:[#allocation35_spill] sm:$0xff] }
 0x228   :  { %v316_v15 = vsel %vm315_vm9, %v7015_v51, %v7014_v25  ;;  %v5456_v9 = vsel %vm826_vm12, %v5349_v13, %v7016_v56  ;;  %2132 = vmatpush1.msra.mxu1 %v480_v39  ;;  %2029 = vmatprep.subr.mxu0 %v863_v17  ;;  %v5460_v23 = vmul.f32 %v7019_v6, %v7018_v45  ;;  %v7020_v18 = vld [vmem:[#allocation118_spill] sm:$0xff]  ;;  %v1217_v51 = vpop.permute.xlu0 %1216  ;;  %v7026_v34 = vld [vmem:[#allocation120_spill] sm:$0xff] }
 0x229   :  { %7017 = vst [vmem:[#allocation23_spill] sm:$0xff] %v5456_v9  ;;  %v5463_v4 = vmul.f32 %v7020_v18, %v379_v14  ;;  %2133 = vmatprep.subr.mxu1 %v477_v41  ;;  %2030 = vmatpush2.msra.mxu0 %v862_v22  ;;  %v417_v25 = vmul.f32 %v7022_v26, %v5430_v46  ;;  %v7023_v13 = vld [vmem:[#allocation146_spill] sm:$0xff]  ;;  %v7027_v41 = vld [vmem:[#allocation21_spill] sm:$0xff]  ;;  %v7028_v22 = vld [vmem:[#allocation32_spill] sm:$0xff] }
 0x22a   :  { %v413_v56 = vmul.f32 %v7022_v26, %v379_v14  ;;  %v416_v39 = vmul.f32 %v6995_v37, %v7023_v13  ;;  %v7024_v17 = vld [vmem:[#allocation42_spill] sm:$0xff]  ;;  %2134 = vmatpush1.msra.mxu1 %v7026_v34  ;;  %v859_v62 = vmul.f32 %v845_v7, %v7027_v41  ;;  %v5482_v53 = vmul.f32 %v7029_v20, %v7028_v22  ;;  %v5488_v13 = vld [vmem:[#allocation12] sm:$0xff]  ;;  %v7034_v37 = vld [vmem:[#allocation105_spill] sm:$0xff] }
 0x22b   :  { %7021 = vst [vmem:[#allocation60_spill] sm:$0xff] %v5463_v4  ;;  %v5476_v45 = vsel %vm315_vm9, %v7025_v12, %v7024_v17  ;;  %v5485_v32 = vmul.f32 %v7031_v3, %v316_v15  ;;  %v858_v14 = vmul.f32 %v841_v61, %v5456_v9  ;;  %2135 = vmatprep.subr.mxu1 %v417_v25  ;;  %7033 = vst [vmem:[#allocation135_spill] sm:$0xff] %v5488_v13  ;;  %v7035_v12 = vld [vmem:[#allocation91_spill] sm:$0xff]  ;;  %v7036_v17 = vld [vmem:[#allocation96_spill] sm:$0xff] }
 0x22c   :  { %7030 = vst [vmem:[#allocation53_spill] sm:$0xff] %v5482_v53  ;;  %v349_v26 = vmul.f32 %v7034_v37, %v316_v15  ;;  %v5493_v28 = vmul.f32 %v7036_v17, %v7035_v12  ;;  %v3620_v34 = vld [vmem:[#allocation10 + $0x20] ss:$8 sm:$0xf]  ;;  %2031 = vmatprep.subr.mxu0 %v859_v62  ;;  %2136 = vmatpush1.msra.mxu1 %v416_v39 }
 0x22d   :  { %7032 = vst [vmem:[#allocation55_spill] sm:$0xff] %v5485_v32  ;;  %v7038_v7 = vld [vmem:[#allocation115_spill] sm:$0xff]  ;;  %v7040_v22 = vld [vmem:[#allocation81_spill] sm:$0xff]  ;;  %2032 = vmatpush2.msra.mxu0 %v858_v14  ;;  %2137 = vmatprep.subr.mxu1 %v413_v56  ;;  %v7043_v15 = vld [vmem:[#allocation34_spill] sm:$0xff]  ;;  %v1618_v30 = vmul.f32 %v7045_v42, %v5277_v29 }
 0x22e   :  { %7037 = vst [vmem:[#allocation140_spill] sm:$0xff] %v5493_v28  ;;  %v5496_v41 = vrot.slane %v3620_v34, %v7038_v7  ;;  %v7041_v4 = vld [vmem:[#allocation117_spill] sm:$0xff]  ;;  %v7042_v61 = vld [vmem:[#allocation127_spill] sm:$0xff]  ;;  %v5506_v28 = vpop.permute.xlu1 %1342  ;;  %v353_v34 = vmul.f32 %v7034_v37, %v5476_v45  ;;  %2034 = vmatmul.mubr.f32.vlgmr.msra.gmra.mxu0 %v5488_v13  ;;  %2138 = vmatpush1.msra.mxu1 %v5398_v31 }
 0x22f   :  { %v1241_v53 = vrot.slane %v7041_v4, %v7040_v22  ;;  %v1245_v32 = vrot.slane %v7041_v4, %v7038_v7  ;;  %v1177_v25 = vrot.slane %v7042_v61, %v7040_v22  ;;  %v7044_v12 = vld [vmem:[#allocation133_spill] sm:$0xff]  ;;  %v7046_v4 = vld [vmem:[#allocation95_spill] sm:$0xff]  ;;  %v1181_v56 = vrot.slane %v7042_v61, %v7038_v7 }
 0x230   :  { %7039 = vst [vmem:[#allocation134_spill] sm:$0xff] %v5496_v41  ;;  %v1619_v9 = vmul.f32 %v7044_v12, %v7043_v15  ;;  %v1153_v41 = vpop.permute.xlu0 %1152  ;;  %v352_v62 = vmul.f32 %v7012_v10, %v7046_v4  ;;  %v7047_v39 = vld [vmem:[#allocation93_spill] sm:$0xff]  ;;  %2139 = vmatprep.subr.mxu1 %v353_v34  ;;  %v7049_v29 = vld [vmem:[#allocation51_spill] sm:$0xff]  ;;  %v7052_v34 = vld [vmem:[#allocation90_spill] sm:$0xff] }
 0x231   :  { %v1226_v14 = vsel %vm1218_vm13, %v1217_v51, %v7047_v39  ;;  %v3621_v15 = vld [vmem:[#allocation10 + $0x41] ss:$8 sm:$0xf]  ;;  %v1225_v10 = vsel %vm1218_vm13, %v5379_v63, %v7049_v29  ;;  %v3622_v61 = vld [vmem:[#allocation10 + $0x40] ss:$8 sm:$0xf]  ;;  %v1162_v13 = vsel %vm1154_vm14, %v1153_v41, %v6946_v8  ;;  %v1161_v8 = vsel %vm1154_vm14, %v5420_v60, %v6952_v48 }
 0x232   :  { %v5522_v37 = vrot.slane %v3621_v15, %v7040_v22  ;;  %v7048_v12 = vld [vmem:[#allocation85_spill] sm:$0xff]  ;;  %2182 = vmatprep.subr.mxu0 %v1619_v9  ;;  %v5532_v31 = vrot.slane %v3621_v15, %v7038_v7  ;;  %2140 = vmatpush1.msra.mxu1 %v352_v62  ;;  %v5535_v4 = vrot.slane %v3622_v61, %v7040_v22 }
 0x233   :  { %v1220_v42 = vsel %vm1218_vm13, %v7048_v12, %v1217_v51  ;;  %2183 = vmatpush1.msra.mxu0 %v1618_v30  ;;  %v7051_v39 = vld [vmem:[#allocation49_spill] sm:$0xff]  ;;  %v1257_v51 = vmul.f32 %v1245_v32, %v1226_v14  ;;  %2141 = vmatprep.subr.mxu1 %v349_v26  ;;  %v7053_v12 = vld [vmem:[#allocation36_spill] sm:$0xff]  ;;  %v1579_v30 = vmul.f32 %v6988_v21, %v5311_v24  ;;  %v7055_v14 = vld [vmem:[#allocation79_spill] sm:$0xff] }
 0x234   :  { %7050 = vst [vmem:[#allocation22_spill] sm:$0xff] %v5535_v4  ;;  %v1219_v9 = vsel %vm1218_vm13, %v7051_v39, %v5379_v63  ;;  %2184 = vmatprep.subr.mxu0 %v7052_v34  ;;  %v1580_v29 = vmul.f32 %v4942_v43, %v7053_v12  ;;  %v1077_v15 = vpop.permute.xlu0 %1076  ;;  %v1256_v62 = vmul.f32 %v1241_v53, %v1220_v42  ;;  %v7054_v4 = vld [vmem:[#allocation122_spill] sm:$0xff]  ;;  %v5557_v39 = vpop.permute.xlu1 %1280 }
 0x235   :  { %2185 = vmatpush1.msra.mxu0 %v7054_v4  ;;  %2142 = vmatpush1.msra.mxu1 %v5441_v52  ;;  %v1253_v63 = vmul.f32 %v1245_v32, %v1225_v10  ;;  %v1156_v26 = vsel %vm1154_vm14, %v7055_v14, %v1153_v41  ;;  %v5555_v43 = vrot.slane %v3622_v61, %v7038_v7  ;;  %v7063_v12 = vld [vmem:[#allocation62_spill] sm:$0xff] }
 0x236   :  { %2186 = vmatprep.subr.mxu0 %v1580_v29  ;;  %2143 = vmatprep.subr.mxu1 %v1257_v51  ;;  %v1252_v24 = vmul.f32 %v1241_v53, %v1219_v9  ;;  %v5565_v32 = vrot.slane %v5135_v44, %v7040_v22  ;;  %v1155_v21 = vsel %vm1154_vm14, %v6950_v19, %v5420_v60  ;;  %v7056_v53 = vld [vmem:[#allocation38_spill] sm:$0xff]  ;;  %v7064_v29 = vld [vmem:[#allocation116_spill] sm:$0xff] }
 0x237   :  { %2187 = vmatpush1.msra.mxu0 %v1579_v30  ;;  %2144 = vmatpush2.msra.mxu1 %v1256_v62  ;;  %v1193_v52 = vmul.f32 %v1181_v56, %v1162_v13  ;;  %v1541_v41 = vmul.f32 %v6999_v33, %v7056_v53  ;;  %v1540_v48 = vmul.f32 %v6996_v47, %v5343_v50  ;;  %v7057_v47 = vld [vmem:[#allocation101_spill] sm:$0xff]  ;;  %v3624_v62 = vld [vmem:[#allocation4 + $0x10] sm:$0xff] }
 0x238   :  { %2188 = vmatprep.subr.mxu0 %v5385_v54  ;;  %2145 = vmatprep.subr.mxu1 %v1253_v63  ;;  %v1075_v42 = vpop.permute.xlu0 %1074  ;;  %v1192_v10 = vmul.f32 %v1177_v25, %v1156_v26  ;;  %v1109_v61 = vrot.slane %v5135_v44, %v7038_v7  ;;  %v1189_v4 = vmul.f32 %v1181_v56, %v1161_v8  ;;  %v7065_v26 = vld [vmem:[#allocation37_spill] sm:$0xff]  ;;  %v7068_v53 = vld [vmem:[#allocation64_spill] sm:$0xff] }
 0x239   :  { %2189 = vmatpush1.msra.mxu0 %v5360_v2  ;;  %2146 = vmatpush2.msra.mxu1 %v1252_v24  ;;  %v5581_v19 = vrot.slane %v5267_v5, %v7040_v22  ;;  %v5585_v54 = vrot.slane %v5267_v5, %v7038_v7  ;;  %v1188_v33 = vmul.f32 %v1177_v25, %v1155_v21  ;;  %v5593_v2 = vpop.permute.xlu1 %1278  ;;  %v7067_v21 = vld [vmem:[#allocation39_spill] sm:$0xff] }
 0x23a   :  { %2190 = vmatprep.subr.mxu0 %v1541_v41  ;;  %2147 = vmatprep.subr.mxu1 %v1193_v52  ;;  %v5589_v44 = vrot.slane %v5178_v27, %v7040_v22  ;;  %v1045_v50 = vrot.slane %v5178_v27, %v7038_v7  ;;  %v1502_v60 = vmul.f32 %v7019_v6, %v7057_v47  ;;  %v7058_v6 = vld [vmem:[#allocation72_spill] sm:$0xff] }
 0x23b   :  { %2191 = vmatpush1.msra.mxu0 %v1540_v48  ;;  %2148 = vmatpush2.msra.mxu1 %v1192_v10  ;;  %v5600_v13 = vrot.slane %v5301_v1, %v7040_v22  ;;  %v5604_v25 = vrot.slane %v5301_v1, %v7038_v7  ;;  %v1501_v27 = vmul.f32 %v7013_v59, %v5376_v40  ;;  %v7059_v40 = vld [vmem:[#allocation46_spill] sm:$0xff]  ;;  %v7070_v10 = vld [vmem:[#allocation60_spill] sm:$0xff] }
 0x23c   :  { %2192 = vmatprep.subr.mxu0 %v5411_v58  ;;  %2149 = vmatprep.subr.mxu1 %v1189_v4  ;;  %v1013_v5 = vpop.permute.xlu0 %1012  ;;  %v1462_v56 = vmul.f32 %v7020_v18, %v5430_v46  ;;  %v1084_v58 = vsel %vm1082_vm15, %v1077_v15, %v5162_v49  ;;  %v1348_v9 = vsel %vm1346_vm10, %v7058_v6, %v5465_v57  ;;  %v7060_v46 = vld [vmem:[#allocation86_spill] sm:$0xff] }
 0x23d   :  { %2193 = vmatpush1.msra.mxu0 %v5401_v36  ;;  %2150 = vmatpush2.msra.mxu1 %v1188_v33  ;;  %v1086_v1 = vsel %vm1082_vm15, %v5053_v55, %v1077_v15  ;;  %v1463_v59 = vmul.f32 %v7029_v20, %v7060_v46  ;;  %v1423_v49 = vmul.f32 %v7031_v3, %v5476_v45  ;;  %v7061_v36 = vld [vmem:[#allocation74_spill] sm:$0xff]  ;;  %v7062_v55 = vld [vmem:[#allocation28_spill] sm:$0xff]  ;;  %v3623_v3 = vld [vmem:[#allocation4 + $0x18] sm:$0xff]  ;;  %v947_v14 = vpop.permute.xlu1 %946 }
 0x23e   :  { %2194 = vmatprep.subr.mxu0 %v1502_v60  ;;  %2151 = vmatprep.subr.mxu1 %v7059_v40  ;;  %v1354_v18 = vsel %vm1346_vm10, %v5465_v57, %v7061_v36  ;;  %v1083_v51 = vsel %vm1082_vm15, %v1075_v42, %v6973_v16  ;;  %v1121_v34 = vmul.f32 %v1109_v61, %v1084_v58  ;;  %v7072_v33 = vld [vmem:[#allocation94_spill] sm:$0xff] }
 0x23f   :  { %2195 = vmatpush1.msra.mxu0 %v1501_v27  ;;  %2152 = vmatpush2.msra.mxu1 %v7062_v55  ;;  %v1085_v20 = vsel %vm1082_vm15, %v7063_v12, %v1075_v42  ;;  %v1424_v57 = vmul.f32 %v7036_v17, %v7064_v29  ;;  %v1384_v15 = vmul.f32 %v5522_v37, %v1348_v9  ;;  %v7069_v42 = vld [vmem:[#allocation53_spill] sm:$0xff]  ;;  %v7073_v27 = vld [vmem:[#allocation124_spill] sm:$0xff]  ;;  %v7080_v55 = vld [vmem:[#allocation54_spill] sm:$0xff] }
 0x240   :  { %2196 = vmatprep.subr.mxu0 %v5460_v23  ;;  %2153 = vmatprep.subr.mxu1 %v3623_v3  ;;  %v1011_v45 = vpop.permute.xlu0 %1010  ;;  %v1120_v16 = vmul.f32 %v5565_v32, %v1086_v1  ;;  %v1020_v30 = vsel %vm1018_vm0, %v1013_v5, %v5201_v35  ;;  %v1385_v23 = vmul.f32 %v5532_v31, %v1354_v18  ;;  %v7074_v1 = vld [vmem:[#allocation76_spill] sm:$0xff]  ;;  %v7082_v29 = vld [vmem:[#allocation131_spill] sm:$0xff] }
 0x241   :  { %2197 = vmatpush1.msra.mxu0 %v5444_v0  ;;  %2154 = vmatpush2.msra.mxu1 %v3624_v62  ;;  %v1117_v63 = vmul.f32 %v1109_v61, %v1083_v51  ;;  %v1022_v17 = vsel %vm1018_vm0, %v5112_v38, %v1013_v5  ;;  %v1347_v24 = vsel %vm1346_vm10, %v7065_v26, %v5506_v28  ;;  %v7066_v0 = vld [vmem:[#allocation109_spill] sm:$0xff]  ;;  %v7071_v61 = vld [vmem:[#allocation58_spill] sm:$0xff]  ;;  %v883_v46 = vpop.permute.xlu1 %882  ;;  %v7079_v18 = vld [vmem:[#allocation84_spill] sm:$0xff] }
 0x242   :  { %2198 = vmatprep.subr.mxu0 %v1463_v59  ;;  %2155 = vmatprep.subr.mxu1 %v1121_v34  ;;  %v1116_v35 = vmul.f32 %v5565_v32, %v1085_v20  ;;  %v1019_v8 = vsel %vm1018_vm0, %v1011_v45, %v7066_v0  ;;  %v1353_v38 = vsel %vm1346_vm10, %v5506_v28, %v7067_v21  ;;  %v7076_v59 = vld [vmem:[#allocation140_spill] sm:$0xff]  ;;  %v7083_v62 = vld [vmem:[#allocation41_spill] sm:$0xff] }
 0x243   :  { %2199 = vmatpush1.msra.mxu0 %v1462_v56  ;;  %2156 = vmatpush2.msra.mxu1 %v1120_v16  ;;  %v1057_v52 = vmul.f32 %v1045_v50, %v1020_v30  ;;  %v1021_v41 = vsel %vm1018_vm0, %v7068_v53, %v1011_v45  ;;  %v1056_v48 = vmul.f32 %v5589_v44, %v1022_v17  ;;  %v7081_v12 = vld [vmem:[#allocation44_spill] sm:$0xff]  ;;  %v7088_v21 = vld [vmem:[#allocation129_spill] sm:$0xff] }
 0x244   :  { %2200 = vmatprep.subr.mxu0 %v7069_v42  ;;  %2157 = vmatprep.subr.mxu1 %v1117_v63  ;;  %v949_v32 = vpop.permute.xlu0 %948  ;;  %v1380_v47 = vmul.f32 %v5522_v37, %v1347_v24  ;;  %v1053_v60 = vmul.f32 %v1045_v50, %v1019_v8  ;;  %v955_v56 = vsel %vm954_vm6, %v947_v14, %v7073_v27  ;;  %v7075_v50 = vld [vmem:[#allocation125_spill] sm:$0xff]  ;;  %v7086_v17 = vld [vmem:[#allocation80_spill] sm:$0xff]  ;;  %v7087_v24 = vld [vmem:[#allocation22_spill] sm:$0xff] }
 0x245   :  { %2201 = vmatpush1.msra.mxu0 %v7070_v10  ;;  %2158 = vmatpush2.msra.mxu1 %v1116_v35  ;;  %v956_v4 = vsel %vm954_vm6, %v949_v32, %v7071_v61  ;;  %v958_v28 = vsel %vm954_vm6, %v7072_v33, %v949_v32  ;;  %v1052_v58 = vmul.f32 %v5589_v44, %v1021_v41  ;;  %v7090_v42 = vld [vmem:[#allocation134_spill] sm:$0xff] }
 0x246   :  { %2202 = vmatprep.subr.mxu0 %v1424_v57  ;;  %2159 = vmatprep.subr.mxu1 %v1057_v52  ;;  %v993_v5 = vmul.f32 %v5585_v54, %v956_v4  ;;  %v992_v6 = vmul.f32 %v5581_v19, %v958_v28  ;;  %v1381_v9 = vmul.f32 %v5532_v31, %v1353_v38  ;;  %v7078_v31 = vld [vmem:[#allocation55_spill] sm:$0xff] }
 0x247   :  { %2203 = vmatpush1.msra.mxu0 %v1423_v49  ;;  %2160 = vmatpush2.msra.mxu1 %v1056_v48  ;;  %v1284_v37 = vsel %vm1282_vm11, %v7074_v1, %v5557_v39  ;;  %v957_v40 = vsel %vm954_vm6, %v7075_v50, %v947_v14  ;;  %v7077_v49 = vld [vmem:[#allocation78_spill] sm:$0xff]  ;;  %v1289_v20 = vsel %vm1282_vm11, %v5593_v2, %v7081_v12  ;;  %v7089_v38 = vld [vmem:[#allocation47_spill] sm:$0xff]  ;;  %v7091_v48 = vld [vmem:[#allocation57_spill] sm:$0xff] }
 0x248   :  { %2204 = vmatprep.subr.mxu0 %v7076_v59  ;;  %2161 = vmatprep.subr.mxu1 %v1053_v60  ;;  %v885_v44 = vpop.permute.xlu0 %884  ;;  %v1290_v36 = vsel %vm1282_vm11, %v5557_v39, %v7077_v49  ;;  %v989_v3 = vmul.f32 %v5585_v54, %v955_v56  ;;  %v988_v45 = vmul.f32 %v5581_v19, %v957_v40  ;;  %v3625_v19 = vld [vmem:[#allocation10 + $0x62] ss:$8 sm:$0xf] }
 0x249   :  { %2205 = vmatpush1.msra.mxu0 %v7078_v31  ;;  %2162 = vmatpush2.msra.mxu1 %v1052_v58  ;;  %v892_v51 = vsel %vm890_vm2, %v885_v44, %v7079_v18  ;;  %v894_v34 = vsel %vm890_vm2, %v7080_v55, %v885_v44  ;;  %v891_v57 = vsel %vm890_vm2, %v883_v46, %v7082_v29  ;;  %v7094_v28 = vld [vmem:[#allocation23_spill] sm:$0xff]  ;;  %v7098_v50 = vld [vmem:[#allocation138_spill] sm:$0xff]  ;;  %v7100_v49 = vld [vmem:[#allocation52_spill] sm:$0xff] }
 0x24a   :  { %2206 = vmatprep.subr.mxu0 %v1385_v23  ;;  %2163 = vmatprep.subr.mxu1 %v993_v5  ;;  %v929_v39 = vmul.f32 %v5604_v25, %v892_v51  ;;  %v928_v16 = vmul.f32 %v5600_v13, %v894_v34  ;;  %v1321_v30 = vmul.f32 %v5555_v43, %v1290_v36  ;;  %v7084_v23 = vld [vmem:[#allocation139_spill] sm:$0xff]  ;;  %v3628_v18 = vld [vmem:[#allocation12 + $0x18] sm:$0xff]  ;;  %v7101_v51 = vld [vmem:[#allocation144_spill] sm:$0xff] }
 0x24b   :  { %2207 = vmatpush1.msra.mxu0 %v1384_v15  ;;  %2164 = vmatpush2.msra.mxu1 %v992_v6  ;;  %v1283_v54 = vsel %vm1282_vm11, %v7083_v62, %v5593_v2  ;;  %v893_v63 = vsel %vm890_vm2, %v7084_v23, %v883_v46  ;;  %v1720_v14 = vrot.slane %v3625_v19, %v7040_v22  ;;  %v7085_v15 = vld [vmem:[#allocation113_spill] sm:$0xff]  ;;  %v7095_v5 = vld [vmem:[#allocation87_spill] sm:$0xff]  ;;  %v7096_v6 = vld [vmem:[#allocation136_spill] sm:$0xff] }
 0x24c   :  { %2208 = vmatprep.subr.mxu0 %v1381_v9  ;;  %2165 = vmatprep.subr.mxu1 %v989_v3  ;;  %v828_v26 = vsel %vm826_vm12, %v7086_v17, %v7085_v15  ;;  %v1320_v35 = vmul.f32 %v7087_v24, %v1284_v37  ;;  %v1724_v2 = vrot.slane %v3625_v19, %v7038_v7  ;;  %v7097_v1 = vld [vmem:[#allocation111_spill] sm:$0xff]  ;;  %v7102_v34 = vld [vmem:[#allocation128_spill] sm:$0xff]  ;;  %v7105_v29 = vld [vmem:[#allocation77_spill] sm:$0xff] }
 0x24d   :  { %2209 = vmatpush1.msra.mxu0 %v1380_v47  ;;  %2166 = vmatpush2.msra.mxu1 %v988_v45  ;;  %v1317_v0 = vmul.f32 %v5555_v43, %v1289_v20  ;;  %v925_v8 = vmul.f32 %v5604_v25, %v891_v57  ;;  %v827_v52 = vsel %vm826_vm12, %v7089_v38, %v7088_v21  ;;  %v7092_v43 = vld [vmem:[#allocation88_spill] sm:$0xff]  ;;  %v7093_v25 = vld [vmem:[#allocation123_spill] sm:$0xff] }
 0x24e   :  { %2210 = vmatprep.subr.mxu0 %v1321_v30  ;;  %2167 = vmatprep.subr.mxu1 %v929_v39  ;;  %v1316_v53 = vmul.f32 %v7087_v24, %v1283_v54  ;;  %v924_v41 = vmul.f32 %v5600_v13, %v893_v63  ;;  %v865_v32 = vmul.f32 %v7090_v42, %v828_v26  ;;  %v3626_v13 = vld [vmem:[#allocation10 + $0x61] ss:$8 sm:$0xf]  ;;  %v3627_v46 = vld [vmem:[#allocation10 + $0x60] ss:$8 sm:$0xf] }
 0x24f   :  { %2211 = vmatpush1.msra.mxu0 %v1320_v35  ;;  %2168 = vmatpush2.msra.mxu1 %v928_v16  ;;  %v1736_v10 = vmul.f32 %v1724_v2, %v7091_v48  ;;  %v864_v61 = vmul.f32 %v7093_v25, %v7092_v43  ;;  %v1735_v4 = vmul.f32 %v1720_v14, %v828_v26  ;;  %v7099_v44 = vld [vmem:[#allocation135_spill] sm:$0xff]  ;;  %v7104_v39 = vld [vmem:[#allocation132_spill] sm:$0xff] }
 0x250   :  { %2212 = vmatprep.subr.mxu0 %v1317_v0  ;;  %2169 = vmatprep.subr.mxu1 %v925_v8  ;;  %v861_v33 = vmul.f32 %v7090_v42, %v827_v52  ;;  %v1732_v47 = vmul.f32 %v1724_v2, %v7094_v28  ;;  %v1685_v60 = vrot.slane %v3626_v13, %v7038_v7  ;;  %v7103_v20 = vld [vmem:[#allocation143_spill] sm:$0xff] }
 0x251   :  { %2213 = vmatpush1.msra.mxu0 %v1316_v53  ;;  %2170 = vmatpush2.msra.mxu1 %v924_v41  ;;  %v860_v27 = vmul.f32 %v7093_v25, %v7095_v5  ;;  %v1681_v56 = vrot.slane %v3626_v13, %v7040_v22  ;;  %v1731_v58 = vmul.f32 %v1720_v14, %v827_v52 }
 0x252   :  { %2234 = vmatprep.subr.mxu0 %v1736_v10  ;;  %2171 = vmatprep.subr.mxu1 %v865_v32  ;;  %v1697_v9 = vmul.f32 %v1685_v60, %v7096_v6  ;;  %v1693_v40 = vmul.f32 %v1685_v60, %v7098_v50  ;;  %v1646_v59 = vrot.slane %v3627_v46, %v7038_v7 }
 0x253   :  { %2235 = vmatpush2.msra.mxu0 %v1735_v4  ;;  %2172 = vmatpush2.msra.mxu1 %v864_v61  ;;  %v1696_v37 = vmul.f32 %v1681_v56, %v7097_v1  ;;  %v1692_v36 = vmul.f32 %v1681_v56, %v7100_v49  ;;  %v1642_v31 = vrot.slane %v3627_v46, %v7040_v22  ;;  %v7106_v1 = vld [vmem:[#allocation100_spill] sm:$0xff] }
 0x254   :  { %2236 = vmatprep.subr.mxu0 %v1732_v47  ;;  %2173 = vmatprep.subr.mxu1 %v861_v33  ;;  %v1658_v55 = vmul.f32 %v1646_v59, %v7101_v51  ;;  %v1654_v3 = vmul.f32 %v1646_v59, %v7103_v20 }
 0x255   :  { %2237 = vmatpush2.msra.mxu0 %v1731_v58  ;;  %2174 = vmatpush2.msra.mxu1 %v860_v27  ;;  %v1657_v12 = vmul.f32 %v1642_v31, %v7102_v34  ;;  %v1653_v45 = vmul.f32 %v1642_v31, %v7104_v39 }
 0x256   :  { %2238 = vmatprep.subr.mxu0 %v1697_v9  ;;  %2176 = vmatmul.mubr.f32.vlgmr.msra.gmra.mxu1 %v7099_v44  ;;  %v2888_v9 = vld [vmem:[#allocation10 + $0x27] ss:$8 sm:$0xf] }
 0x257   :  { %2239 = vmatpush2.msra.mxu0 %v1696_v37  ;;  %3583 = vmatprep.mubr.msk.f32.mxu0 %vm1965_vm1, %v3628_v18  ;;  %v2897_v37 = vrot.slane %v2888_v9, %v7106_v1  ;;  %v7107_v44 = vld [vmem:[#allocation82_spill] sm:$0xff]  ;;  %vm3382_vm1 = vcmask 719872  }
 0x258   :  { %2240 = vmatprep.subr.mxu0 %v1693_v40  ;;  %v2893_v49 = vrot.slane %v2888_v9, %v7107_v44 }
 0x259   :  { %2241 = vmatpush2.msra.mxu0 %v1692_v36  ;;  %v2846_v36 = vld [vmem:[#allocation10 + $0x26] ss:$8 sm:$0xf] }
 0x25a   :  { %2242 = vmatprep.subr.mxu0 %v1658_v55  ;;  %v2851_v34 = vrot.slane %v2846_v36, %v7107_v44 }
 0x25b   :  { %2243 = vmatpush2.msra.mxu0 %v1657_v12  ;;  %v2855_v12 = vrot.slane %v2846_v36, %v7106_v1 }
 0x25c   :  { %2244 = vmatprep.subr.mxu0 %v1654_v3 }
 0x25d   :  { %2245 = vmatpush2.msra.mxu0 %v1653_v45 }
 0x25e   :  { %2247 = vmatmul.mubr.f32.vlgmr.msra.gmra.mxu0 %v7105_v29  ;;  %v2901_v29 = vrot.slane %v2888_v9, %v7040_v22 }
 0x2d1   :  { %v2106_v16 = vpop.f32.mrf.mxu1 }
 0x2d3   :  { %v2108_v62 = vpop.f32.mrf.mxu1 }
 0x2ee   :  { %v2035_v57 = vpop.f32.mrf.mxu0 }
 0x2ef   :  { %v2107_v63 = vadd.f32 %v2106_v16, %v2035_v57 }
 0x2f0   :  { %v2037_v30 = vpop.f32.mrf.mxu0 }
 0x2f1   :  { %v2109_v54 = vadd.f32 %v2108_v62, %v2037_v30  ;;  %v2905_v30 = vrot.slane %v2888_v9, %v7038_v7  ;;  %v5908_v62 = vld [vmem:[#allocation10 + $0x24] ss:$8 sm:$0xf] }
 0x2f3   :  { %v2253_v14 = vadd.f32 %v2109_v54, %v2107_v63 }
 0x316   :  { %v2177_v23 = vpop.f32.mrf.mxu1 }
 0x318   :  { %v2179_v17 = vpop.f32.mrf.mxu1 }
 0x31e   :  { %v2248_v19 = vpop.f32.mrf.mxu0 }
 0x31f   :  { %v2249_v15 = vadd.f32 %v2248_v19, %v2177_v23  ;;  %v3273_v19 = vld [vmem:[#allocation13 + $0x8] sm:$0xff] }
 0x320   :  { %v2250_v26 = vpop.f32.mrf.mxu0  ;;  %3584 = vmatprep.mubr.msk.f32.mxu0 %vm3382_vm1, %v3273_v19  ;;  %3585 = vmatprep.mubr.msk.f32.mxu1 %vm3382_vm1, %v3273_v19 }
 0x321   :  { %v2254_v24 = vadd.f32 %v2253_v14, %v2249_v15  ;;  %v2251_v35 = vadd.f32 %v2250_v26, %v2179_v17  ;;  %v2863_v17 = vrot.slane %v2846_v36, %v7038_v7 }
 0x323   :  { %v2255_v2 = vadd.f32 %v2254_v24, %v2251_v35 }
 0x325   :  { %2256 = vadd.xlane.f32.xlu0 %v2255_v2 }
 0x3ae   :  { %v2257_v0 = vpop.xlane.xlu0 %2256 }
 0x3af   :  { %v2259_v8 = vmul.f32 0.001953125, %v2257_v0 }
 0x3b1   :  { %v2260_v21 = vsub.f32 %v2107_v63, %v2259_v8  ;;  %v2261_v38 = vsub.f32 %v2109_v54, %v2259_v8  ;;  %v2262_v52 = vsub.f32 %v2249_v15, %v2259_v8  ;;  %v2263_v53 = vsub.f32 %v2251_v35, %v2259_v8 }
 0x3b2   :  { %v2859_v63 = vrot.slane %v2846_v36, %v7040_v22  ;;  %v2809_v35 = vrot.slane %v5908_v62, %v7106_v1 }
 0x3b3   :  { %v2264_v41 = vmul.f32 %v2260_v21, %v2260_v21  ;;  %v2265_v42 = vmul.f32 %v2261_v38, %v2261_v38  ;;  %v2266_v32 = vmul.f32 %v2262_v52, %v2262_v52  ;;  %v2267_v10 = vmul.f32 %v2263_v53, %v2263_v53 }
 0x3b5   :  { %v2268_v48 = vadd.f32 %v2265_v42, %v2264_v41 }
 0x3b7   :  { %v2269_v43 = vadd.f32 %v2268_v48, %v2266_v32  ;;  %v2758_v32 = vld [vmem:[#allocation10 + $0x23] ss:$8 sm:$0xf] }
 0x3b9   :  { %v2270_v25 = vadd.f32 %v2269_v43, %v2267_v10 }
 0x3bb   :  { %2271 = vadd.xlane.f32.xlu1 %v2270_v25 }
 0x444   :  { %v2272_v61 = vpop.xlane.xlu1 %2271 }
 0x445   :  { %v2273_v4 = vmul.f32 0.001953125, %v2272_v61  ;;  %v2763_v61 = vrot.slane %v2758_v32, %v7107_v44 }
 0x447   :  { %v2274_v33 = vadd.f32 1e-05, %v2273_v4  ;;  %v2767_v4 = vrot.slane %v2758_v32, %v7106_v1 }
 0x449   :  { %3613 = vrsqrt.f32 %v2274_v33  ;;  %v5942_v33 = vld [vmem:[#allocation10 + $0x22] ss:$8 sm:$0xf] }
 0x456   :  { %v3614_v28 = vpop.eup %3613 }
 0x457   :  { %v2277_v47 = vmul.f32 %v3614_v28, %v2261_v38  ;;  %v2278_v13 = vmul.f32 %v3614_v28, %v2262_v52  ;;  %v2276_v60 = vmul.f32 %v3614_v28, %v2260_v21  ;;  %v2279_v58 = vmul.f32 %v3614_v28, %v2263_v53 }
 0x458   :  { %v2805_v52 = vrot.slane %v5908_v62, %v7107_v44 }
 0x459   :  { %v5758_v5 = vmax.f32 %v2277_v47, 0.0  ;;  %v5760_v27 = vmax.f32 %v2278_v13, 0.0  ;;  %v5766_v56 = vmax.f32 %v2276_v60, 0.0  ;;  %v5776_v6 = vmax.f32 %v2279_v58, 0.0 }
 0x45a   :  { %v2725_v58 = vrot.slane %v5942_v33, %v7106_v1 }
 0x45b   :  { %2880 = vrot.lane.b32.xlu1 %v5760_v27, %s3799_s10  ;;  %2878 = vrot.lane.b32.xlu0 %v5758_v5, %s3799_s10 }
 0x45f   :  { %2836 = vrot.lane.b32.xlu1 %v5758_v5, %s3800_s1  ;;  %2876 = vrot.lane.b32.xlu0 %v5766_v56, %s3799_s10 }
 0x463   :  { %2834 = vrot.lane.b32.xlu1 %v5766_v56, %s3800_s1  ;;  %2838 = vrot.lane.b32.xlu0 %v5760_v27, %s3800_s1 }
 0x467   :  { %2788 = vrot.lane.b32.xlu1 %v5766_v56, %s3801_s11  ;;  %2882 = vrot.lane.b32.xlu0 %v5776_v6, %s3799_s10 }
 0x46b   :  { %2840 = vrot.lane.b32.xlu1 %v5776_v6, %s3800_s1  ;;  %2790 = vrot.lane.b32.xlu0 %v5758_v5, %s3801_s11 }
 0x46f   :  { %2746 = vrot.lane.b32.xlu1 %v5766_v56, %s3802_s12  ;;  %2794 = vrot.lane.b32.xlu0 %v5776_v6, %s3801_s11 }
 0x473   :  { %2752 = vrot.lane.b32.xlu1 %v5776_v6, %s3802_s12  ;;  %2748 = vrot.lane.b32.xlu0 %v5758_v5, %s3802_s12 }
 0x477   :  { %2706 = vrot.lane.b32.xlu1 %v5758_v5, %s3803_s13  ;;  %2704 = vrot.lane.b32.xlu0 %v5766_v56, %s3803_s13 }
 0x47b   :  { %2710 = vrot.lane.b32.xlu1 %v5776_v6, %s3803_s13  ;;  %2792 = vrot.lane.b32.xlu0 %v5760_v27, %s3801_s11 }
 0x47f   :  { %2664 = vrot.lane.b32.xlu1 %v5758_v5, %s3804_s14  ;;  %2662 = vrot.lane.b32.xlu0 %v5766_v56, %s3804_s14 }
 0x483   :  { %2668 = vrot.lane.b32.xlu1 %v5776_v6, %s3804_s14  ;;  %2750 = vrot.lane.b32.xlu0 %v5760_v27, %s3802_s12 }
 0x487   :  { %2622 = vrot.lane.b32.xlu1 %v5758_v5, %s3798_s9  ;;  %2620 = vrot.lane.b32.xlu0 %v5766_v56, %s3798_s9 }
 0x48b   :  { %2626 = vrot.lane.b32.xlu1 %v5776_v6, %s3798_s9  ;;  %2708 = vrot.lane.b32.xlu0 %v5760_v27, %s3803_s13 }
 0x48f   :  { %2580 = vrot.lane.b32.xlu1 %v5758_v5, %s3789_s5  ;;  %2578 = vrot.lane.b32.xlu0 %v5766_v56, %s3789_s5 }
 0x493   :  { %2584 = vrot.lane.b32.xlu1 %v5776_v6, %s3789_s5  ;;  %2666 = vrot.lane.b32.xlu0 %v5760_v27, %s3804_s14 }
 0x497   :  { %2538 = vrot.lane.b32.xlu1 %v5758_v5, %s3791_s26  ;;  %2536 = vrot.lane.b32.xlu0 %v5766_v56, %s3791_s26 }
 0x49b   :  { %2542 = vrot.lane.b32.xlu1 %v5776_v6, %s3791_s26  ;;  %2624 = vrot.lane.b32.xlu0 %v5760_v27, %s3798_s9 }
 0x49f   :  { %2496 = vrot.lane.b32.xlu1 %v5758_v5, %s3788_s4  ;;  %2494 = vrot.lane.b32.xlu0 %v5766_v56, %s3788_s4 }
 0x4a3   :  { %2500 = vrot.lane.b32.xlu1 %v5776_v6, %s3788_s4  ;;  %2582 = vrot.lane.b32.xlu0 %v5760_v27, %s3789_s5 }
 0x4a7   :  { %2454 = vrot.lane.b32.xlu1 %v5758_v5, %s3790_s25  ;;  %2452 = vrot.lane.b32.xlu0 %v5766_v56, %s3790_s25 }
 0x4ab   :  { %2458 = vrot.lane.b32.xlu1 %v5776_v6, %s3790_s25  ;;  %2540 = vrot.lane.b32.xlu0 %v5760_v27, %s3791_s26 }
 0x4af   :  { %2412 = vrot.lane.b32.xlu1 %v5758_v5, %s3792_s27  ;;  %2410 = vrot.lane.b32.xlu0 %v5766_v56, %s3792_s27 }
 0x4b3   :  { %2416 = vrot.lane.b32.xlu1 %v5776_v6, %s3792_s27  ;;  %2498 = vrot.lane.b32.xlu0 %v5760_v27, %s3788_s4 }
 0x4b7   :  { %2370 = vrot.lane.b32.xlu1 %v5758_v5, %s3793_s28  ;;  %2368 = vrot.lane.b32.xlu0 %v5766_v56, %s3793_s28 }
 0x4bb   :  { %2374 = vrot.lane.b32.xlu1 %v5776_v6, %s3793_s28  ;;  %2456 = vrot.lane.b32.xlu0 %v5760_v27, %s3790_s25 }
 0x4bf   :  { %2328 = vrot.lane.b32.xlu1 %v5758_v5, %s3794_s29  ;;  %2326 = vrot.lane.b32.xlu0 %v5766_v56, %s3794_s29 }
 0x4c3   :  { %2332 = vrot.lane.b32.xlu1 %v5776_v6, %s3794_s29  ;;  %2414 = vrot.lane.b32.xlu0 %v5760_v27, %s3792_s27 }
 0x4c7   :  { %2286 = vrot.lane.b32.xlu1 %v5758_v5, %s3795_s30  ;;  %2284 = vrot.lane.b32.xlu0 %v5766_v56, %s3795_s30 }
 0x4cb   :  { %2290 = vrot.lane.b32.xlu1 %v5776_v6, %s3795_s30  ;;  %2372 = vrot.lane.b32.xlu0 %v5760_v27, %s3793_s28 }
 0x4cd   :  { %v2881_v50 = vpop.permute.xlu1 %2880  ;;  %v2879_v40 = vpop.permute.xlu0 %2878 }
 0x4ce   :  { %v2885_v46 = vsel %vm1218_vm13, %v2879_v40, %v2881_v50 }
 0x4cf   :  { %v2911_v59 = vmul.f32 %v2897_v37, %v2885_v46  ;;  %2288 = vrot.lane.b32.xlu1 %v5760_v27, %s3795_s30  ;;  %2330 = vrot.lane.b32.xlu0 %v5760_v27, %s3794_s29  ;;  %v2817_v46 = vrot.slane %v5908_v62, %v7038_v7 }
 0x4d1   :  { %v2837_v31 = vpop.permute.xlu1 %2836  ;;  %3386 = vmatprep.subr.mxu0 %v2911_v59  ;;  %v2877_v18 = vpop.permute.xlu0 %2876  ;;  %v5958_v59 = vld [vmem:[#allocation10 + $0x21] ss:$8 sm:$0xf] }
 0x4d2   :  { %v2886_v51 = vsel %vm1218_vm13, %v2877_v18, %v2879_v40  ;;  %v2813_v40 = vrot.slane %v5908_v62, %v7040_v22  ;;  %v5974_v62 = vld [vmem:[#allocation10 + $0x20] ss:$8 sm:$0xf] }
 0x4d3   :  { %v2910_v55 = vmul.f32 %v2893_v49, %v2886_v51  ;;  %2964 = vrot.lane.b32.xlu1 %v5760_v27, %s3796_s7  ;;  %2962 = vrot.lane.b32.xlu0 %v5758_v5, %s3796_s7 }
 0x4d5   :  { %v2835_v20 = vpop.permute.xlu1 %2834  ;;  %3387 = vmatpush1.msra.mxu0 %v2910_v55  ;;  %v2839_v3 = vpop.permute.xlu0 %2838 }
 0x4d6   :  { %v2844_v39 = vsel %vm1154_vm14, %v2835_v20, %v2837_v31  ;;  %v2843_v45 = vsel %vm1154_vm14, %v2837_v31, %v2839_v3 }
 0x4d7   :  { %v2868_v57 = vmul.f32 %v2851_v34, %v2844_v39  ;;  %v2869_v16 = vmul.f32 %v2855_v12, %v2843_v45  ;;  %2920 = vrot.lane.b32.xlu1 %v5758_v5, %s3797_s8  ;;  %2960 = vrot.lane.b32.xlu0 %v5766_v56, %s3796_s7 }
 0x4d9   :  { %v2789_v54 = vpop.permute.xlu1 %2788  ;;  %3388 = vmatprep.subr.mxu0 %v2869_v16  ;;  %v2883_v23 = vpop.permute.xlu0 %2882  ;;  %v2771_v16 = vrot.slane %v2758_v32, %v7040_v22 }
 0x4da   :  { %v2884_v14 = vsel %vm1218_vm13, %v2881_v50, %v2883_v23  ;;  %v2887_v15 = vsel %vm1218_vm13, %v2883_v23, %v2877_v18  ;;  %3389 = vmatpush1.msra.mxu0 %v2868_v57  ;;  %v2721_v50 = vrot.slane %v5942_v33, %v7107_v44  ;;  %v2679_v57 = vrot.slane %v5958_v59, %v7107_v44 }
 0x4db   :  { %v2912_v26 = vmul.f32 %v2901_v29, %v2884_v14  ;;  %v2913_v24 = vmul.f32 %v2905_v30, %v2887_v15  ;;  %2918 = vrot.lane.b32.xlu1 %v5766_v56, %s3797_s8  ;;  %2922 = vrot.lane.b32.xlu0 %v5760_v27, %s3797_s8  ;;  %v2775_v30 = vrot.slane %v2758_v32, %v7038_v7  ;;  %vm7110_vm13 = vcmp.lt.s32.totalorder %v4286_v11, 63 }
 0x4dc   :  { %3390 = vmatprep.subr.mxu0 %v5758_v5 }
 0x4dd   :  { %3391 = vmatpush1.msra.mxu0 %v5766_v56  ;;  %v2841_v2 = vpop.permute.xlu1 %2840  ;;  %3457 = vmatprep.subr.mxu1 %v2913_v24  ;;  %v2791_v0 = vpop.permute.xlu0 %2790  ;;  %v2641_v24 = vrot.slane %v5974_v62, %v7106_v1 }
 0x4de   :  { %v2842_v8 = vsel %vm1154_vm14, %v2839_v3, %v2841_v2  ;;  %v2845_v21 = vsel %vm1154_vm14, %v2841_v2, %v2835_v20  ;;  %v2798_v38 = vsel %vm1082_vm15, %v2789_v54, %v2791_v0  ;;  %3458 = vmatpush1.msra.mxu1 %v2912_v26  ;;  %v2683_v20 = vrot.slane %v5958_v59, %v7106_v1 }
 0x4df   :  { %v2870_v53 = vmul.f32 %v2859_v63, %v2842_v8  ;;  %v2871_v41 = vmul.f32 %v2863_v17, %v2845_v21  ;;  %v2823_v42 = vmul.f32 %v2809_v35, %v2798_v38  ;;  %2924 = vrot.lane.b32.xlu1 %v5776_v6, %s3797_s8  ;;  %2966 = vrot.lane.b32.xlu0 %v5776_v6, %s3796_s7 }
 0x4e0   :  { %v2637_v21 = vrot.slane %v5974_v62, %v7107_v44  ;;  %v2729_v38 = vrot.slane %v5942_v33, %v7040_v22 }
 0x4e1   :  { %v2747_v48 = vpop.permute.xlu1 %2746  ;;  %3392 = vmatprep.subr.mxu0 %v2823_v42  ;;  %3459 = vmatprep.subr.mxu1 %v2871_v41  ;;  %v2795_v10 = vpop.permute.xlu0 %2794 }
 0x4e2   :  { %v2799_v43 = vsel %vm1082_vm15, %v2795_v10, %v2789_v54  ;;  %3460 = vmatpush1.msra.mxu1 %v2870_v53  ;;  %v5995_v53 = vld [vmem:[#allocation10 + $0x7] ss:$8 sm:$0xf] }
 0x4e3   :  { %v2822_v25 = vmul.f32 %v2805_v52, %v2799_v43  ;;  %3461 = vmatprep.subr.mxu1 %v5776_v6  ;;  %v2733_v52 = vrot.slane %v5942_v33, %v7038_v7 }
 0x4e4   :  { %3462 = vmatpush1.msra.mxu1 %v5760_v27 }
 0x4e5   :  { %v2753_v28 = vpop.permute.xlu1 %2752  ;;  %3393 = vmatpush1.msra.mxu0 %v2822_v25  ;;  %v2749_v47 = vpop.permute.xlu0 %2748 }
 0x4e6   :  { %v2757_v13 = vsel %vm1018_vm0, %v2753_v28, %v2747_v48  ;;  %v2756_v60 = vsel %vm1018_vm0, %v2747_v48, %v2749_v47 }
 0x4e7   :  { %v2780_v5 = vmul.f32 %v2763_v61, %v2757_v13  ;;  %v2781_v56 = vmul.f32 %v2767_v4, %v2756_v60  ;;  %v2599_v4 = vrot.slane %v5995_v53, %v7106_v1  ;;  %v2595_v60 = vrot.slane %v5995_v53, %v7107_v44 }
 0x4e9   :  { %v2707_v6 = vpop.permute.xlu1 %2706  ;;  %3394 = vmatprep.subr.mxu0 %v2781_v56  ;;  %v2705_v9 = vpop.permute.xlu0 %2704  ;;  %v2691_v56 = vrot.slane %v5958_v59, %v7038_v7 }
 0x4ea   :  { %v2714_v27 = vsel %vm954_vm6, %v2705_v9, %v2707_v6  ;;  %3395 = vmatpush1.msra.mxu0 %v2780_v5  ;;  %v2687_v5 = vrot.slane %v5958_v59, %v7040_v22 }
 0x4eb   :  { %v2739_v37 = vmul.f32 %v2725_v58, %v2714_v27  ;;  %v6019_v58 = vld [vmem:[#allocation10 + $0x6] ss:$8 sm:$0xf] }
 0x4ec   :  { %v2557_v59 = vrot.slane %v6019_v58, %v7106_v1 }
 0x4ed   :  { %v2711_v49 = vpop.permute.xlu1 %2710  ;;  %3396 = vmatprep.subr.mxu0 %v2739_v37  ;;  %v2793_v36 = vpop.permute.xlu0 %2792 }
 0x4ee   :  { %v2715_v31 = vsel %vm954_vm6, %v2711_v49, %v2705_v9  ;;  %v2796_v18 = vsel %vm1082_vm15, %v2793_v36, %v2795_v10  ;;  %v2797_v51 = vsel %vm1082_vm15, %v2791_v0, %v2793_v36 }
 0x4ef   :  { %v2738_v55 = vmul.f32 %v2721_v50, %v2715_v31  ;;  %v2824_v34 = vmul.f32 %v2813_v40, %v2797_v51  ;;  %v2825_v12 = vmul.f32 %v2817_v46, %v2796_v18 }
 0x4f1   :  { %v2665_v3 = vpop.permute.xlu1 %2664  ;;  %3397 = vmatpush1.msra.mxu0 %v2738_v55  ;;  %3463 = vmatprep.subr.mxu1 %v2825_v12  ;;  %v2663_v39 = vpop.permute.xlu0 %2662  ;;  %v2553_v55 = vrot.slane %v6019_v58, %v7107_v44  ;;  %v2649_v12 = vrot.slane %v5974_v62, %v7038_v7 }
 0x4f2   :  { %v2672_v45 = vsel %vm890_vm2, %v2663_v39, %v2665_v3  ;;  %3464 = vmatpush1.msra.mxu1 %v2824_v34  ;;  %v2645_v34 = vrot.slane %v5974_v62, %v7040_v22 }
 0x4f3   :  { %v2697_v29 = vmul.f32 %v2683_v20, %v2672_v45  ;;  %v6043_v20 = vld [vmem:[#allocation10 + $0x5] ss:$8 sm:$0xf] }
 0x4f5   :  { %v2669_v54 = vpop.permute.xlu1 %2668  ;;  %3398 = vmatprep.subr.mxu0 %v2697_v29  ;;  %v2751_v23 = vpop.permute.xlu0 %2750 }
 0x4f6   :  { %v2673_v63 = vsel %vm890_vm2, %v2669_v54, %v2663_v39  ;;  %v2754_v19 = vsel %vm1018_vm0, %v2751_v23, %v2753_v28  ;;  %v2755_v14 = vsel %vm1018_vm0, %v2749_v47, %v2751_v23 }
 0x4f7   :  { %v2696_v15 = vmul.f32 %v2679_v57, %v2673_v63  ;;  %v2782_v17 = vmul.f32 %v2771_v16, %v2755_v14  ;;  %v2783_v26 = vmul.f32 %v2775_v30, %v2754_v19 }
 0x4f9   :  { %v2623_v35 = vpop.permute.xlu1 %2622  ;;  %3399 = vmatpush1.msra.mxu0 %v2696_v15  ;;  %3465 = vmatprep.subr.mxu1 %v2783_v26  ;;  %v2621_v2 = vpop.permute.xlu0 %2620  ;;  %v2511_v15 = vrot.slane %v6043_v20, %v7107_v44  ;;  %v2607_v26 = vrot.slane %v5995_v53, %v7038_v7 }
 0x4fa   :  { %v5986_v0 = vsel %vm826_vm12, %v2621_v2, %v2623_v35  ;;  %3466 = vmatpush1.msra.mxu1 %v2782_v17  ;;  %v2603_v17 = vrot.slane %v5995_v53, %v7040_v22 }
 0x4fb   :  { %v2655_v8 = vmul.f32 %v2641_v24, %v5986_v0  ;;  %v6073_v24 = vld [vmem:[#allocation10 + $0x4] ss:$8 sm:$0xf] }
 0x4fd   :  { %v2627_v41 = vpop.permute.xlu1 %2626  ;;  %3400 = vmatprep.subr.mxu0 %v2655_v8  ;;  %v2709_v42 = vpop.permute.xlu0 %2708 }
 0x4fe   :  { %v5999_v32 = vsel %vm826_vm12, %v2627_v41, %v2621_v2  ;;  %v2712_v48 = vsel %vm954_vm6, %v2709_v42, %v2711_v49  ;;  %v2713_v10 = vsel %vm954_vm6, %v2707_v6, %v2709_v42  ;;  %vm7108_vm6 = vcmp.lt.s32.totalorder %v4286_v11, 57 }
 0x4ff   :  { %v2654_v43 = vmul.f32 %v2637_v21, %v5999_v32  ;;  %v2740_v25 = vmul.f32 %v2729_v38, %v2713_v10  ;;  %v2741_v61 = vmul.f32 %v2733_v52, %v2712_v48  ;;  %v2473_v42 = vrot.slane %v6073_v24, %v7106_v1 }
 0x501   :  { %v2581_v33 = vpop.permute.xlu1 %2580  ;;  %3401 = vmatpush1.msra.mxu0 %v2654_v43  ;;  %3467 = vmatprep.subr.mxu1 %v2741_v61  ;;  %v2579_v28 = vpop.permute.xlu0 %2578  ;;  %v2469_v61 = vrot.slane %v6073_v24, %v7107_v44 }
 0x502   :  { %v6010_v47 = vsel %vm762_vm3, %v2579_v28, %v2581_v33  ;;  %3468 = vmatpush1.msra.mxu1 %v2740_v25 }
 0x503   :  { %v2613_v13 = vmul.f32 %v2599_v4, %v6010_v47  ;;  %v2561_v4 = vrot.slane %v6019_v58, %v7040_v22 }
 0x505   :  { %v2585_v6 = vpop.permute.xlu1 %2584  ;;  %3402 = vmatprep.subr.mxu0 %v2613_v13  ;;  %v2667_v9 = vpop.permute.xlu0 %2666 }
 0x506   :  { %v6023_v27 = vsel %vm762_vm3, %v2585_v6, %v2579_v28  ;;  %v2670_v37 = vsel %vm890_vm2, %v2667_v9, %v2669_v54  ;;  %v2671_v50 = vsel %vm890_vm2, %v2665_v3, %v2667_v9  ;;  %vm7109_vm2 = vmmov %vm7108_vm6  ;;  %v2515_v54 = vrot.slane %v6043_v20, %v7106_v1  ;;  %v6103_v28 = vld [vmem:[#allocation10 + $0x3] ss:$8 sm:$0xf] }
 0x507   :  { %v2612_v40 = vmul.f32 %v2595_v60, %v6023_v27  ;;  %v2698_v46 = vmul.f32 %v2687_v5, %v2671_v50  ;;  %v2699_v49 = vmul.f32 %v2691_v56, %v2670_v37  ;;  %vm7113_vm14 = vmmov %vm7109_vm2  ;;  %v2431_v50 = vrot.slane %v6103_v28, %v7106_v1 }
 0x509   :  { %v2539_v36 = vpop.permute.xlu1 %2538  ;;  %3403 = vmatpush1.msra.mxu0 %v2612_v40  ;;  %3469 = vmatprep.subr.mxu1 %v2699_v49  ;;  %v2537_v31 = vpop.permute.xlu0 %2536 }
 0x50a   :  { %v6034_v18 = vsel %vm7108_vm6, %v2537_v31, %v2539_v36  ;;  %3470 = vmatpush1.msra.mxu1 %v2698_v46 }
 0x50b   :  { %v2571_v51 = vmul.f32 %v2557_v59, %v6034_v18 }
 0x50d   :  { %v2543_v3 = vpop.permute.xlu1 %2542  ;;  %3404 = vmatprep.subr.mxu0 %v2571_v51  ;;  %v2625_v39 = vpop.permute.xlu0 %2624  ;;  %v2523_v51 = vrot.slane %v6043_v20, %v7038_v7 }
 0x50e   :  { %v6047_v45 = vsel %vm7109_vm2, %v2543_v3, %v2537_v31  ;;  %v6051_v29 = vsel %vm826_vm12, %v2625_v39, %v2627_v41  ;;  %v6055_v57 = vsel %vm826_vm12, %v2623_v35, %v2625_v39  ;;  %vm7111_vm12 = vmmov %vm7110_vm13  ;;  %v2519_v31 = vrot.slane %v6043_v20, %v7040_v22 }
 0x50f   :  { %v2570_v16 = vmul.f32 %v2553_v55, %v6047_v45  ;;  %v2656_v30 = vmul.f32 %v2645_v34, %v6055_v57  ;;  %v2657_v62 = vmul.f32 %v2649_v12, %v6051_v29  ;;  %v6133_v55 = vld [vmem:[#allocation10 + $0x2] ss:$8 sm:$0xf]  ;;  %vm7114_vm15 = vmmov %vm7111_vm12 }
 0x510   :  { %vm7115_vm0 = vmmov %vm7111_vm12 }
 0x511   :  { %v2497_v23 = vpop.permute.xlu1 %2496  ;;  %3405 = vmatpush1.msra.mxu0 %v2570_v16  ;;  %3471 = vmatprep.subr.mxu1 %v2657_v62  ;;  %v2495_v63 = vpop.permute.xlu0 %2494 }
 0x512   :  { %v6064_v19 = vsel %vm7110_vm13, %v2495_v63, %v2497_v23  ;;  %3472 = vmatpush1.msra.mxu1 %v2656_v30 }
 0x513   :  { %v2529_v14 = vmul.f32 %v2515_v54, %v6064_v19  ;;  %v2389_v54 = vrot.slane %v6133_v55, %v7106_v1 }
 0x515   :  { %v2501_v35 = vpop.permute.xlu1 %2500  ;;  %3406 = vmatprep.subr.mxu0 %v2529_v14  ;;  %v2583_v2 = vpop.permute.xlu0 %2582 }
 0x516   :  { %v6077_v8 = vsel %vm7111_vm12, %v2501_v35, %v2495_v63  ;;  %v6081_v21 = vsel %vm762_vm3, %v2583_v2, %v2585_v6  ;;  %v6085_v38 = vsel %vm762_vm3, %v2581_v33, %v2583_v2  ;;  %v2565_v33 = vrot.slane %v6019_v58, %v7038_v7  ;;  %vm7112_vm3 = vmmov %vm7109_vm2  ;;  %v6166_v2 = vld [vmem:[#allocation10 + $0x1] ss:$8 sm:$0xf] }
 0x517   :  { %v2528_v52 = vmul.f32 %v2511_v15, %v6077_v8  ;;  %v2614_v53 = vmul.f32 %v2603_v17, %v6085_v38  ;;  %v2615_v41 = vmul.f32 %v2607_v26, %v6081_v21  ;;  %v2385_v17 = vrot.slane %v6133_v55, %v7107_v44 }
 0x518   :  { %v2477_v26 = vrot.slane %v6073_v24, %v7040_v22 }
 0x519   :  { %v2455_v48 = vpop.permute.xlu1 %2454  ;;  %3407 = vmatpush1.msra.mxu0 %v2528_v52  ;;  %3473 = vmatprep.subr.mxu1 %v2615_v41  ;;  %v2453_v10 = vpop.permute.xlu0 %2452 }
 0x51a   :  { %v6094_v43 = vsel %vm570_vm4, %v2453_v10, %v2455_v48  ;;  %3474 = vmatpush1.msra.mxu1 %v2614_v53 }
 0x51b   :  { %v2487_v25 = vmul.f32 %v2473_v42, %v6094_v43 }
 0x51d   :  { %v2459_v13 = vpop.permute.xlu1 %2458  ;;  %3408 = vmatprep.subr.mxu0 %v2487_v25  ;;  %v2541_v60 = vpop.permute.xlu0 %2540 }
 0x51e   :  { %v6107_v5 = vsel %vm570_vm4, %v2459_v13, %v2453_v10  ;;  %v6111_v56 = vsel %vm7112_vm3, %v2541_v60, %v2543_v3  ;;  %v6115_v6 = vsel %vm7113_vm14, %v2539_v36, %v2541_v60  ;;  %v2427_v36 = vrot.slane %v6103_v28, %v7107_v44 }
 0x51f   :  { %v2486_v9 = vmul.f32 %v2469_v61, %v6107_v5  ;;  %v2572_v58 = vmul.f32 %v2561_v4, %v6115_v6  ;;  %v2573_v37 = vmul.f32 %v2565_v33, %v6111_v56  ;;  %v2347_v4 = vrot.slane %v6166_v2, %v7106_v1 }
 0x521   :  { %v2413_v40 = vpop.permute.xlu1 %2412  ;;  %3409 = vmatpush1.msra.mxu0 %v2486_v9  ;;  %3475 = vmatprep.subr.mxu1 %v2573_v37  ;;  %v2411_v46 = vpop.permute.xlu0 %2410  ;;  %v2343_v9 = vrot.slane %v6166_v2, %v7107_v44  ;;  %v2439_v37 = vrot.slane %v6103_v28, %v7038_v7 }
 0x522   :  { %v6124_v49 = vsel %vm506_vm5, %v2411_v46, %v2413_v40  ;;  %3476 = vmatpush1.msra.mxu1 %v2572_v58  ;;  %v2435_v58 = vrot.slane %v6103_v28, %v7040_v22 }
 0x523   :  { %v2445_v59 = vmul.f32 %v2431_v50, %v6124_v49  ;;  %v6202_v50 = vld [vmem:[#allocation10] ss:$8 sm:$0xf] }
 0x525   :  { %v2417_v34 = vpop.permute.xlu1 %2416  ;;  %3410 = vmatprep.subr.mxu0 %v2445_v59  ;;  %v2499_v12 = vpop.permute.xlu0 %2498 }
 0x526   :  { %v6137_v3 = vsel %vm506_vm5, %v2417_v34, %v2411_v46  ;;  %v6141_v39 = vsel %vm7114_vm15, %v2499_v12, %v2501_v35  ;;  %v6145_v16 = vsel %vm7115_vm0, %v2497_v23, %v2499_v12  ;;  %v2481_v35 = vrot.slane %v6073_v24, %v7038_v7  ;;  %v6204_v46 = vld [vmem:[#allocation10 + $0x62] ss:$8 sm:$0xf] }
 0x527   :  { %v2444_v30 = vmul.f32 %v2427_v36, %v6137_v3  ;;  %v2530_v20 = vmul.f32 %v2519_v31, %v6145_v16  ;;  %v2531_v62 = vmul.f32 %v2523_v51, %v6141_v39  ;;  %v6208_v31 = vld [vmem:[#allocation10 + $0x61] ss:$8 sm:$0xf] }
 0x529   :  { %v6152_v63 = vpop.permute.xlu1 %2370  ;;  %3411 = vmatpush1.msra.mxu0 %v2444_v30  ;;  %3477 = vmatprep.subr.mxu1 %v2531_v62  ;;  %v2369_v14 = vpop.permute.xlu0 %2368  ;;  %v6223_v30 = vld [vmem:[#allocation10 + $0x60] ss:$8 sm:$0xf] }
 0x52a   :  { %v6157_v15 = vsel %vm442_vm7, %v2369_v14, %v6152_v63  ;;  %3478 = vmatpush1.msra.mxu1 %v2530_v20 }
 0x52b   :  { %v2403_v23 = vmul.f32 %v2389_v54, %v6157_v15 }
 0x52d   :  { %v6168_v52 = vpop.permute.xlu1 %2374  ;;  %3412 = vmatprep.subr.mxu0 %v2403_v23  ;;  %v2457_v53 = vpop.permute.xlu0 %2456  ;;  %v3247_v23 = vrot.slane %v6204_v46, %v7107_v44 }
 0x52e   :  { %v6173_v41 = vsel %vm442_vm7, %v6168_v52, %v2369_v14  ;;  %v6177_v42 = vsel %vm570_vm4, %v2457_v53, %v2459_v13  ;;  %v6181_v10 = vsel %vm570_vm4, %v2455_v48, %v2457_v53  ;;  %v2305_v14 = vrot.slane %v6202_v50, %v7106_v1 }
 0x52f   :  { %7116 = vst [vmem:[#allocation24_spill] sm:$0xff] %v6173_v41  ;;  %v2402_v24 = vmul.f32 %v2385_v17, %v6173_v41  ;;  %v2488_v25 = vmul.f32 %v2477_v26, %v6181_v10  ;;  %v2489_v61 = vmul.f32 %v2481_v35, %v6177_v42  ;;  %v6238_v26 = vld [vmem:[#allocation10 + $0x47] ss:$8 sm:$0xf] }
 0x531   :  { %v6188_v33 = vpop.permute.xlu1 %2328  ;;  %3413 = vmatpush1.msra.mxu0 %v2402_v24  ;;  %3479 = vmatprep.subr.mxu1 %v2489_v61  ;;  %v2327_v60 = vpop.permute.xlu0 %2326  ;;  %v3251_v61 = vrot.slane %v6204_v46, %v7106_v1  ;;  %v6279_v24 = vld [vmem:[#allocation10 + $0x44] ss:$8 sm:$0xf] }
 0x532   :  { %v6193_v13 = vsel %vm378_vm8, %v2327_v60, %v6188_v33  ;;  %3480 = vmatpush1.msra.mxu1 %v2488_v25 }
 0x533   :  { %v2361_v48 = vmul.f32 %v2347_v4, %v6193_v13  ;;  %v6246_v4 = vld [vmem:[#allocation10 + $0x46] ss:$8 sm:$0xf]  ;;  %v3265_v41 = vmul.f32 %v3251_v61, %v6055_v57  ;;  %v3264_v61 = vmul.f32 %v3247_v23, %v5986_v0  ;;  %v3079_v0 = vrot.slane %v6279_v24, %v7038_v7 }
 0x534   :  { %v2309_v23 = vrot.slane %v6202_v50, %v7040_v22 }
 0x535   :  { %v6206_v59 = vpop.permute.xlu1 %2332  ;;  %3414 = vmatprep.subr.mxu0 %v2361_v48  ;;  %v2415_v36 = vpop.permute.xlu0 %2414 }
 0x536   :  { %v6213_v51 = vsel %vm378_vm8, %v6206_v59, %v2327_v60  ;;  %v6217_v12 = vsel %vm506_vm5, %v2415_v36, %v2417_v34  ;;  %v6221_v28 = vsel %vm506_vm5, %v2413_v40, %v2415_v36  ;;  %v3217_v40 = vrot.slane %v6208_v31, %v7107_v44 }
 0x537   :  { %7117 = vst [vmem:[#allocation59_spill] sm:$0xff] %v6213_v51  ;;  %7118 = vst [vmem:[#allocation126_spill] sm:$0xff] %v6217_v12  ;;  %v2360_v20 = vmul.f32 %v2343_v9, %v6213_v51  ;;  %v2446_v62 = vmul.f32 %v2435_v58, %v6221_v28  ;;  %v2447_v54 = vmul.f32 %v2439_v37, %v6217_v12 }
 0x538   :  { %v2301_v9 = vrot.slane %v6202_v50, %v7107_v44  ;;  %v2393_v58 = vrot.slane %v6133_v55, %v7040_v22  ;;  %v2397_v37 = vrot.slane %v6133_v55, %v7038_v7  ;;  %v3191_v36 = vrot.slane %v6223_v30, %v7106_v1 }
 0x539   :  { %v2287_v35 = vpop.permute.xlu1 %2286  ;;  %3415 = vmatpush1.msra.mxu0 %v2360_v20  ;;  %3481 = vmatprep.subr.mxu1 %v2447_v54  ;;  %v2285_v53 = vpop.permute.xlu0 %2284  ;;  %v3221_v54 = vrot.slane %v6208_v31, %v7106_v1  ;;  %v2351_v12 = vrot.slane %v6166_v2, %v7040_v22 }
 0x53a   :  { %v6250_v60 = vsel %vm315_vm9, %v2285_v53, %v2287_v35  ;;  %3482 = vmatpush1.msra.mxu1 %v2446_v62 }
 0x53b   :  { %v2319_v48 = vmul.f32 %v2305_v14, %v6250_v60  ;;  %v6267_v14 = vld [vmem:[#allocation10 + $0x45] ss:$8 sm:$0xf] }
 0x53d   :  { %v2291_v20 = vpop.permute.xlu1 %2290  ;;  %3416 = vmatprep.subr.mxu0 %v2319_v48  ;;  %v2373_v62 = vpop.permute.xlu0 %2372 }
 0x53e   :  { %v6283_v25 = vsel %vm315_vm9, %v2291_v20, %v2285_v53  ;;  %v6288_v55 = vsel %vm442_vm7, %v2373_v62, %v6168_v52  ;;  %v6293_v17 = vsel %vm442_vm7, %v6152_v63, %v2373_v62  ;;  %v2355_v63 = vrot.slane %v6166_v2, %v7038_v7  ;;  %v6314_v52 = vld [vmem:[#allocation10 + $0x43] ss:$8 sm:$0xf] }
 0x53f   :  { %v2318_v34 = vmul.f32 %v2301_v9, %v6283_v25  ;;  %v2404_v51 = vmul.f32 %v2393_v58, %v6293_v17  ;;  %v2405_v53 = vmul.f32 %v2397_v37, %v6288_v55  ;;  %v3161_v62 = vrot.slane %v6238_v26, %v7106_v1 }
 0x540   :  { %v3067_v58 = vrot.slane %v6279_v24, %v7107_v44  ;;  %v2313_v2 = vrot.slane %v6202_v50, %v7038_v7  ;;  %v3131_v50 = vrot.slane %v6246_v4, %v7106_v1 }
 0x541   :  { %v2289_v37 = vpop.permute.xlu1 %2288  ;;  %3417 = vmatpush1.msra.mxu0 %v2318_v34  ;;  %3483 = vmatprep.subr.mxu1 %v2405_v53  ;;  %v2331_v57 = vpop.permute.xlu0 %2330  ;;  %v3235_v34 = vmul.f32 %v3221_v54, %v6085_v38  ;;  %v3205_v54 = vmul.f32 %v3191_v36, %v6115_v6  ;;  %v7119_v6 = vrot.slane %v6223_v30, %v7107_v44 }
 0x542   :  { %v6321_v48 = vsel %vm378_vm8, %v2331_v57, %v6206_v59  ;;  %v6326_v9 = vsel %vm378_vm8, %v6188_v33, %v2331_v57  ;;  %3428 = vmatprep.subr.mxu0 %v3265_v41  ;;  %v6335_v53 = vsel %vm315_vm9, %v2289_v37, %v2291_v20  ;;  %3484 = vmatpush1.msra.mxu1 %v2404_v51  ;;  %v6351_v51 = vld [vmem:[#allocation10 + $0x42] ss:$8 sm:$0xf] }
 0x543   :  { %v3234_v59 = vmul.f32 %v3217_v40, %v6010_v47  ;;  %v6340_v33 = vsel %vm315_vm9, %v2287_v35, %v2289_v37  ;;  %v2362_v41 = vmul.f32 %v2351_v12, %v6326_v9  ;;  %v2363_v38 = vmul.f32 %v2355_v63, %v6321_v48  ;;  %3429 = vmatpush2.msra.mxu0 %v3264_v61 }
 0x544   :  { %v3135_v20 = vrot.slane %v6246_v4, %v7040_v22  ;;  %v3037_v47 = vrot.slane %v6314_v52, %v7107_v44  ;;  %3430 = vmatprep.subr.mxu0 %v3235_v34  ;;  %v3204_v35 = vmul.f32 %v7119_v6, %v6034_v18  ;;  %v3101_v36 = vrot.slane %v6267_v14, %v7106_v1 }
 0x545   :  { %v6353_v40 = vpop.permute.xlu1 %2964  ;;  %v6355_v12 = vpop.permute.xlu0 %2962  ;;  %v2321_v63 = vmul.f32 %v2313_v2, %v6335_v53  ;;  %3431 = vmatpush2.msra.mxu0 %v3234_v59  ;;  %3485 = vmatprep.subr.mxu1 %v2363_v38  ;;  %v3175_v37 = vmul.f32 %v3161_v62, %v6145_v16  ;;  %v3105_v57 = vrot.slane %v6267_v14, %v7040_v22 }
 0x546   :  { %v2320_v61 = vmul.f32 %v2309_v23, %v6340_v33  ;;  %3432 = vmatprep.subr.mxu0 %v3205_v54  ;;  %3486 = vmatpush1.msra.mxu1 %v2362_v41  ;;  %v7120_v18 = vrot.slane %v6204_v46, %v7038_v7  ;;  %v7121_v2 = vrot.slane %v6238_v26, %v7107_v44 }
 0x547   :  { %v3007_v16 = vrot.slane %v6351_v51, %v7107_v44  ;;  %3433 = vmatpush2.msra.mxu0 %v3204_v35  ;;  %3487 = vmatprep.subr.mxu1 %v2321_v63  ;;  %v7122_v62 = vrot.slane %v6204_v46, %v7040_v22  ;;  %v3145_v41 = vmul.f32 %v3131_v50, %v6181_v10  ;;  %v6397_v10 = vld [vmem:[#allocation10 + $0x41] ss:$8 sm:$0xf] }
 0x548   :  { %v3267_v34 = vmul.f32 %v7120_v18, %v5999_v32  ;;  %v3174_v59 = vmul.f32 %v7121_v2, %v6064_v19  ;;  %v3071_v32 = vrot.slane %v6279_v24, %v7106_v1  ;;  %3434 = vmatprep.subr.mxu0 %v3175_v37  ;;  %3488 = vmatpush1.msra.mxu1 %v2320_v61 }
 0x549   :  { %v3266_v23 = vmul.f32 %v7122_v62, %v6051_v29  ;;  %v6385_v38 = vpop.permute.xlu0 %2960  ;;  %v7123_v19 = vrot.slane %v6208_v31, %v7038_v7  ;;  %v7124_v6 = vrot.slane %v6246_v4, %v7107_v44  ;;  %v3075_v29 = vrot.slane %v6279_v24, %v7040_v22  ;;  %v2921_v50 = vpop.permute.xlu1 %2920 }
 0x54a   :  { %3435 = vmatpush2.msra.mxu0 %v3174_v59  ;;  %3499 = vmatprep.subr.mxu1 %v3267_v34  ;;  %v7125_v35 = vrot.slane %v6208_v31, %v7040_v22  ;;  %v3041_v37 = vrot.slane %v6314_v52, %v7106_v1  ;;  %v7127_v18 = vrot.slane %v6267_v14, %v7107_v44  ;;  %v6416_v31 = vld [vmem:[#allocation10 + $0x40] ss:$8 sm:$0xf] }
 0x54b   :  { %v3237_v54 = vmul.f32 %v7123_v19, %v6023_v27  ;;  %v3144_v46 = vmul.f32 %v7124_v6, %v6094_v43  ;;  %v3115_v27 = vmul.f32 %v3101_v36, %v6221_v28  ;;  %3436 = vmatprep.subr.mxu0 %v3145_v41  ;;  %3500 = vmatpush2.msra.mxu1 %v3266_v23 }
 0x54c   :  { %v3236_v63 = vmul.f32 %v7125_v35, %v6081_v21  ;;  %v7126_v43 = vrot.slane %v6223_v30, %v7038_v7  ;;  %v3114_v34 = vmul.f32 %v7127_v18, %v6124_v49  ;;  %v3011_v21 = vrot.slane %v6351_v51, %v7106_v1 }
 0x54d   :  { %3437 = vmatpush2.msra.mxu0 %v3144_v46  ;;  %3501 = vmatprep.subr.mxu1 %v3237_v54  ;;  %v7128_v28 = vrot.slane %v6223_v30, %v7040_v22  ;;  %v3085_v2 = vmul.f32 %v3071_v32, %v6293_v17  ;;  %v7129_v49 = vrot.slane %v6238_v26, %v7038_v7  ;;  %v2923_v41 = vpop.permute.xlu0 %2922 }
 0x54e   :  { %v3207_v61 = vmul.f32 %v7126_v43, %v6047_v45  ;;  %v2981_v45 = vrot.slane %v6397_v10, %v7106_v1  ;;  %3438 = vmatprep.subr.mxu0 %v3115_v27  ;;  %3502 = vmatpush2.msra.mxu1 %v3236_v63  ;;  %v3084_v62 = vmul.f32 %v3067_v58, %v6157_v15  ;;  %v3272_v63 = vld [vmem:[#allocation13] sm:$0xff] }
 0x54f   :  { %v3206_v36 = vmul.f32 %v7128_v28, %v6111_v56  ;;  %v3177_v59 = vmul.f32 %v7129_v49, %v6077_v8  ;;  %v2977_v56 = vrot.slane %v6397_v10, %v7107_v44  ;;  %3439 = vmatpush2.msra.mxu0 %v3114_v34  ;;  %v7130_v30 = vrot.slane %v6238_v26, %v7040_v22  ;;  %v2919_v26 = vpop.permute.xlu1 %2918 }
 0x550   :  { %3503 = vmatprep.subr.mxu1 %v3207_v61  ;;  %v3055_v23 = vmul.f32 %v3041_v37, %v6326_v9  ;;  %v2935_v8 = vrot.slane %v6416_v31, %v7107_v44  ;;  %3440 = vmatprep.subr.mxu0 %v3085_v2  ;;  %v7131_v15 = vrot.slane %v6246_v4, %v7038_v7 }
 0x551   :  { %v3176_v17 = vmul.f32 %v7130_v30, %v6141_v39  ;;  %3504 = vmatpush2.msra.mxu1 %v3206_v36  ;;  %v3054_v32 = vmul.f32 %v3037_v47, %v6193_v13  ;;  %v2969_v39 = vsel %vm1346_vm10, %v6355_v12, %v6353_v40  ;;  %3441 = vmatpush2.msra.mxu0 %v3084_v62  ;;  %v2967_v35 = vpop.permute.xlu0 %2966 }
 0x552   :  { %v3147_v58 = vmul.f32 %v7131_v15, %v6107_v5  ;;  %3505 = vmatprep.subr.mxu1 %v3177_v59  ;;  %v3025_v44 = vmul.f32 %v3011_v21, %v6340_v33  ;;  %v2970_v9 = vsel %vm1346_vm10, %v6385_v38, %v6355_v12  ;;  %v2939_v5 = vrot.slane %v6416_v31, %v7106_v1 }
 0x553   :  { %3442 = vmatprep.subr.mxu0 %v3055_v23  ;;  %3506 = vmatpush2.msra.mxu1 %v3176_v17  ;;  %v3146_v13 = vmul.f32 %v3135_v20, %v6177_v42  ;;  %v3024_v47 = vmul.f32 %v3007_v16, %v6250_v60  ;;  %v2927_v33 = vsel %vm1282_vm11, %v2921_v50, %v2923_v41  ;;  %v7133_v42 = vld [vmem:[#allocation126_spill] sm:$0xff]  ;;  %v2925_v37 = vpop.permute.xlu1 %2924 }
 0x554   :  { %3443 = vmatpush2.msra.mxu0 %v3054_v32  ;;  %3507 = vmatprep.subr.mxu1 %v3147_v58  ;;  %v7132_v12 = vrot.slane %v6267_v14, %v7038_v7  ;;  %v3049_v1 = vrot.slane %v6314_v52, %v7038_v7  ;;  %v2995_v54 = vmul.f32 %v2981_v45, %v2969_v39 }
 0x555   :  { %v2928_v4 = vsel %vm1282_vm11, %v2919_v26, %v2921_v50  ;;  %3444 = vmatprep.subr.mxu0 %v3025_v44  ;;  %v3116_v60 = vmul.f32 %v3105_v57, %v7133_v42  ;;  %v3045_v20 = vrot.slane %v6314_v52, %v7040_v22  ;;  %v2994_v16 = vmul.f32 %v2977_v56, %v2970_v9 }
 0x556   :  { %v3117_v19 = vmul.f32 %v7132_v12, %v6137_v3  ;;  %3508 = vmatpush2.msra.mxu1 %v3146_v13  ;;  %3445 = vmatpush2.msra.mxu0 %v3024_v47  ;;  %v7134_v3 = vld [vmem:[#allocation24_spill] sm:$0xff]  ;;  %v3019_v46 = vrot.slane %v6351_v51, %v7038_v7  ;;  %v2953_v50 = vmul.f32 %v2939_v5, %v2927_v33 }
 0x557   :  { %v3087_v6 = vmul.f32 %v3079_v0, %v7134_v3  ;;  %3446 = vmatprep.subr.mxu0 %v2995_v54  ;;  %v3086_v14 = vmul.f32 %v3075_v29, %v6288_v55  ;;  %v3015_v52 = vrot.slane %v6351_v51, %v7040_v22  ;;  %v2952_v57 = vmul.f32 %v2935_v8, %v2928_v4  ;;  %v7135_v0 = vld [vmem:[#allocation59_spill] sm:$0xff] }
 0x558   :  { %3509 = vmatprep.subr.mxu1 %v3117_v19  ;;  %3447 = vmatpush2.msra.mxu0 %v2994_v16  ;;  %v3057_v27 = vmul.f32 %v3049_v1, %v7135_v0  ;;  %v2989_v43 = vrot.slane %v6397_v10, %v7038_v7  ;;  %v3056_v61 = vmul.f32 %v3045_v20, %v6321_v48 }
 0x559   :  { %3510 = vmatpush2.msra.mxu1 %v3116_v60  ;;  %3448 = vmatprep.subr.mxu0 %v2953_v50  ;;  %v2985_v24 = vrot.slane %v6397_v10, %v7040_v22  ;;  %v2971_v55 = vsel %vm1346_vm10, %v2967_v35, %v6385_v38  ;;  %v3027_v51 = vmul.f32 %v3019_v46, %v6283_v25 }
 0x55a   :  { %3511 = vmatprep.subr.mxu1 %v3087_v6  ;;  %3449 = vmatpush2.msra.mxu0 %v2952_v57  ;;  %v2947_v29 = vrot.slane %v6416_v31, %v7038_v7  ;;  %v2968_v18 = vsel %vm1346_vm10, %v6353_v40, %v2967_v35  ;;  %v3026_v48 = vmul.f32 %v3015_v52, %v6335_v53 }
 0x55b   :  { %3512 = vmatpush2.msra.mxu1 %v3086_v14  ;;  %3451 = vmatmul.mubr.f32.vlgmr.msra.gmra.mxu0 %v3272_v63  ;;  %v2943_v10 = vrot.slane %v6416_v31, %v7040_v22  ;;  %v2929_v38 = vsel %vm1282_vm11, %v2925_v37, %v2919_v26  ;;  %v2926_v25 = vsel %vm1282_vm11, %v2923_v41, %v2925_v37 }
 0x55c   :  { %3513 = vmatprep.subr.mxu1 %v3057_v27  ;;  %v2997_v34 = vmul.f32 %v2989_v43, %v2971_v55  ;;  %v2996_v7 = vmul.f32 %v2985_v24, %v2968_v18  ;;  %v2955_v21 = vmul.f32 %v2947_v29, %v2929_v38 }
 0x55d   :  { %3514 = vmatpush2.msra.mxu1 %v3056_v61  ;;  %v2954_v40 = vmul.f32 %v2943_v10, %v2926_v25 }
 0x55e   :  { %3515 = vmatprep.subr.mxu1 %v3027_v51 }
 0x55f   :  { %3516 = vmatpush2.msra.mxu1 %v3026_v48 }
 0x560   :  { %3517 = vmatprep.subr.mxu1 %v2997_v34 }
 0x561   :  { %3518 = vmatpush2.msra.mxu1 %v2996_v7 }
 0x562   :  { %3519 = vmatprep.subr.mxu1 %v2955_v21 }
 0x563   :  { %3520 = vmatpush2.msra.mxu1 %v2954_v40 }
 0x564   :  { %3522 = vmatmul.mubr.f32.vlgmr.msra.gmra.mxu1 %v3272_v63 }
 0x61b   :  { %v3452_v53 = vpop.f32.mrf.mxu0 }
 0x61d   :  { %v3454_v22 = vpop.f32.mrf.mxu0 }
 0x61e   :  { %v3528_v31 = vadd.f32 %v3454_v22, %v3452_v53 }
 0x624   :  { %v3523_v28 = vpop.f32.mrf.mxu1 }
 0x625   :  { %v3529_v36 = vadd.f32 %v3528_v31, %v3523_v28 }
 0x626   :  { %v3525_v2 = vpop.f32.mrf.mxu1 }
 0x627   :  { %v3530_v45 = vadd.f32 %v3529_v36, %v3525_v2 }
 0x629   :  { %3531 = vadd.xlane.f32.xlu0 %v3530_v45 }
 0x6b2   :  { %v3532_v11 = vpop.xlane.xlu0 %3531 }
 0x6b3   :  { %v3533_v49 = vmul.f32 0.001953125, %v3532_v11 }
 0x6b5   :  { %v3534_v59 = vsub.f32 %v3452_v53, %v3533_v49  ;;  %v3535_v62 = vsub.f32 %v3454_v22, %v3533_v49  ;;  %v3536_v56 = vsub.f32 %v3523_v28, %v3533_v49  ;;  %v3537_v30 = vsub.f32 %v3525_v2, %v3533_v49 }
 0x6b7   :  { %v3538_v17 = vmul.f32 %v3534_v59, %v3534_v59  ;;  %v3539_v23 = vmul.f32 %v3535_v62, %v3535_v62  ;;  %v3540_v8 = vmul.f32 %v3536_v56, %v3536_v56  ;;  %v3541_v15 = vmul.f32 %v3537_v30, %v3537_v30 }
 0x6b9   :  { %v3542_v41 = vadd.f32 %v3539_v23, %v3538_v17 }
 0x6bb   :  { %v3543_v58 = vadd.f32 %v3542_v41, %v3540_v8 }
 0x6bd   :  { %v3544_v32 = vadd.f32 %v3543_v58, %v3541_v15 }
 0x6bf   :  { %3545 = vadd.xlane.f32.xlu1 %v3544_v32 }
 0x748   :  { %v3546_v39 = vpop.xlane.xlu1 %3545 }
 0x749   :  { %v3547_v26 = vmul.f32 0.001953125, %v3546_v39 }
 0x74b   :  { %v3548_v44 = vadd.f32 1e-05, %v3547_v26 }
 0x74d   :  { %3615 = vrsqrt.f32 %v3548_v44 }
 0x75a   :  { %v3616_v9 = vpop.eup %3615 }
 0x75b   :  { %v3550_v5 = vmul.f32 %v3616_v9, %v3534_v59  ;;  %v3551_v13 = vmul.f32 %v3616_v9, %v3535_v62  ;;  %v3552_v47 = vmul.f32 %v3616_v9, %v3536_v56  ;;  %v3553_v33 = vmul.f32 %v3616_v9, %v3537_v30 }
 0x75d   :  { %v3554_v12 = vmax.f32 %v3550_v5, 0.0  ;;  %v3555_v19 = vmax.f32 %v3551_v13, 0.0  ;;  %v3556_v1 = vmax.f32 %v3552_v47, 0.0  ;;  %v3557_v54 = vmax.f32 %v3553_v33, 0.0 }
 0x75f   :  { %3558 = vst [vmem:[#allocation15] sm:$0xff] %v3554_v12  ;;  %3559 = vst [vmem:[#allocation15 + $0x8] sm:$0xff] %v3555_v19 }
 0x760   :  { %3560 = vst [vmem:[#allocation15 + $0x10] sm:$0xff] %v3556_v1  ;;  %3561 = vst [vmem:[#allocation15 + $0x18] sm:$0xff] %v3557_v54 }
 0x761   :  { %3760 = shalt.err (!%p3757_p6)
}
 0x762   :  { %3571 = dma.vmem_to_hbm [thread:$0]  %s3569_s16, 512, %s6522_s6, [#allocation6]  }
 0x763   :  { %3777 = dma.done.wait [#allocation6], 512  }
 0x764   :  { %3778 = vsyncadd [#allocation6], 4294966784 }
 0x765   :  { %3575 = vsyncpa [#allocation5], 1 }
 0x766   :  { %3576 = vsyncpa [#allocation8], 1 }
 0x767   :  { %3577 = vsyncpa [#allocation11], 1 }
 0x768   :  { %3578 = vsyncpa [#allocation14], 1 }
 0x769   :  { %3579 = vsyncpa [#allocation6], 1 }

</bundles_post_ra>
